<compile_context>
chip_gen: v5e
topology: v5e:2x2
jax: 0.10.0
libtpu: 0.0.40
codegen_flags: <defaults>
</compile_context>

<pallas_src>
import jax
import jax.numpy as jnp
from jax.experimental import pallas as pl
from jax.experimental.pallas import tpu as pltpu

V_NODES = 24          # fixed by the module (adj is 24x24)
V_PAD = 32            # padded joint count: 4 frames * 32 joints = 128 lanes exactly
BN_EPS = 1e-5


# ------------------------------ fused kernel ------------------------------ #
def make_fused_stgcn_kernel(has_residual, lane_tiles, inv_count):
    """Build the fused kernel.

    has_residual : tuple of Python bools (conv residual vs identity), per layer.
    lane_tiles   : number of 128-lane tiles in the activation (B*T*32 / 128).
    inv_count    : 1 / (B*T*V)  (real, un-padded element count for BN stats).
    """

    def kernel(*refs):
        x_ref = refs[0]
        out_ref = refs[-1]
        w = refs[1:-1]
        x = x_ref[...]                                  # (C, L) lane-dense activation
        idx = 0
        for has_res in has_residual:
            agg = w[idx][...]                           # (128,128) kron(I_4, softmax(adj) padded)
            w1 = w[idx + 1][...]                        # (O, C)
            gamma = w[idx + 2][...]                     # (O, 1)
            beta = w[idx + 3][...]                      # (O, 1)
            w2 = w[idx + 4][...]                        # (O, O)
            b2 = w[idx + 5][...]                        # (O, 1)
            if has_res:
                wr = w[idx + 6][...]                    # (O, C)
                br = w[idx + 7][...]                    # (O, 1)
                idx += 8
                r = jnp.dot(wr, x, preferred_element_type=jnp.float32) + br
            else:
                idx += 6
                r = x                                   # identity residual

            # Graph aggregation over joints: one lane-tile-aligned matmul per 128 lanes.
            parts = [
                jnp.dot(x[:, g * 128:(g + 1) * 128], agg,
                        preferred_element_type=jnp.float32)
                for g in range(lane_tiles)
            ]
            xg = parts[0] if lane_tiles == 1 else jnp.concatenate(parts, axis=1)

            # Spatial 1x1 conv (channel mixing).  Bias b1 omitted: it cancels exactly
            # in training-mode BatchNorm (h - mean).
            h = jnp.dot(w1, xg, preferred_element_type=jnp.float32)

            # Fused BatchNorm2d (training-mode batch statistics) + ReLU.
            # Padded lanes of h are exactly 0, so lane-wide sums / inv_count are the
            # exact per-channel statistics over the real B*T*V elements.
            mean = jnp.sum(h, axis=1, keepdims=True) * inv_count
            meansq = jnp.sum(h * h, axis=1, keepdims=True) * inv_count
            var = meansq - mean * mean
            scale = gamma * jax.lax.rsqrt(var + BN_EPS)
            shift = beta - mean * scale
            hn = jnp.maximum(h * scale + shift, 0.0)

            # Temporal conv (kernel_size=1 -> 1x1 channel mixing) + residual add.
            x = jnp.dot(w2, hn, preferred_element_type=jnp.float32) + b2 + r

        out_ref[...] = x

    return kernel


def stgcn_forward(x_nchw, kernel_layers):
    """Full fused STGCN forward.  Input/output in PyTorch NCHW = (B, C, T, V)."""
    B, C, T, V = x_nchw.shape
    N = B * T
    assert V == V_NODES, "adjacency is 24x24; V must be 24"
    assert (N * V_PAD) % 128 == 0, "B*T must be a multiple of 4 for 128-lane tiling"
    L = N * V_PAD
    lane_tiles = L // 128

    # (B,C,T,V) -> pad joints to 32 -> (C, B*T*32) lane-dense slab.
    xp = jnp.pad(x_nchw, ((0, 0), (0, 0), (0, 0), (0, V_PAD - V)))
    x2 = jnp.transpose(xp, (1, 0, 2, 3)).reshape(C, L)

    flat_params = []
    has_residual = []
    for p in kernel_layers:
        flat_params += [p['agg'], p['w1'], p['gamma'], p['beta'], p['w2'], p['b2']]
        if p['wr'] is not None:
            flat_params += [p['wr'], p['br']]
            has_residual.append(True)
        else:
            has_residual.append(False)

    O = kernel_layers[-1]['w2'].shape[0]
    inputs = (x2, *flat_params)

    # Advisory cost estimate for XLA scheduling around the custom call.
    flops = 0
    for p in kernel_layers:
        o, cin = p['w1'].shape
        flops += 2 * cin * 128 * L          # graph aggregation (per-tile matmuls)
        flops += 2 * o * cin * L            # spatial 1x1 conv
        flops += 2 * o * o * L              # temporal 1x1 conv
        if p['wr'] is not None:
            flops += 2 * o * cin * L        # residual 1x1 conv
        flops += 8 * o * L                  # BN + ReLU + adds
    in_bytes = sum(int(a.size) * 4 for a in inputs)
    out_bytes = O * L * 4

    out2 = pl.pallas_call(
        make_fused_stgcn_kernel(tuple(has_residual), lane_tiles, 1.0 / (N * V)),
        out_shape=jax.ShapeDtypeStruct((O, L), jnp.float32),
        in_specs=[pl.BlockSpec(memory_space=pltpu.MemorySpace.VMEM) for _ in inputs],
        out_specs=pl.BlockSpec(memory_space=pltpu.MemorySpace.VMEM),
        compiler_params=pltpu.CompilerParams(vmem_limit_bytes=8 * 1024 * 1024),
        cost_estimate=pl.CostEstimate(flops=int(flops),
                                      transcendentals=int(len(kernel_layers) * O),
                                      bytes_accessed=int(in_bytes + out_bytes)),
    )(*inputs)

    # (O, B*T*32) -> drop joint padding -> (B, O, T, V)
    out = out2.reshape(O, B, T, V_PAD)[:, :, :, :V]
    return jnp.transpose(out, (1, 0, 2, 3))


# ------------------------------- glue / init ------------------------------ #
def init_torch_params(key, in_channels=3, hidden=32, num_layers=6, V=V_NODES):
    """Deterministic parameters with the same shapes PyTorch __init__ creates."""
    layers = []
    for i in range(num_layers):
        cin = in_channels if i == 0 else hidden
        key, k1, k2, k3, k4, k5, k6 = jax.random.split(key, 7)
        p = dict(
            adj=jnp.ones((V, V), jnp.float32) * 0.1,                        # nn.Parameter(ones*0.1)
            w1=jax.random.normal(k1, (hidden, cin), jnp.float32) * 0.1,     # spatial Conv2d (O,C,1,1)
            b1=jax.random.normal(k2, (hidden,), jnp.float32) * 0.1,
            w2=jax.random.normal(k3, (hidden, hidden), jnp.float32) * 0.1,  # temporal Conv2d
            b2=jax.random.normal(k4, (hidden,), jnp.float32) * 0.1,
            gamma=jnp.ones((hidden,), jnp.float32),                         # BN weight default
            beta=jnp.zeros((hidden,), jnp.float32),                         # BN bias default
            wr=(jax.random.normal(k5, (hidden, cin), jnp.float32) * 0.1
                if cin != hidden else None),                                # residual Conv2d / Identity
            br=(jax.random.normal(k6, (hidden,), jnp.float32) * 0.1
                if cin != hidden else None),
        )
        layers.append(p)
    return layers


def to_kernel_params(torch_layers):
    """Prepare torch params for the fused kernel.

    softmax(adj) is a fixed function of the (frozen) adj parameter, so it is
    precomputed here, zero-padded from (24,24) to (32,32) and expanded to
    kron(I_4, .) of shape (128,128) so the in-kernel aggregation is a plain
    lane-tile-aligned 2-D matmul.  This expansion is constant-sized (does NOT
    grow with B*T).  b1 is intentionally dropped (absorbed by training-mode BN).
    """
    eye4 = jnp.eye(4, dtype=jnp.float32)
    out = []
    for p in torch_layers:
        O = p['w1'].shape[0]
        adj_sm = jax.nn.softmax(p['adj'], axis=-1)                           # (24,24)
        adj_pad = jnp.pad(adj_sm, ((0, V_PAD - V_NODES), (0, V_PAD - V_NODES)))
        out.append(dict(
            agg=jnp.kron(eye4, adj_pad),                                     # (128,128)
            w1=p['w1'],                                                      # (O, C)
            gamma=p['gamma'].reshape(O, 1),
            beta=p['beta'].reshape(O, 1),
            w2=p['w2'],                                                      # (O, O)
            b2=p['b2'].reshape(O, 1),
            wr=p['wr'],                                                      # (O, C) or None
            br=(p['br'].reshape(O, 1) if p['br'] is not None else None),
        ))
    return out


# ------------------------- pure-JAX reference (NCHW) ----------------------- #
def stgcn_reference(x, torch_layers):
    for p in torch_layers:
        if p['wr'] is None:
            residual = x
        else:
            residual = jnp.einsum('oc,bctv->botv', p['wr'], x) + p['br'][None, :, None, None]
        adj = jax.nn.softmax(p['adj'], axis=-1)
        h = jnp.einsum('bctv,vm->bctm', x, adj)
        h = jnp.einsum('oc,bctv->botv', p['w1'], h) + p['b1'][None, :, None, None]
        mean = jnp.mean(h, axis=(0, 2, 3), keepdims=True)
        var = jnp.mean((h - mean) ** 2, axis=(0, 2, 3), keepdims=True)
        h = (h - mean) / jnp.sqrt(var + BN_EPS)
        h = h * p['gamma'][None, :, None, None] + p['beta'][None, :, None, None]
        h = jnp.maximum(h, 0.0)
        h = jnp.einsum('oc,bctv->botv', p['w2'], h) + p['b2'][None, :, None, None]
        x = h + residual
    return x


# ---------------------------------- main ----------------------------------- #
if __name__ == "__main__":
    B, C_IN, T, V = 2, 3, 8, V_NODES            # V must be 24 (adj is 24x24)
    HIDDEN, NUM_LAYERS = 32, 6

    key = jax.random.PRNGKey(0)
    key, kx = jax.random.split(key)
    x = jax.random.normal(kx, (B, C_IN, T, V), jnp.float32)

    torch_layers = init_torch_params(key, C_IN, HIDDEN, NUM_LAYERS, V)
    kernel_layers = to_kernel_params(torch_layers)

    out = stgcn_forward(x, kernel_layers)
    out = jax.block_until_ready(out)
    assert out.shape == (B, HIDDEN, T, V), out.shape

    # TODO(synk): BatchNorm running-stat (buffer) updates are not modeled;
    # forward output uses training-mode batch statistics (the module default).
    ref = stgcn_reference(x, torch_layers)
    if not jnp.allclose(out, ref, rtol=1e-3, atol=1e-3):
        err = float(jnp.max(jnp.abs(out - ref)))
        raise AssertionError(f"Pallas STGCN output mismatch vs reference (max abs err {err})")

    print("KERNEL_OK")
</pallas_src>

<mosaic_0001>
module attributes {stable_mosaic.version = 11 : i64} {
  func.func @kernel(%arg0: memref<3x512xf32, #tpu.memory_space<vmem>>, %arg1: memref<128x128xf32, #tpu.memory_space<vmem>>, %arg2: memref<32x3xf32, #tpu.memory_space<vmem>>, %arg3: memref<32x1xf32, #tpu.memory_space<vmem>>, %arg4: memref<32x1xf32, #tpu.memory_space<vmem>>, %arg5: memref<32x32xf32, #tpu.memory_space<vmem>>, %arg6: memref<32x1xf32, #tpu.memory_space<vmem>>, %arg7: memref<32x3xf32, #tpu.memory_space<vmem>>, %arg8: memref<32x1xf32, #tpu.memory_space<vmem>>, %arg9: memref<128x128xf32, #tpu.memory_space<vmem>>, %arg10: memref<32x32xf32, #tpu.memory_space<vmem>>, %arg11: memref<32x1xf32, #tpu.memory_space<vmem>>, %arg12: memref<32x1xf32, #tpu.memory_space<vmem>>, %arg13: memref<32x32xf32, #tpu.memory_space<vmem>>, %arg14: memref<32x1xf32, #tpu.memory_space<vmem>>, %arg15: memref<128x128xf32, #tpu.memory_space<vmem>>, %arg16: memref<32x32xf32, #tpu.memory_space<vmem>>, %arg17: memref<32x1xf32, #tpu.memory_space<vmem>>, %arg18: memref<32x1xf32, #tpu.memory_space<vmem>>, %arg19: memref<32x32xf32, #tpu.memory_space<vmem>>, %arg20: memref<32x1xf32, #tpu.memory_space<vmem>>, %arg21: memref<128x128xf32, #tpu.memory_space<vmem>>, %arg22: memref<32x32xf32, #tpu.memory_space<vmem>>, %arg23: memref<32x1xf32, #tpu.memory_space<vmem>>, %arg24: memref<32x1xf32, #tpu.memory_space<vmem>>, %arg25: memref<32x32xf32, #tpu.memory_space<vmem>>, %arg26: memref<32x1xf32, #tpu.memory_space<vmem>>, %arg27: memref<128x128xf32, #tpu.memory_space<vmem>>, %arg28: memref<32x32xf32, #tpu.memory_space<vmem>>, %arg29: memref<32x1xf32, #tpu.memory_space<vmem>>, %arg30: memref<32x1xf32, #tpu.memory_space<vmem>>, %arg31: memref<32x32xf32, #tpu.memory_space<vmem>>, %arg32: memref<32x1xf32, #tpu.memory_space<vmem>>, %arg33: memref<128x128xf32, #tpu.memory_space<vmem>>, %arg34: memref<32x32xf32, #tpu.memory_space<vmem>>, %arg35: memref<32x1xf32, #tpu.memory_space<vmem>>, %arg36: memref<32x1xf32, #tpu.memory_space<vmem>>, %arg37: memref<32x32xf32, #tpu.memory_space<vmem>>, %arg38: memref<32x1xf32, #tpu.memory_space<vmem>>, %arg39: memref<32x512xf32, #tpu.memory_space<vmem>>) attributes {dimension_semantics = [], scalar_prefetch = 0 : i64, scratch_operands = 0 : i64, tpu.core_type = #tpu.core_type<tc>} {
    %c0 = arith.constant 0 : index
    %c0_0 = arith.constant 0 : index
    %0 = vector.load %arg0[%c0, %c0_0] : memref<3x512xf32, #tpu.memory_space<vmem>>, vector<3x512xf32>
    %c0_1 = arith.constant 0 : index
    %c0_2 = arith.constant 0 : index
    %1 = vector.load %arg1[%c0_1, %c0_2] : memref<128x128xf32, #tpu.memory_space<vmem>>, vector<128x128xf32>
    %c0_3 = arith.constant 0 : index
    %c0_4 = arith.constant 0 : index
    %2 = vector.load %arg2[%c0_3, %c0_4] : memref<32x3xf32, #tpu.memory_space<vmem>>, vector<32x3xf32>
    %c0_5 = arith.constant 0 : index
    %c0_6 = arith.constant 0 : index
    %3 = vector.load %arg3[%c0_5, %c0_6] : memref<32x1xf32, #tpu.memory_space<vmem>>, vector<32x1xf32>
    %c0_7 = arith.constant 0 : index
    %c0_8 = arith.constant 0 : index
    %4 = vector.load %arg4[%c0_7, %c0_8] : memref<32x1xf32, #tpu.memory_space<vmem>>, vector<32x1xf32>
    %c0_9 = arith.constant 0 : index
    %c0_10 = arith.constant 0 : index
    %5 = vector.load %arg5[%c0_9, %c0_10] : memref<32x32xf32, #tpu.memory_space<vmem>>, vector<32x32xf32>
    %c0_11 = arith.constant 0 : index
    %c0_12 = arith.constant 0 : index
    %6 = vector.load %arg6[%c0_11, %c0_12] : memref<32x1xf32, #tpu.memory_space<vmem>>, vector<32x1xf32>
    %c0_13 = arith.constant 0 : index
    %c0_14 = arith.constant 0 : index
    %7 = vector.load %arg7[%c0_13, %c0_14] : memref<32x3xf32, #tpu.memory_space<vmem>>, vector<32x3xf32>
    %c0_15 = arith.constant 0 : index
    %c0_16 = arith.constant 0 : index
    %8 = vector.load %arg8[%c0_15, %c0_16] : memref<32x1xf32, #tpu.memory_space<vmem>>, vector<32x1xf32>
    %cst = arith.constant dense<0.000000e+00> : vector<32x512xf32>
    %9 = tpu.matmul %7, %0, %cst {dimension_numbers = #tpu.dot_dimension_numbers<[1], [0], [0], [1], [0, 0, 1, 1], [], []>} : vector<32x3xf32>, vector<3x512xf32>, vector<32x512xf32> -> vector<32x512xf32>
    %10 = vector.broadcast %8 : vector<32x1xf32> to vector<32x512xf32>
    %11 = arith.addf %9, %10 : vector<32x512xf32>
    %12 = vector.extract_strided_slice %0 {offsets = [0, 0], sizes = [3, 128], strides = [1, 1]} : vector<3x512xf32> to vector<3x128xf32>
    %cst_17 = arith.constant dense<0.000000e+00> : vector<3x128xf32>
    %13 = tpu.matmul %12, %1, %cst_17 {dimension_numbers = #tpu.dot_dimension_numbers<[1], [0], [0], [1], [0, 0, 1, 1], [], []>} : vector<3x128xf32>, vector<128x128xf32>, vector<3x128xf32> -> vector<3x128xf32>
    %14 = vector.extract_strided_slice %0 {offsets = [0, 128], sizes = [3, 128], strides = [1, 1]} : vector<3x512xf32> to vector<3x128xf32>
    %cst_18 = arith.constant dense<0.000000e+00> : vector<3x128xf32>
    %15 = tpu.matmul %14, %1, %cst_18 {dimension_numbers = #tpu.dot_dimension_numbers<[1], [0], [0], [1], [0, 0, 1, 1], [], []>} : vector<3x128xf32>, vector<128x128xf32>, vector<3x128xf32> -> vector<3x128xf32>
    %16 = vector.extract_strided_slice %0 {offsets = [0, 256], sizes = [3, 128], strides = [1, 1]} : vector<3x512xf32> to vector<3x128xf32>
    %cst_19 = arith.constant dense<0.000000e+00> : vector<3x128xf32>
    %17 = tpu.matmul %16, %1, %cst_19 {dimension_numbers = #tpu.dot_dimension_numbers<[1], [0], [0], [1], [0, 0, 1, 1], [], []>} : vector<3x128xf32>, vector<128x128xf32>, vector<3x128xf32> -> vector<3x128xf32>
    %18 = vector.extract_strided_slice %0 {offsets = [0, 384], sizes = [3, 128], strides = [1, 1]} : vector<3x512xf32> to vector<3x128xf32>
    %cst_20 = arith.constant dense<0.000000e+00> : vector<3x128xf32>
    %19 = tpu.matmul %18, %1, %cst_20 {dimension_numbers = #tpu.dot_dimension_numbers<[1], [0], [0], [1], [0, 0, 1, 1], [], []>} : vector<3x128xf32>, vector<128x128xf32>, vector<3x128xf32> -> vector<3x128xf32>
    %20 = tpu.concatenate %13, %15, %17, %19 in 1 : vector<3x128xf32>, vector<3x128xf32>, vector<3x128xf32>, vector<3x128xf32> -> vector<3x512xf32>
    %cst_21 = arith.constant dense<0.000000e+00> : vector<32x512xf32>
    %21 = tpu.matmul %2, %20, %cst_21 {dimension_numbers = #tpu.dot_dimension_numbers<[1], [0], [0], [1], [0, 0, 1, 1], [], []>} : vector<32x3xf32>, vector<3x512xf32>, vector<32x512xf32> -> vector<32x512xf32>
    %cst_22 = arith.constant dense<0.000000e+00> : vector<32xf32>
    %22 = vector.multi_reduction <add>, %21, %cst_22 [1] : vector<32x512xf32> to vector<32xf32>
    %23 = vector.shape_cast %22 : vector<32xf32> to vector<32x1xf32>
    %cst_23 = arith.constant 0.00260416674 : f32
    %24 = vector.broadcast %cst_23 : f32 to vector<32x1xf32>
    %25 = arith.mulf %23, %24 : vector<32x1xf32>
    %26 = arith.mulf %21, %21 : vector<32x512xf32>
    %cst_24 = arith.constant dense<0.000000e+00> : vector<32xf32>
    %27 = vector.multi_reduction <add>, %26, %cst_24 [1] : vector<32x512xf32> to vector<32xf32>
    %28 = vector.shape_cast %27 : vector<32xf32> to vector<32x1xf32>
    %cst_25 = arith.constant 0.00260416674 : f32
    %29 = vector.broadcast %cst_25 : f32 to vector<32x1xf32>
    %30 = arith.mulf %28, %29 : vector<32x1xf32>
    %31 = arith.mulf %25, %25 : vector<32x1xf32>
    %32 = arith.subf %30, %31 : vector<32x1xf32>
    %cst_26 = arith.constant 9.99999974E-6 : f32
    %33 = vector.broadcast %cst_26 : f32 to vector<32x1xf32>
    %34 = arith.addf %32, %33 : vector<32x1xf32>
    %35 = math.rsqrt %34 : vector<32x1xf32>
    %36 = arith.mulf %3, %35 : vector<32x1xf32>
    %37 = arith.mulf %25, %36 : vector<32x1xf32>
    %38 = arith.subf %4, %37 : vector<32x1xf32>
    %39 = vector.broadcast %36 : vector<32x1xf32> to vector<32x512xf32>
    %40 = arith.mulf %21, %39 : vector<32x512xf32>
    %41 = vector.broadcast %38 : vector<32x1xf32> to vector<32x512xf32>
    %42 = arith.addf %40, %41 : vector<32x512xf32>
    %cst_27 = arith.constant 0.000000e+00 : f32
    %43 = vector.broadcast %cst_27 : f32 to vector<32x512xf32>
    %44 = arith.maximumf %42, %43 : vector<32x512xf32>
    %cst_28 = arith.constant dense<0.000000e+00> : vector<32x512xf32>
    %45 = tpu.matmul %5, %44, %cst_28 {dimension_numbers = #tpu.dot_dimension_numbers<[1], [0], [0], [1], [0, 0, 1, 1], [], []>} : vector<32x32xf32>, vector<32x512xf32>, vector<32x512xf32> -> vector<32x512xf32>
    %46 = vector.broadcast %6 : vector<32x1xf32> to vector<32x512xf32>
    %47 = arith.addf %45, %46 : vector<32x512xf32>
    %48 = arith.addf %47, %11 : vector<32x512xf32>
    %c0_29 = arith.constant 0 : index
    %c0_30 = arith.constant 0 : index
    %49 = vector.load %arg9[%c0_29, %c0_30] : memref<128x128xf32, #tpu.memory_space<vmem>>, vector<128x128xf32>
    %c0_31 = arith.constant 0 : index
    %c0_32 = arith.constant 0 : index
    %50 = vector.load %arg10[%c0_31, %c0_32] : memref<32x32xf32, #tpu.memory_space<vmem>>, vector<32x32xf32>
    %c0_33 = arith.constant 0 : index
    %c0_34 = arith.constant 0 : index
    %51 = vector.load %arg11[%c0_33, %c0_34] : memref<32x1xf32, #tpu.memory_space<vmem>>, vector<32x1xf32>
    %c0_35 = arith.constant 0 : index
    %c0_36 = arith.constant 0 : index
    %52 = vector.load %arg12[%c0_35, %c0_36] : memref<32x1xf32, #tpu.memory_space<vmem>>, vector<32x1xf32>
    %c0_37 = arith.constant 0 : index
    %c0_38 = arith.constant 0 : index
    %53 = vector.load %arg13[%c0_37, %c0_38] : memref<32x32xf32, #tpu.memory_space<vmem>>, vector<32x32xf32>
    %c0_39 = arith.constant 0 : index
    %c0_40 = arith.constant 0 : index
    %54 = vector.load %arg14[%c0_39, %c0_40] : memref<32x1xf32, #tpu.memory_space<vmem>>, vector<32x1xf32>
    %55 = vector.extract_strided_slice %48 {offsets = [0, 0], sizes = [32, 128], strides = [1, 1]} : vector<32x512xf32> to vector<32x128xf32>
    %cst_41 = arith.constant dense<0.000000e+00> : vector<32x128xf32>
    %56 = tpu.matmul %55, %49, %cst_41 {dimension_numbers = #tpu.dot_dimension_numbers<[1], [0], [0], [1], [0, 0, 1, 1], [], []>} : vector<32x128xf32>, vector<128x128xf32>, vector<32x128xf32> -> vector<32x128xf32>
    %57 = vector.extract_strided_slice %48 {offsets = [0, 128], sizes = [32, 128], strides = [1, 1]} : vector<32x512xf32> to vector<32x128xf32>
    %cst_42 = arith.constant dense<0.000000e+00> : vector<32x128xf32>
    %58 = tpu.matmul %57, %49, %cst_42 {dimension_numbers = #tpu.dot_dimension_numbers<[1], [0], [0], [1], [0, 0, 1, 1], [], []>} : vector<32x128xf32>, vector<128x128xf32>, vector<32x128xf32> -> vector<32x128xf32>
    %59 = vector.extract_strided_slice %48 {offsets = [0, 256], sizes = [32, 128], strides = [1, 1]} : vector<32x512xf32> to vector<32x128xf32>
    %cst_43 = arith.constant dense<0.000000e+00> : vector<32x128xf32>
    %60 = tpu.matmul %59, %49, %cst_43 {dimension_numbers = #tpu.dot_dimension_numbers<[1], [0], [0], [1], [0, 0, 1, 1], [], []>} : vector<32x128xf32>, vector<128x128xf32>, vector<32x128xf32> -> vector<32x128xf32>
    %61 = vector.extract_strided_slice %48 {offsets = [0, 384], sizes = [32, 128], strides = [1, 1]} : vector<32x512xf32> to vector<32x128xf32>
    %cst_44 = arith.constant dense<0.000000e+00> : vector<32x128xf32>
    %62 = tpu.matmul %61, %49, %cst_44 {dimension_numbers = #tpu.dot_dimension_numbers<[1], [0], [0], [1], [0, 0, 1, 1], [], []>} : vector<32x128xf32>, vector<128x128xf32>, vector<32x128xf32> -> vector<32x128xf32>
    %63 = tpu.concatenate %56, %58, %60, %62 in 1 : vector<32x128xf32>, vector<32x128xf32>, vector<32x128xf32>, vector<32x128xf32> -> vector<32x512xf32>
    %cst_45 = arith.constant dense<0.000000e+00> : vector<32x512xf32>
    %64 = tpu.matmul %50, %63, %cst_45 {dimension_numbers = #tpu.dot_dimension_numbers<[1], [0], [0], [1], [0, 0, 1, 1], [], []>} : vector<32x32xf32>, vector<32x512xf32>, vector<32x512xf32> -> vector<32x512xf32>
    %cst_46 = arith.constant dense<0.000000e+00> : vector<32xf32>
    %65 = vector.multi_reduction <add>, %64, %cst_46 [1] : vector<32x512xf32> to vector<32xf32>
    %66 = vector.shape_cast %65 : vector<32xf32> to vector<32x1xf32>
    %cst_47 = arith.constant 0.00260416674 : f32
    %67 = vector.broadcast %cst_47 : f32 to vector<32x1xf32>
    %68 = arith.mulf %66, %67 : vector<32x1xf32>
    %69 = arith.mulf %64, %64 : vector<32x512xf32>
    %cst_48 = arith.constant dense<0.000000e+00> : vector<32xf32>
    %70 = vector.multi_reduction <add>, %69, %cst_48 [1] : vector<32x512xf32> to vector<32xf32>
    %71 = vector.shape_cast %70 : vector<32xf32> to vector<32x1xf32>
    %cst_49 = arith.constant 0.00260416674 : f32
    %72 = vector.broadcast %cst_49 : f32 to vector<32x1xf32>
    %73 = arith.mulf %71, %72 : vector<32x1xf32>
    %74 = arith.mulf %68, %68 : vector<32x1xf32>
    %75 = arith.subf %73, %74 : vector<32x1xf32>
    %cst_50 = arith.constant 9.99999974E-6 : f32
    %76 = vector.broadcast %cst_50 : f32 to vector<32x1xf32>
    %77 = arith.addf %75, %76 : vector<32x1xf32>
    %78 = math.rsqrt %77 : vector<32x1xf32>
    %79 = arith.mulf %51, %78 : vector<32x1xf32>
    %80 = arith.mulf %68, %79 : vector<32x1xf32>
    %81 = arith.subf %52, %80 : vector<32x1xf32>
    %82 = vector.broadcast %79 : vector<32x1xf32> to vector<32x512xf32>
    %83 = arith.mulf %64, %82 : vector<32x512xf32>
    %84 = vector.broadcast %81 : vector<32x1xf32> to vector<32x512xf32>
    %85 = arith.addf %83, %84 : vector<32x512xf32>
    %cst_51 = arith.constant 0.000000e+00 : f32
    %86 = vector.broadcast %cst_51 : f32 to vector<32x512xf32>
    %87 = arith.maximumf %85, %86 : vector<32x512xf32>
    %cst_52 = arith.constant dense<0.000000e+00> : vector<32x512xf32>
    %88 = tpu.matmul %53, %87, %cst_52 {dimension_numbers = #tpu.dot_dimension_numbers<[1], [0], [0], [1], [0, 0, 1, 1], [], []>} : vector<32x32xf32>, vector<32x512xf32>, vector<32x512xf32> -> vector<32x512xf32>
    %89 = vector.broadcast %54 : vector<32x1xf32> to vector<32x512xf32>
    %90 = arith.addf %88, %89 : vector<32x512xf32>
    %91 = arith.addf %90, %48 : vector<32x512xf32>
    %c0_53 = arith.constant 0 : index
    %c0_54 = arith.constant 0 : index
    %92 = vector.load %arg15[%c0_53, %c0_54] : memref<128x128xf32, #tpu.memory_space<vmem>>, vector<128x128xf32>
    %c0_55 = arith.constant 0 : index
    %c0_56 = arith.constant 0 : index
    %93 = vector.load %arg16[%c0_55, %c0_56] : memref<32x32xf32, #tpu.memory_space<vmem>>, vector<32x32xf32>
    %c0_57 = arith.constant 0 : index
    %c0_58 = arith.constant 0 : index
    %94 = vector.load %arg17[%c0_57, %c0_58] : memref<32x1xf32, #tpu.memory_space<vmem>>, vector<32x1xf32>
    %c0_59 = arith.constant 0 : index
    %c0_60 = arith.constant 0 : index
    %95 = vector.load %arg18[%c0_59, %c0_60] : memref<32x1xf32, #tpu.memory_space<vmem>>, vector<32x1xf32>
    %c0_61 = arith.constant 0 : index
    %c0_62 = arith.constant 0 : index
    %96 = vector.load %arg19[%c0_61, %c0_62] : memref<32x32xf32, #tpu.memory_space<vmem>>, vector<32x32xf32>
    %c0_63 = arith.constant 0 : index
    %c0_64 = arith.constant 0 : index
    %97 = vector.load %arg20[%c0_63, %c0_64] : memref<32x1xf32, #tpu.memory_space<vmem>>, vector<32x1xf32>
    %98 = vector.extract_strided_slice %91 {offsets = [0, 0], sizes = [32, 128], strides = [1, 1]} : vector<32x512xf32> to vector<32x128xf32>
    %cst_65 = arith.constant dense<0.000000e+00> : vector<32x128xf32>
    %99 = tpu.matmul %98, %92, %cst_65 {dimension_numbers = #tpu.dot_dimension_numbers<[1], [0], [0], [1], [0, 0, 1, 1], [], []>} : vector<32x128xf32>, vector<128x128xf32>, vector<32x128xf32> -> vector<32x128xf32>
    %100 = vector.extract_strided_slice %91 {offsets = [0, 128], sizes = [32, 128], strides = [1, 1]} : vector<32x512xf32> to vector<32x128xf32>
    %cst_66 = arith.constant dense<0.000000e+00> : vector<32x128xf32>
    %101 = tpu.matmul %100, %92, %cst_66 {dimension_numbers = #tpu.dot_dimension_numbers<[1], [0], [0], [1], [0, 0, 1, 1], [], []>} : vector<32x128xf32>, vector<128x128xf32>, vector<32x128xf32> -> vector<32x128xf32>
    %102 = vector.extract_strided_slice %91 {offsets = [0, 256], sizes = [32, 128], strides = [1, 1]} : vector<32x512xf32> to vector<32x128xf32>
    %cst_67 = arith.constant dense<0.000000e+00> : vector<32x128xf32>
    %103 = tpu.matmul %102, %92, %cst_67 {dimension_numbers = #tpu.dot_dimension_numbers<[1], [0], [0], [1], [0, 0, 1, 1], [], []>} : vector<32x128xf32>, vector<128x128xf32>, vector<32x128xf32> -> vector<32x128xf32>
    %104 = vector.extract_strided_slice %91 {offsets = [0, 384], sizes = [32, 128], strides = [1, 1]} : vector<32x512xf32> to vector<32x128xf32>
    %cst_68 = arith.constant dense<0.000000e+00> : vector<32x128xf32>
    %105 = tpu.matmul %104, %92, %cst_68 {dimension_numbers = #tpu.dot_dimension_numbers<[1], [0], [0], [1], [0, 0, 1, 1], [], []>} : vector<32x128xf32>, vector<128x128xf32>, vector<32x128xf32> -> vector<32x128xf32>
    %106 = tpu.concatenate %99, %101, %103, %105 in 1 : vector<32x128xf32>, vector<32x128xf32>, vector<32x128xf32>, vector<32x128xf32> -> vector<32x512xf32>
    %cst_69 = arith.constant dense<0.000000e+00> : vector<32x512xf32>
    %107 = tpu.matmul %93, %106, %cst_69 {dimension_numbers = #tpu.dot_dimension_numbers<[1], [0], [0], [1], [0, 0, 1, 1], [], []>} : vector<32x32xf32>, vector<32x512xf32>, vector<32x512xf32> -> vector<32x512xf32>
    %cst_70 = arith.constant dense<0.000000e+00> : vector<32xf32>
    %108 = vector.multi_reduction <add>, %107, %cst_70 [1] : vector<32x512xf32> to vector<32xf32>
    %109 = vector.shape_cast %108 : vector<32xf32> to vector<32x1xf32>
    %cst_71 = arith.constant 0.00260416674 : f32
    %110 = vector.broadcast %cst_71 : f32 to vector<32x1xf32>
    %111 = arith.mulf %109, %110 : vector<32x1xf32>
    %112 = arith.mulf %107, %107 : vector<32x512xf32>
    %cst_72 = arith.constant dense<0.000000e+00> : vector<32xf32>
    %113 = vector.multi_reduction <add>, %112, %cst_72 [1] : vector<32x512xf32> to vector<32xf32>
    %114 = vector.shape_cast %113 : vector<32xf32> to vector<32x1xf32>
    %cst_73 = arith.constant 0.00260416674 : f32
    %115 = vector.broadcast %cst_73 : f32 to vector<32x1xf32>
    %116 = arith.mulf %114, %115 : vector<32x1xf32>
    %117 = arith.mulf %111, %111 : vector<32x1xf32>
    %118 = arith.subf %116, %117 : vector<32x1xf32>
    %cst_74 = arith.constant 9.99999974E-6 : f32
    %119 = vector.broadcast %cst_74 : f32 to vector<32x1xf32>
    %120 = arith.addf %118, %119 : vector<32x1xf32>
    %121 = math.rsqrt %120 : vector<32x1xf32>
    %122 = arith.mulf %94, %121 : vector<32x1xf32>
    %123 = arith.mulf %111, %122 : vector<32x1xf32>
    %124 = arith.subf %95, %123 : vector<32x1xf32>
    %125 = vector.broadcast %122 : vector<32x1xf32> to vector<32x512xf32>
    %126 = arith.mulf %107, %125 : vector<32x512xf32>
    %127 = vector.broadcast %124 : vector<32x1xf32> to vector<32x512xf32>
    %128 = arith.addf %126, %127 : vector<32x512xf32>
    %cst_75 = arith.constant 0.000000e+00 : f32
    %129 = vector.broadcast %cst_75 : f32 to vector<32x512xf32>
    %130 = arith.maximumf %128, %129 : vector<32x512xf32>
    %cst_76 = arith.constant dense<0.000000e+00> : vector<32x512xf32>
    %131 = tpu.matmul %96, %130, %cst_76 {dimension_numbers = #tpu.dot_dimension_numbers<[1], [0], [0], [1], [0, 0, 1, 1], [], []>} : vector<32x32xf32>, vector<32x512xf32>, vector<32x512xf32> -> vector<32x512xf32>
    %132 = vector.broadcast %97 : vector<32x1xf32> to vector<32x512xf32>
    %133 = arith.addf %131, %132 : vector<32x512xf32>
    %134 = arith.addf %133, %91 : vector<32x512xf32>
    %c0_77 = arith.constant 0 : index
    %c0_78 = arith.constant 0 : index
    %135 = vector.load %arg21[%c0_77, %c0_78] : memref<128x128xf32, #tpu.memory_space<vmem>>, vector<128x128xf32>
    %c0_79 = arith.constant 0 : index
    %c0_80 = arith.constant 0 : index
    %136 = vector.load %arg22[%c0_79, %c0_80] : memref<32x32xf32, #tpu.memory_space<vmem>>, vector<32x32xf32>
    %c0_81 = arith.constant 0 : index
    %c0_82 = arith.constant 0 : index
    %137 = vector.load %arg23[%c0_81, %c0_82] : memref<32x1xf32, #tpu.memory_space<vmem>>, vector<32x1xf32>
    %c0_83 = arith.constant 0 : index
    %c0_84 = arith.constant 0 : index
    %138 = vector.load %arg24[%c0_83, %c0_84] : memref<32x1xf32, #tpu.memory_space<vmem>>, vector<32x1xf32>
    %c0_85 = arith.constant 0 : index
    %c0_86 = arith.constant 0 : index
    %139 = vector.load %arg25[%c0_85, %c0_86] : memref<32x32xf32, #tpu.memory_space<vmem>>, vector<32x32xf32>
    %c0_87 = arith.constant 0 : index
    %c0_88 = arith.constant 0 : index
    %140 = vector.load %arg26[%c0_87, %c0_88] : memref<32x1xf32, #tpu.memory_space<vmem>>, vector<32x1xf32>
    %141 = vector.extract_strided_slice %134 {offsets = [0, 0], sizes = [32, 128], strides = [1, 1]} : vector<32x512xf32> to vector<32x128xf32>
    %cst_89 = arith.constant dense<0.000000e+00> : vector<32x128xf32>
    %142 = tpu.matmul %141, %135, %cst_89 {dimension_numbers = #tpu.dot_dimension_numbers<[1], [0], [0], [1], [0, 0, 1, 1], [], []>} : vector<32x128xf32>, vector<128x128xf32>, vector<32x128xf32> -> vector<32x128xf32>
    %143 = vector.extract_strided_slice %134 {offsets = [0, 128], sizes = [32, 128], strides = [1, 1]} : vector<32x512xf32> to vector<32x128xf32>
    %cst_90 = arith.constant dense<0.000000e+00> : vector<32x128xf32>
    %144 = tpu.matmul %143, %135, %cst_90 {dimension_numbers = #tpu.dot_dimension_numbers<[1], [0], [0], [1], [0, 0, 1, 1], [], []>} : vector<32x128xf32>, vector<128x128xf32>, vector<32x128xf32> -> vector<32x128xf32>
    %145 = vector.extract_strided_slice %134 {offsets = [0, 256], sizes = [32, 128], strides = [1, 1]} : vector<32x512xf32> to vector<32x128xf32>
    %cst_91 = arith.constant dense<0.000000e+00> : vector<32x128xf32>
    %146 = tpu.matmul %145, %135, %cst_91 {dimension_numbers = #tpu.dot_dimension_numbers<[1], [0], [0], [1], [0, 0, 1, 1], [], []>} : vector<32x128xf32>, vector<128x128xf32>, vector<32x128xf32> -> vector<32x128xf32>
    %147 = vector.extract_strided_slice %134 {offsets = [0, 384], sizes = [32, 128], strides = [1, 1]} : vector<32x512xf32> to vector<32x128xf32>
    %cst_92 = arith.constant dense<0.000000e+00> : vector<32x128xf32>
    %148 = tpu.matmul %147, %135, %cst_92 {dimension_numbers = #tpu.dot_dimension_numbers<[1], [0], [0], [1], [0, 0, 1, 1], [], []>} : vector<32x128xf32>, vector<128x128xf32>, vector<32x128xf32> -> vector<32x128xf32>
    %149 = tpu.concatenate %142, %144, %146, %148 in 1 : vector<32x128xf32>, vector<32x128xf32>, vector<32x128xf32>, vector<32x128xf32> -> vector<32x512xf32>
    %cst_93 = arith.constant dense<0.000000e+00> : vector<32x512xf32>
    %150 = tpu.matmul %136, %149, %cst_93 {dimension_numbers = #tpu.dot_dimension_numbers<[1], [0], [0], [1], [0, 0, 1, 1], [], []>} : vector<32x32xf32>, vector<32x512xf32>, vector<32x512xf32> -> vector<32x512xf32>
    %cst_94 = arith.constant dense<0.000000e+00> : vector<32xf32>
    %151 = vector.multi_reduction <add>, %150, %cst_94 [1] : vector<32x512xf32> to vector<32xf32>
    %152 = vector.shape_cast %151 : vector<32xf32> to vector<32x1xf32>
    %cst_95 = arith.constant 0.00260416674 : f32
    %153 = vector.broadcast %cst_95 : f32 to vector<32x1xf32>
    %154 = arith.mulf %152, %153 : vector<32x1xf32>
    %155 = arith.mulf %150, %150 : vector<32x512xf32>
    %cst_96 = arith.constant dense<0.000000e+00> : vector<32xf32>
    %156 = vector.multi_reduction <add>, %155, %cst_96 [1] : vector<32x512xf32> to vector<32xf32>
    %157 = vector.shape_cast %156 : vector<32xf32> to vector<32x1xf32>
    %cst_97 = arith.constant 0.00260416674 : f32
    %158 = vector.broadcast %cst_97 : f32 to vector<32x1xf32>
    %159 = arith.mulf %157, %158 : vector<32x1xf32>
    %160 = arith.mulf %154, %154 : vector<32x1xf32>
    %161 = arith.subf %159, %160 : vector<32x1xf32>
    %cst_98 = arith.constant 9.99999974E-6 : f32
    %162 = vector.broadcast %cst_98 : f32 to vector<32x1xf32>
    %163 = arith.addf %161, %162 : vector<32x1xf32>
    %164 = math.rsqrt %163 : vector<32x1xf32>
    %165 = arith.mulf %137, %164 : vector<32x1xf32>
    %166 = arith.mulf %154, %165 : vector<32x1xf32>
    %167 = arith.subf %138, %166 : vector<32x1xf32>
    %168 = vector.broadcast %165 : vector<32x1xf32> to vector<32x512xf32>
    %169 = arith.mulf %150, %168 : vector<32x512xf32>
    %170 = vector.broadcast %167 : vector<32x1xf32> to vector<32x512xf32>
    %171 = arith.addf %169, %170 : vector<32x512xf32>
    %cst_99 = arith.constant 0.000000e+00 : f32
    %172 = vector.broadcast %cst_99 : f32 to vector<32x512xf32>
    %173 = arith.maximumf %171, %172 : vector<32x512xf32>
    %cst_100 = arith.constant dense<0.000000e+00> : vector<32x512xf32>
    %174 = tpu.matmul %139, %173, %cst_100 {dimension_numbers = #tpu.dot_dimension_numbers<[1], [0], [0], [1], [0, 0, 1, 1], [], []>} : vector<32x32xf32>, vector<32x512xf32>, vector<32x512xf32> -> vector<32x512xf32>
    %175 = vector.broadcast %140 : vector<32x1xf32> to vector<32x512xf32>
    %176 = arith.addf %174, %175 : vector<32x512xf32>
    %177 = arith.addf %176, %134 : vector<32x512xf32>
    %c0_101 = arith.constant 0 : index
    %c0_102 = arith.constant 0 : index
    %178 = vector.load %arg27[%c0_101, %c0_102] : memref<128x128xf32, #tpu.memory_space<vmem>>, vector<128x128xf32>
    %c0_103 = arith.constant 0 : index
    %c0_104 = arith.constant 0 : index
    %179 = vector.load %arg28[%c0_103, %c0_104] : memref<32x32xf32, #tpu.memory_space<vmem>>, vector<32x32xf32>
    %c0_105 = arith.constant 0 : index
    %c0_106 = arith.constant 0 : index
    %180 = vector.load %arg29[%c0_105, %c0_106] : memref<32x1xf32, #tpu.memory_space<vmem>>, vector<32x1xf32>
    %c0_107 = arith.constant 0 : index
    %c0_108 = arith.constant 0 : index
    %181 = vector.load %arg30[%c0_107, %c0_108] : memref<32x1xf32, #tpu.memory_space<vmem>>, vector<32x1xf32>
    %c0_109 = arith.constant 0 : index
    %c0_110 = arith.constant 0 : index
    %182 = vector.load %arg31[%c0_109, %c0_110] : memref<32x32xf32, #tpu.memory_space<vmem>>, vector<32x32xf32>
    %c0_111 = arith.constant 0 : index
    %c0_112 = arith.constant 0 : index
    %183 = vector.load %arg32[%c0_111, %c0_112] : memref<32x1xf32, #tpu.memory_space<vmem>>, vector<32x1xf32>
    %184 = vector.extract_strided_slice %177 {offsets = [0, 0], sizes = [32, 128], strides = [1, 1]} : vector<32x512xf32> to vector<32x128xf32>
    %cst_113 = arith.constant dense<0.000000e+00> : vector<32x128xf32>
    %185 = tpu.matmul %184, %178, %cst_113 {dimension_numbers = #tpu.dot_dimension_numbers<[1], [0], [0], [1], [0, 0, 1, 1], [], []>} : vector<32x128xf32>, vector<128x128xf32>, vector<32x128xf32> -> vector<32x128xf32>
    %186 = vector.extract_strided_slice %177 {offsets = [0, 128], sizes = [32, 128], strides = [1, 1]} : vector<32x512xf32> to vector<32x128xf32>
    %cst_114 = arith.constant dense<0.000000e+00> : vector<32x128xf32>
    %187 = tpu.matmul %186, %178, %cst_114 {dimension_numbers = #tpu.dot_dimension_numbers<[1], [0], [0], [1], [0, 0, 1, 1], [], []>} : vector<32x128xf32>, vector<128x128xf32>, vector<32x128xf32> -> vector<32x128xf32>
    %188 = vector.extract_strided_slice %177 {offsets = [0, 256], sizes = [32, 128], strides = [1, 1]} : vector<32x512xf32> to vector<32x128xf32>
    %cst_115 = arith.constant dense<0.000000e+00> : vector<32x128xf32>
    %189 = tpu.matmul %188, %178, %cst_115 {dimension_numbers = #tpu.dot_dimension_numbers<[1], [0], [0], [1], [0, 0, 1, 1], [], []>} : vector<32x128xf32>, vector<128x128xf32>, vector<32x128xf32> -> vector<32x128xf32>
    %190 = vector.extract_strided_slice %177 {offsets = [0, 384], sizes = [32, 128], strides = [1, 1]} : vector<32x512xf32> to vector<32x128xf32>
    %cst_116 = arith.constant dense<0.000000e+00> : vector<32x128xf32>
    %191 = tpu.matmul %190, %178, %cst_116 {dimension_numbers = #tpu.dot_dimension_numbers<[1], [0], [0], [1], [0, 0, 1, 1], [], []>} : vector<32x128xf32>, vector<128x128xf32>, vector<32x128xf32> -> vector<32x128xf32>
    %192 = tpu.concatenate %185, %187, %189, %191 in 1 : vector<32x128xf32>, vector<32x128xf32>, vector<32x128xf32>, vector<32x128xf32> -> vector<32x512xf32>
    %cst_117 = arith.constant dense<0.000000e+00> : vector<32x512xf32>
    %193 = tpu.matmul %179, %192, %cst_117 {dimension_numbers = #tpu.dot_dimension_numbers<[1], [0], [0], [1], [0, 0, 1, 1], [], []>} : vector<32x32xf32>, vector<32x512xf32>, vector<32x512xf32> -> vector<32x512xf32>
    %cst_118 = arith.constant dense<0.000000e+00> : vector<32xf32>
    %194 = vector.multi_reduction <add>, %193, %cst_118 [1] : vector<32x512xf32> to vector<32xf32>
    %195 = vector.shape_cast %194 : vector<32xf32> to vector<32x1xf32>
    %cst_119 = arith.constant 0.00260416674 : f32
    %196 = vector.broadcast %cst_119 : f32 to vector<32x1xf32>
    %197 = arith.mulf %195, %196 : vector<32x1xf32>
    %198 = arith.mulf %193, %193 : vector<32x512xf32>
    %cst_120 = arith.constant dense<0.000000e+00> : vector<32xf32>
    %199 = vector.multi_reduction <add>, %198, %cst_120 [1] : vector<32x512xf32> to vector<32xf32>
    %200 = vector.shape_cast %199 : vector<32xf32> to vector<32x1xf32>
    %cst_121 = arith.constant 0.00260416674 : f32
    %201 = vector.broadcast %cst_121 : f32 to vector<32x1xf32>
    %202 = arith.mulf %200, %201 : vector<32x1xf32>
    %203 = arith.mulf %197, %197 : vector<32x1xf32>
    %204 = arith.subf %202, %203 : vector<32x1xf32>
    %cst_122 = arith.constant 9.99999974E-6 : f32
    %205 = vector.broadcast %cst_122 : f32 to vector<32x1xf32>
    %206 = arith.addf %204, %205 : vector<32x1xf32>
    %207 = math.rsqrt %206 : vector<32x1xf32>
    %208 = arith.mulf %180, %207 : vector<32x1xf32>
    %209 = arith.mulf %197, %208 : vector<32x1xf32>
    %210 = arith.subf %181, %209 : vector<32x1xf32>
    %211 = vector.broadcast %208 : vector<32x1xf32> to vector<32x512xf32>
    %212 = arith.mulf %193, %211 : vector<32x512xf32>
    %213 = vector.broadcast %210 : vector<32x1xf32> to vector<32x512xf32>
    %214 = arith.addf %212, %213 : vector<32x512xf32>
    %cst_123 = arith.constant 0.000000e+00 : f32
    %215 = vector.broadcast %cst_123 : f32 to vector<32x512xf32>
    %216 = arith.maximumf %214, %215 : vector<32x512xf32>
    %cst_124 = arith.constant dense<0.000000e+00> : vector<32x512xf32>
    %217 = tpu.matmul %182, %216, %cst_124 {dimension_numbers = #tpu.dot_dimension_numbers<[1], [0], [0], [1], [0, 0, 1, 1], [], []>} : vector<32x32xf32>, vector<32x512xf32>, vector<32x512xf32> -> vector<32x512xf32>
    %218 = vector.broadcast %183 : vector<32x1xf32> to vector<32x512xf32>
    %219 = arith.addf %217, %218 : vector<32x512xf32>
    %220 = arith.addf %219, %177 : vector<32x512xf32>
    %c0_125 = arith.constant 0 : index
    %c0_126 = arith.constant 0 : index
    %221 = vector.load %arg33[%c0_125, %c0_126] : memref<128x128xf32, #tpu.memory_space<vmem>>, vector<128x128xf32>
    %c0_127 = arith.constant 0 : index
    %c0_128 = arith.constant 0 : index
    %222 = vector.load %arg34[%c0_127, %c0_128] : memref<32x32xf32, #tpu.memory_space<vmem>>, vector<32x32xf32>
    %c0_129 = arith.constant 0 : index
    %c0_130 = arith.constant 0 : index
    %223 = vector.load %arg35[%c0_129, %c0_130] : memref<32x1xf32, #tpu.memory_space<vmem>>, vector<32x1xf32>
    %c0_131 = arith.constant 0 : index
    %c0_132 = arith.constant 0 : index
    %224 = vector.load %arg36[%c0_131, %c0_132] : memref<32x1xf32, #tpu.memory_space<vmem>>, vector<32x1xf32>
    %c0_133 = arith.constant 0 : index
    %c0_134 = arith.constant 0 : index
    %225 = vector.load %arg37[%c0_133, %c0_134] : memref<32x32xf32, #tpu.memory_space<vmem>>, vector<32x32xf32>
    %c0_135 = arith.constant 0 : index
    %c0_136 = arith.constant 0 : index
    %226 = vector.load %arg38[%c0_135, %c0_136] : memref<32x1xf32, #tpu.memory_space<vmem>>, vector<32x1xf32>
    %227 = vector.extract_strided_slice %220 {offsets = [0, 0], sizes = [32, 128], strides = [1, 1]} : vector<32x512xf32> to vector<32x128xf32>
    %cst_137 = arith.constant dense<0.000000e+00> : vector<32x128xf32>
    %228 = tpu.matmul %227, %221, %cst_137 {dimension_numbers = #tpu.dot_dimension_numbers<[1], [0], [0], [1], [0, 0, 1, 1], [], []>} : vector<32x128xf32>, vector<128x128xf32>, vector<32x128xf32> -> vector<32x128xf32>
    %229 = vector.extract_strided_slice %220 {offsets = [0, 128], sizes = [32, 128], strides = [1, 1]} : vector<32x512xf32> to vector<32x128xf32>
    %cst_138 = arith.constant dense<0.000000e+00> : vector<32x128xf32>
    %230 = tpu.matmul %229, %221, %cst_138 {dimension_numbers = #tpu.dot_dimension_numbers<[1], [0], [0], [1], [0, 0, 1, 1], [], []>} : vector<32x128xf32>, vector<128x128xf32>, vector<32x128xf32> -> vector<32x128xf32>
    %231 = vector.extract_strided_slice %220 {offsets = [0, 256], sizes = [32, 128], strides = [1, 1]} : vector<32x512xf32> to vector<32x128xf32>
    %cst_139 = arith.constant dense<0.000000e+00> : vector<32x128xf32>
    %232 = tpu.matmul %231, %221, %cst_139 {dimension_numbers = #tpu.dot_dimension_numbers<[1], [0], [0], [1], [0, 0, 1, 1], [], []>} : vector<32x128xf32>, vector<128x128xf32>, vector<32x128xf32> -> vector<32x128xf32>
    %233 = vector.extract_strided_slice %220 {offsets = [0, 384], sizes = [32, 128], strides = [1, 1]} : vector<32x512xf32> to vector<32x128xf32>
    %cst_140 = arith.constant dense<0.000000e+00> : vector<32x128xf32>
    %234 = tpu.matmul %233, %221, %cst_140 {dimension_numbers = #tpu.dot_dimension_numbers<[1], [0], [0], [1], [0, 0, 1, 1], [], []>} : vector<32x128xf32>, vector<128x128xf32>, vector<32x128xf32> -> vector<32x128xf32>
    %235 = tpu.concatenate %228, %230, %232, %234 in 1 : vector<32x128xf32>, vector<32x128xf32>, vector<32x128xf32>, vector<32x128xf32> -> vector<32x512xf32>
    %cst_141 = arith.constant dense<0.000000e+00> : vector<32x512xf32>
    %236 = tpu.matmul %222, %235, %cst_141 {dimension_numbers = #tpu.dot_dimension_numbers<[1], [0], [0], [1], [0, 0, 1, 1], [], []>} : vector<32x32xf32>, vector<32x512xf32>, vector<32x512xf32> -> vector<32x512xf32>
    %cst_142 = arith.constant dense<0.000000e+00> : vector<32xf32>
    %237 = vector.multi_reduction <add>, %236, %cst_142 [1] : vector<32x512xf32> to vector<32xf32>
    %238 = vector.shape_cast %237 : vector<32xf32> to vector<32x1xf32>
    %cst_143 = arith.constant 0.00260416674 : f32
    %239 = vector.broadcast %cst_143 : f32 to vector<32x1xf32>
    %240 = arith.mulf %238, %239 : vector<32x1xf32>
    %241 = arith.mulf %236, %236 : vector<32x512xf32>
    %cst_144 = arith.constant dense<0.000000e+00> : vector<32xf32>
    %242 = vector.multi_reduction <add>, %241, %cst_144 [1] : vector<32x512xf32> to vector<32xf32>
    %243 = vector.shape_cast %242 : vector<32xf32> to vector<32x1xf32>
    %cst_145 = arith.constant 0.00260416674 : f32
    %244 = vector.broadcast %cst_145 : f32 to vector<32x1xf32>
    %245 = arith.mulf %243, %244 : vector<32x1xf32>
    %246 = arith.mulf %240, %240 : vector<32x1xf32>
    %247 = arith.subf %245, %246 : vector<32x1xf32>
    %cst_146 = arith.constant 9.99999974E-6 : f32
    %248 = vector.broadcast %cst_146 : f32 to vector<32x1xf32>
    %249 = arith.addf %247, %248 : vector<32x1xf32>
    %250 = math.rsqrt %249 : vector<32x1xf32>
    %251 = arith.mulf %223, %250 : vector<32x1xf32>
    %252 = arith.mulf %240, %251 : vector<32x1xf32>
    %253 = arith.subf %224, %252 : vector<32x1xf32>
    %254 = vector.broadcast %251 : vector<32x1xf32> to vector<32x512xf32>
    %255 = arith.mulf %236, %254 : vector<32x512xf32>
    %256 = vector.broadcast %253 : vector<32x1xf32> to vector<32x512xf32>
    %257 = arith.addf %255, %256 : vector<32x512xf32>
    %cst_147 = arith.constant 0.000000e+00 : f32
    %258 = vector.broadcast %cst_147 : f32 to vector<32x512xf32>
    %259 = arith.maximumf %257, %258 : vector<32x512xf32>
    %cst_148 = arith.constant dense<0.000000e+00> : vector<32x512xf32>
    %260 = tpu.matmul %225, %259, %cst_148 {dimension_numbers = #tpu.dot_dimension_numbers<[1], [0], [0], [1], [0, 0, 1, 1], [], []>} : vector<32x32xf32>, vector<32x512xf32>, vector<32x512xf32> -> vector<32x512xf32>
    %261 = vector.broadcast %226 : vector<32x1xf32> to vector<32x512xf32>
    %262 = arith.addf %260, %261 : vector<32x512xf32>
    %263 = arith.addf %262, %220 : vector<32x512xf32>
    %c0_149 = arith.constant 0 : index
    %c0_150 = arith.constant 0 : index
    %264 = vector.load %arg39[%c0_149, %c0_150] : memref<32x512xf32, #tpu.memory_space<vmem>>, vector<32x512xf32>
    tpu.vector_store %arg39[%c0_149, %c0_150], %263 {strides = array<i32>} : memref<32x512xf32, #tpu.memory_space<vmem>>, vector<32x512xf32>,
    return
  }
}

</mosaic_0001>

<bundles_post_ra>
// kernel: tpu_custom_call.1
= control target key start
LH: loop header
LB: loop body
LE: loop exit
PB: predicated region body
PF: predicated region fallthrough
CT: control target
= control target key end

     0   :  { %s5156_s6 = smov 1   ;;  %s5157_s10 = smov 2   ;;  %s6947_s0 = inlined_call_operand.smem [shape: u32[40], index: -1, kind: input, shape index: {}] }
   0x1   :  { %s5220_s5 = sld [smem:[%s6947_s0]]   ;;  %s5158_s14 = smov 3  }
   0x2   :  { %s5225_s9 = sld [smem:[%s6947_s0 + %s5156_s6]]   ;;  %s5159_s18 = smov 4  }
   0x3   :  { %s5230_s13 = sld [smem:[%s6947_s0 + %s5157_s10]]   ;;  %s5160_s22 = smov 5  }
   0x4   :  { %s5235_s17 = sld [smem:[%s6947_s0 + %s5158_s14]]   ;;  %s5161_s26 = smov 6  }
   0x5   :  { %s5240_s21 = sld [smem:[%s6947_s0 + %s5159_s18]]   ;;  %s5162_s30 = smov 7  }
   0x6   :  { %s5245_s25 = sld [smem:[%s6947_s0 + %s5160_s22]]   ;;  %s5163_s4 = smov 8  }
   0x7   :  { %s5250_s29 = sld [smem:[%s6947_s0 + %s5161_s26]]   ;;  %s5164_s10 = smov 9  }
   0x8   :  { %s5255_s3 = sld [smem:[%s6947_s0 + %s5162_s30]]   ;;  %s5165_s15 = smov 10  }
   0x9   :  { %s5260_s8 = sld [smem:[%s6947_s0 + %s5163_s4]]   ;;  %s5166_s20 = smov 11  }
   0xa   :  { %s5265_s14 = sld [smem:[%s6947_s0 + %s5164_s10]]   ;;  %s5167_s26 = smov 12  }
   0xb   :  { %6970 = sst [smem:[#allocation28_spill]] %s5240_s21  ;;  %s5168_s1 = smov 13  }
   0xc   :  { %6971 = sst [smem:[#allocation29_spill]] %s5245_s25  ;;  %s5169_s7 = smov 14  }
   0xd   :  { %6972 = sst [smem:[#allocation30_spill]] %s5250_s29  ;;  %s5171_s22 = smov 16  }
   0xe   :  { %s5270_s19 = sld [smem:[%s6947_s0 + %s5165_s15]]   ;;  %s5170_s15 = smov 15  }
   0xf   :  { %6973 = sst [smem:[#allocation31_spill]] %s5260_s8  ;;  %s5172_s28 = smov 17  }
  0x10   :  { %6974 = sst [smem:[#allocation32_spill]] %s5265_s14 }
  0x11   :  { %s5275_s24 = sld [smem:[%s6947_s0 + %s5166_s20]]  }
  0x12   :  { %s5280_s30 = sld [smem:[%s6947_s0 + %s5167_s26]]  }
  0x13   :  { %s5285_s6 = sld [smem:[%s6947_s0 + %s5168_s1]]  }
  0x14   :  { %6975 = sst [smem:[#allocation33_spill]] %s5270_s19 }
  0x15   :  { %s5290_s12 = sld [smem:[%s6947_s0 + %s5169_s7]]   ;;  %s5173_s7 = smov 18  }
  0x16   :  { %s5295_s20 = sld [smem:[%s6947_s0 + %s5170_s15]]   ;;  %s5174_s15 = smov 19  }
  0x17   :  { %6976 = sst [smem:[#allocation34_spill]] %s5275_s24 }
  0x18   :  { %6977 = sst [smem:[#allocation35_spill]] %s5280_s30 }
  0x19   :  { %s5300_s27 = sld [smem:[%s6947_s0 + %s5171_s22]]   ;;  %s5175_s22 = smov 20  }
  0x1a   :  { %s5305_s4 = sld [smem:[%s6947_s0 + %s5172_s28]]   ;;  %s5176_s28 = smov 21  }
  0x1b   :  { %6978 = sst [smem:[#allocation36_spill]] %s5290_s12 }
  0x1c   :  { %6979 = sst [smem:[#allocation37_spill]] %s5295_s20 }
  0x1d   :  { %s5310_s12 = sld [smem:[%s6947_s0 + %s5173_s7]]   ;;  %s5177_s7 = smov 22  }
  0x1e   :  { %s5315_s20 = sld [smem:[%s6947_s0 + %s5174_s15]]   ;;  %s5178_s15 = smov 23  }
  0x1f   :  { %s5320_s30 = sld [smem:[%s6947_s0 + %s5175_s22]]   ;;  %s5179_s22 = smov 24  }
  0x20   :  { %6980 = sst [smem:[#allocation38_spill]] %s5305_s4 }
  0x21   :  { %s5325_s4 = sld [smem:[%s6947_s0 + %s5176_s28]]   ;;  %s5180_s28 = smov 25  }
  0x22   :  { %s5335_s24 = sld [smem:[%s6947_s0 + %s5178_s15]]   ;;  %s5182_s15 = smov 27  }
  0x23   :  { %6981 = sst [smem:[#allocation39_spill]] %s5310_s12 }
  0x24   :  { %s5330_s12 = sld [smem:[%s6947_s0 + %s5177_s7]]   ;;  %s5181_s7 = smov 26  }
  0x25   :  { %6982 = sst [smem:[#allocation40_spill]] %s5320_s30 }
  0x26   :  { %s5340_s30 = sld [smem:[%s6947_s0 + %s5179_s22]]   ;;  %s5183_s22 = smov 28  }
  0x27   :  { %6983 = sst [smem:[#allocation41_spill]] %s5325_s4 }
  0x28   :  { %6984 = sst [smem:[#allocation42_spill]] %s5335_s24 }
  0x29   :  { %s5345_s4 = sld [smem:[%s6947_s0 + %s5180_s28]]   ;;  %s5184_s28 = smov 29  }
  0x2a   :  { %s5350_s19 = sld [smem:[%s6947_s0 + %s5181_s7]]   ;;  %s5185_s7 = smov 30  }
  0x2b   :  { %s5355_s24 = sld [smem:[%s6947_s0 + %s5182_s15]]   ;;  %s5186_s15 = smov 31  }
  0x2c   :  { %6985 = sst [smem:[#allocation43_spill]] %s5340_s30 }
  0x2d   :  { %s5360_s30 = sld [smem:[%s6947_s0 + %s5183_s22]]   ;;  %s5187_s22 = smov 32  }
  0x2e   :  { %s5365_s14 = sld [smem:[%s6947_s0 + %s5184_s28]]   ;;  %s5188_s28 = smov 33  }
  0x2f   :  { %s5380_s25 = sld [smem:[%s6947_s0 + %s5187_s22]]   ;;  %s5191_s22 = smov 36  }
  0x30   :  { %6986 = sst [smem:[#allocation44_spill]] %s5350_s19 }
  0x31   :  { %6987 = sst [smem:[#allocation45_spill]] %s5355_s24 }
  0x32   :  { %s5370_s19 = sld [smem:[%s6947_s0 + %s5185_s7]]   ;;  %s5189_s7 = smov 34  }
  0x33   :  { %s5375_s24 = sld [smem:[%s6947_s0 + %s5186_s15]]   ;;  %s5190_s15 = smov 35  }
  0x34   :  { %6988 = sst [smem:[#allocation46_spill]] %s5365_s14 }
  0x35   :  { %6990 = sst [smem:[#allocation48_spill]] %s5380_s25 }
  0x36   :  { %s5385_s14 = sld [smem:[%s6947_s0 + %s5188_s28]]   ;;  %s5192_s28 = smov 37  }
  0x37   :  { %s5395_s21 = sld [smem:[%s6947_s0 + %s5190_s15]]   ;;  %s5194_s15 = smov 39  }
  0x38   :  { %6989 = sst [smem:[#allocation47_spill]] %s5370_s19 }
  0x39   :  { %s5390_s19 = sld [smem:[%s6947_s0 + %s5189_s7]]   ;;  %s5193_s7 = smov 38  }
  0x3a   :  { %s5400_s25 = sld [smem:[%s6947_s0 + %s5191_s22]]  }
  0x3b   :  { %s5405_s29 = sld [smem:[%s6947_s0 + %s5192_s28]]  }
  0x3c   :  { %s5410_s8 = sld [smem:[%s6947_s0 + %s5193_s7]]  }
  0x3d   :  { %6991 = sst [smem:[#allocation49_spill]] %s5395_s21 }
  0x3e   :  { %s5415_s21 = sld [smem:[%s6947_s0 + %s5194_s15]]  }
  0x3f   :  { %84 = vsyncpa [#allocation3], 0 }
  0x40   :  { %85 = vsyncpa [#allocation6], 0 }
  0x41   :  { %86 = vsyncpa [#allocation9], 0 }
  0x42   :  { %87 = vsyncpa [#allocation12], 0 }
  0x43   :  { %88 = vsyncpa [#allocation15], 0 }
  0x44   :  { %89 = vsyncpa [#allocation18], 0  ;;  %s130_s22 = sshll.u32 %s5285_s6, 4  ;;  %s131_s22 = int_to_ptr.hbm [resolvable:$true] %s130_s22 }
  0x45   :  { %90 = vsyncpa [#allocation4], 0  ;;  %s5195_s23 = smov [#allocation5]   ;;  %s164_s28 = sshll.u32 %s5315_s20, 4  ;;  %s165_s28 = int_to_ptr.hbm [resolvable:$true] %s164_s28 }
  0x46   :  { %s132_s26 = sshll.u32 %s5195_s23, 4  ;;  %s4854_s1 = sshra.s32 %s131_s22, 4  ;;  %s133_s26 = int_to_ptr.vmem [resolvable:$true] %s132_s26  ;;  %s4855_s1 = int_to_ptr.hbm [resolvable:$true] %s4854_s1 }
  0x47   :  { %s4856_s0 = scalar_lea.hbm %s4855_s1, 32  ;;  %s4858_s2 = scalar_lea.hbm %s5285_s6, 32 }
  0x48   :  { %p4857_p0 = scmp.ne.s32.totalorder %s4855_s1, %s4856_s0  ;;  %p4859_p1 = scmp.lt.s32.totalorder %s4855_s1, %s5285_s6 }
  0x49   :  { %p4860_p2 = scmp.lt.s32.totalorder %s4858_s2, %s4856_s0 }
  0x4b   :  { %p4861_p3 = por %p4860_p2, %p4859_p1 }
  0x4d   :  { %p4862_p4 = pnand %p4861_p3, %p4857_p0 }
  0x4f   :  { %4865 = shalt.err (!%p4862_p4)
}
  0x50   :  { %s5196_s7 = smov 128   ;;  %s5197_s10 = smov 8  }
  0x51   :  { %138 = dma.hbm_to_vmem [thread:$0]  %s131_s22, 512, %s133_s26, [#allocation6], %s5196_s7, %s5196_s7, %s5197_s10  }
  0x52   :  { %s5198_s11 = smov [#allocation8]   ;;  %s198_s16 = sshll.u32 %s5345_s4, 4  ;;  %s5425_s16 = int_to_ptr.hbm [resolvable:$true] %s198_s16 }
  0x53   :  { %s166_s15 = sshll.u32 %s5198_s11, 4  ;;  %s4878_s6 = sshra.s32 %s165_s28, 4  ;;  %s167_s15 = int_to_ptr.vmem [resolvable:$true] %s166_s15  ;;  %s4879_s6 = int_to_ptr.hbm [resolvable:$true] %s4878_s6 }
  0x54   :  { %s4880_s18 = scalar_lea.hbm %s4879_s6, 32  ;;  %s4882_s23 = scalar_lea.hbm %s5315_s20, 32 }
  0x55   :  { %p4881_p5 = scmp.ne.s32.totalorder %s4879_s6, %s4880_s18  ;;  %p4883_p6 = scmp.lt.s32.totalorder %s4879_s6, %s5315_s20 }
  0x56   :  { %p4884_p7 = scmp.lt.s32.totalorder %s4882_s23, %s4880_s18 }
  0x58   :  { %p4885_p8 = por %p4884_p7, %p4883_p6 }
  0x5a   :  { %p4886_p9 = pnand %p4885_p8, %p4881_p5 }
  0x5c   :  { %4889 = shalt.err (!%p4886_p9)
}
  0x5d   :  { %172 = dma.hbm_to_vmem [thread:$0]  %s165_s28, 512, %s167_s15, [#allocation9], %s5196_s7, %s5196_s7, %s5197_s10  }
  0x5e   :  { %s232_s22 = sshll.u32 %s5375_s24, 4  ;;  %s5199_s26 = smov [#allocation11]   ;;  %s5433_s22 = int_to_ptr.hbm [resolvable:$true] %s232_s22 }
  0x5f   :  { %s200_s1 = sshll.u32 %s5199_s26, 4  ;;  %s4902_s0 = sshra.s32 %s5425_s16, 4  ;;  %s201_s1 = int_to_ptr.vmem [resolvable:$true] %s200_s1  ;;  %s4903_s0 = int_to_ptr.hbm [resolvable:$true] %s4902_s0 }
  0x60   :  { %s4904_s20 = scalar_lea.hbm %s4903_s0, 32  ;;  %s4906_s2 = scalar_lea.hbm %s5345_s4, 32 }
  0x61   :  { %p4905_p10 = scmp.ne.s32.totalorder %s4903_s0, %s4904_s20  ;;  %p4907_p11 = scmp.lt.s32.totalorder %s4903_s0, %s5345_s4 }
  0x62   :  { %p4908_p12 = scmp.lt.s32.totalorder %s4906_s2, %s4904_s20 }
  0x64   :  { %p4909_p13 = por %p4908_p12, %p4907_p11 }
  0x66   :  { %p4910_p0 = pnand %p4909_p13, %p4905_p10 }
  0x68   :  { %4913 = shalt.err (!%p4910_p0)
}
  0x69   :  { %206 = dma.hbm_to_vmem [thread:$0]  %s5425_s16, 512, %s201_s1, [#allocation12], %s5196_s7, %s5196_s7, %s5197_s10  }
  0x6a   :  { %s5200_s28 = smov [#allocation14]   ;;  %s260_s15 = sshll.u32 %s5390_s19, 4  ;;  %s5443_s15 = int_to_ptr.hbm [resolvable:$true] %s260_s15 }
  0x6b   :  { %s234_s11 = sshll.u32 %s5200_s28, 4  ;;  %s4926_s4 = sshra.s32 %s5433_s22, 4  ;;  %s235_s11 = int_to_ptr.vmem [resolvable:$true] %s234_s11  ;;  %s4927_s4 = int_to_ptr.hbm [resolvable:$true] %s4926_s4 }
  0x6c   :  { %s4928_s6 = scalar_lea.hbm %s4927_s4, 32  ;;  %s4930_s18 = scalar_lea.hbm %s5375_s24, 32 }
  0x6d   :  { %p4929_p1 = scmp.ne.s32.totalorder %s4927_s4, %s4928_s6  ;;  %p4931_p2 = scmp.lt.s32.totalorder %s4927_s4, %s5375_s24 }
  0x6e   :  { %p4932_p3 = scmp.lt.s32.totalorder %s4930_s18, %s4928_s6 }
  0x70   :  { %p4933_p4 = por %p4932_p3, %p4931_p2 }
  0x72   :  { %p4934_p5 = pnand %p4933_p4, %p4929_p1 }
  0x74   :  { %4937 = shalt.err (!%p4934_p5)
}
  0x75   :  { %240 = dma.hbm_to_vmem [thread:$0]  %s5433_s22, 512, %s235_s11, [#allocation15], %s5196_s7, %s5196_s7, %s5197_s10  }
  0x76   :  { %s96_s16 = sshll.u32 %s5220_s5, 4  ;;  %s5201_s23 = smov [#allocation17]   ;;  %s97_s16 = int_to_ptr.hbm [resolvable:$true] %s96_s16 }
  0x77   :  { %s262_s26 = sshll.u32 %s5201_s23, 4  ;;  %s4950_s1 = sshra.s32 %s5443_s15, 4  ;;  %s263_s26 = int_to_ptr.vmem [resolvable:$true] %s262_s26  ;;  %s4951_s1 = int_to_ptr.hbm [resolvable:$true] %s4950_s1 }
  0x78   :  { %s4952_s24 = scalar_lea.hbm %s4951_s1, 32  ;;  %s4954_s0 = scalar_lea.hbm %s5390_s19, 32 }
  0x79   :  { %p4953_p6 = scmp.ne.s32.totalorder %s4951_s1, %s4952_s24  ;;  %p4955_p7 = scmp.lt.s32.totalorder %s4951_s1, %s5390_s19 }
  0x7a   :  { %p4956_p8 = scmp.lt.s32.totalorder %s4954_s0, %s4952_s24 }
  0x7c   :  { %p4957_p9 = por %p4956_p8, %p4955_p7 }
  0x7e   :  { %p4958_p10 = pnand %p4957_p9, %p4953_p6 }
  0x80   :  { %4961 = shalt.err (!%p4958_p10)
}
  0x81   :  { %268 = dma.hbm_to_vmem [thread:$0]  %s5443_s15, 512, %s263_s26, [#allocation18], %s5196_s7, %s5196_s7, %s5197_s10  }
  0x82   :  { %s5202_s22 = smov [#allocation2]   ;;  %s147_s2 = sshll.u32 %s5300_s27, 4  ;;  %s5461_s2 = int_to_ptr.hbm [resolvable:$true] %s147_s2 }
  0x83   :  { %s98_s20 = sshll.u32 %s5202_s22, 4  ;;  %s4974_s28 = sshra.s32 %s97_s16, 4  ;;  %s99_s20 = int_to_ptr.vmem [resolvable:$true] %s98_s20  ;;  %s4975_s28 = int_to_ptr.hbm [resolvable:$true] %s4974_s28 }
  0x84   :  { %s4976_s19 = scalar_lea.hbm %s4975_s28, 16  ;;  %s4978_s11 = scalar_lea.hbm %s5220_s5, 16 }
  0x85   :  { %p4977_p11 = scmp.ne.s32.totalorder %s4975_s28, %s4976_s19  ;;  %p4979_p12 = scmp.lt.s32.totalorder %s4975_s28, %s5220_s5 }
  0x86   :  { %p4980_p13 = scmp.lt.s32.totalorder %s4978_s11, %s4976_s19 }
  0x88   :  { %p4981_p0 = por %p4980_p13, %p4979_p12 }
  0x8a   :  { %p4982_p1 = pnand %p4981_p0, %p4977_p11 }
  0x8c   :  { %4985 = shalt.err (!%p4982_p1)
}
  0x8d   :  { %101 = dma.hbm_to_vmem [thread:$0]  %s97_s16, 256, %s99_s20, [#allocation3]  }
  0x8e   :  { %s181_s15 = sshll.u32 %s5330_s12, 4  ;;  %s5203_s4 = smov [#allocation7]   ;;  %s5466_s15 = int_to_ptr.hbm [resolvable:$true] %s181_s15 }
  0x8f   :  { %s149_s6 = sshll.u32 %s5203_s4, 4  ;;  %s4998_s18 = sshra.s32 %s5461_s2, 4  ;;  %s150_s6 = int_to_ptr.vmem [resolvable:$true] %s149_s6  ;;  %s4999_s18 = int_to_ptr.hbm [resolvable:$true] %s4998_s18 }
  0x90   :  { %s5000_s23 = scalar_lea.hbm %s4999_s18, 32  ;;  %s5002_s5 = scalar_lea.hbm %s5300_s27, 32 }
  0x91   :  { %p5001_p2 = scmp.ne.s32.totalorder %s4999_s18, %s5000_s23  ;;  %p5003_p3 = scmp.lt.s32.totalorder %s4999_s18, %s5300_s27 }
  0x92   :  { %p5004_p4 = scmp.lt.s32.totalorder %s5002_s5, %s5000_s23 }
  0x94   :  { %p5005_p5 = por %p5004_p4, %p5003_p3 }
  0x96   :  { %p5006_p6 = pnand %p5005_p5, %p5001_p2 }
  0x98   :  { %5009 = shalt.err (!%p5006_p6)
}
  0x99   :  { %155 = dma.hbm_to_vmem [thread:$0]  %s5461_s2, 512, %s150_s6, [#allocation6], %s5196_s7, %s5196_s7, %s5197_s10  }
  0x9a   :  { %s5204_s16 = smov [#allocation10]   ;;  %s215_s1 = sshll.u32 %s5360_s30, 4  ;;  %s5476_s1 = int_to_ptr.hbm [resolvable:$true] %s215_s1 }
  0x9b   :  { %s183_s26 = sshll.u32 %s5204_s16, 4  ;;  %s5022_s27 = sshra.s32 %s5466_s15, 4  ;;  %s184_s26 = int_to_ptr.vmem [resolvable:$true] %s183_s26  ;;  %s5023_s27 = int_to_ptr.hbm [resolvable:$true] %s5022_s27 }
  0x9c   :  { %s5024_s24 = scalar_lea.hbm %s5023_s27, 32  ;;  %s5026_s0 = scalar_lea.hbm %s5330_s12, 32 }
  0x9d   :  { %p5025_p7 = scmp.ne.s32.totalorder %s5023_s27, %s5024_s24  ;;  %p5027_p8 = scmp.lt.s32.totalorder %s5023_s27, %s5330_s12 }
  0x9e   :  { %p5028_p9 = scmp.lt.s32.totalorder %s5026_s0, %s5024_s24 }
  0xa0   :  { %p5029_p10 = por %p5028_p9, %p5027_p8 }
  0xa2   :  { %p5030_p11 = pnand %p5029_p10, %p5025_p7 }
  0xa4   :  { %5033 = shalt.err (!%p5030_p11)
}
  0xa5   :  { %189 = dma.hbm_to_vmem [thread:$0]  %s5466_s15, 512, %s184_s26, [#allocation9], %s5196_s7, %s5196_s7, %s5197_s10  }
  0xa6   :  { %s247_s22 = sshll.u32 %s5385_s14, 4  ;;  %s5205_s20 = smov [#allocation13]   ;;  %s5486_s22 = int_to_ptr.hbm [resolvable:$true] %s247_s22 }
  0xa7   :  { %s217_s2 = sshll.u32 %s5205_s20, 4  ;;  %s5046_s12 = sshra.s32 %s5476_s1, 4  ;;  %s218_s2 = int_to_ptr.vmem [resolvable:$true] %s217_s2  ;;  %s5047_s12 = int_to_ptr.hbm [resolvable:$true] %s5046_s12 }
  0xa8   :  { %s5048_s28 = scalar_lea.hbm %s5047_s12, 32  ;;  %s5050_s19 = scalar_lea.hbm %s5360_s30, 32 }
  0xa9   :  { %p5049_p12 = scmp.ne.s32.totalorder %s5047_s12, %s5048_s28  ;;  %p5051_p13 = scmp.lt.s32.totalorder %s5047_s12, %s5360_s30 }
  0xaa   :  { %p5052_p0 = scmp.lt.s32.totalorder %s5050_s19, %s5048_s28 }
  0xac   :  { %p5053_p1 = por %p5052_p0, %p5051_p13 }
  0xae   :  { %p5054_p2 = pnand %p5053_p1, %p5049_p12 }
  0xb0   :  { %5057 = shalt.err (!%p5054_p2)
}
  0xb1   :  { %223 = dma.hbm_to_vmem [thread:$0]  %s5476_s1, 512, %s218_s2, [#allocation12], %s5196_s7, %s5196_s7, %s5197_s10  }
  0xb2   :  { %s5206_s11 = smov [#allocation16]   ;;  %s277_s4 = sshll.u32 %s5405_s29, 4  ;;  %s278_s4 = int_to_ptr.hbm [resolvable:$true] %s277_s4 }
  0xb3   :  { %s249_s15 = sshll.u32 %s5206_s11, 4  ;;  %s5070_s6 = sshra.s32 %s5486_s22, 4  ;;  %s250_s15 = int_to_ptr.vmem [resolvable:$true] %s249_s15  ;;  %s5071_s6 = int_to_ptr.hbm [resolvable:$true] %s5070_s6 }
  0xb4   :  { %s5072_s30 = scalar_lea.hbm %s5071_s6, 128  ;;  %s5074_s18 = scalar_lea.hbm %s5385_s14, 128 }
  0xb5   :  { %p5073_p3 = scmp.ne.s32.totalorder %s5071_s6, %s5072_s30  ;;  %p5075_p4 = scmp.lt.s32.totalorder %s5071_s6, %s5385_s14 }
  0xb6   :  { %p5076_p5 = scmp.lt.s32.totalorder %s5074_s18, %s5072_s30 }
  0xb8   :  { %p5077_p6 = por %p5076_p5, %p5075_p4 }
  0xba   :  { %p5078_p7 = pnand %p5077_p6, %p5073_p3 }
  0xbc   :  { %5081 = shalt.err (!%p5078_p7)
}
  0xbd   :  { %255 = dma.hbm_to_vmem [thread:$0]  %s5486_s22, 2048, %s250_s15, [#allocation15], %s5196_s7, %s5196_s7, %s5197_s10  }
  0xbe   :  { %s5207_s23 = smov [#allocation19]   ;;  %s5094_s16 = sshra.s32 %s278_s4, 4  ;;  %s5095_s16 = int_to_ptr.hbm [resolvable:$true] %s5094_s16 }
  0xbf   :  { %s279_s5 = sshll.u32 %s5207_s23, 4  ;;  %s5096_s26 = scalar_lea.hbm %s5095_s16, 32  ;;  %s280_s5 = int_to_ptr.vmem [resolvable:$true] %s279_s5 }
  0xc0   :  { %p5097_p8 = scmp.ne.s32.totalorder %s5095_s16, %s5096_s26  ;;  %s5098_s14 = scalar_lea.hbm %s5405_s29, 32 }
  0xc1   :  { %p5099_p9 = scmp.lt.s32.totalorder %s5095_s16, %s5405_s29  ;;  %p5100_p10 = scmp.lt.s32.totalorder %s5098_s14, %s5096_s26 }
  0xc3   :  { %p5101_p11 = por %p5100_p10, %p5099_p9 }
  0xc5   :  { %p5102_p12 = pnand %p5101_p11, %p5097_p8 }
  0xc7   :  { %5105 = shalt.err (!%p5102_p12)
}
  0xc8   :  { %285 = dma.hbm_to_vmem [thread:$0]  %s278_s4, 512, %s280_s5, [#allocation18], %s5196_s7, %s5196_s7, %s5197_s10  }
  0xc9   :  { %5142 = dma.done.wait [#allocation3], 256  }
  0xca   :  { %5143 = vsyncadd [#allocation3], 4294967040 }
  0xcb   :  { %5144 = dma.done.wait [#allocation6], 1024  }
  0xcc   :  { %5145 = vsyncadd [#allocation6], 4294966272 }
  0xcd   :  { %5146 = dma.done.wait [#allocation9], 1024  }
  0xce   :  { %5147 = vsyncadd [#allocation9], 4294966272 }
  0xcf   :  { %5148 = dma.done.wait [#allocation12], 1024  }
  0xd0   :  { %5149 = vsyncadd [#allocation12], 4294966272 }
  0xd1   :  { %5150 = dma.done.wait [#allocation15], 2560  }
  0xd2   :  { %5151 = vsyncadd [#allocation15], 4294964736 }
  0xd3   :  { %5152 = dma.done.wait [#allocation18], 1024  }
  0xd4   :  { %5153 = vsyncadd [#allocation18], 4294966272  ;;  %v5508_v0 = vld [vmem:[#allocation2 + $0x8] sm:$0x77]  ;;  %v5511_v1 = vld [vmem:[#allocation2] sm:$0x77] }
  0xd5   :  { %402 = vst [vmem:[#allocation1 + $0x10] ss:$2 sm:$0xff] %v5508_v0  ;;  %vm420_vm0 = vcmask 1042432   ;;  %v370_v2 = vld [vmem:[%s5255_s3] sm:$0xff]  ;;  %vm407_vm1 = vcmask 23552   ;;  %v349_v3 = vld [vmem:[%s5225_s9 + $0x78] sm:$0xff] }
  0xd6   :  { %400 = vst [vmem:[#allocation1] ss:$2 sm:$0xff] %v5511_v1  ;;  %v348_v6 = vld [vmem:[%s5225_s9 + $0x70] sm:$0xff]  ;;  %v347_v9 = vld [vmem:[%s5225_s9 + $0x68] sm:$0xff]  ;;  %v346_v10 = vld [vmem:[%s5225_s9 + $0x60] sm:$0xff]  ;;  %s6996_s29 = sld [smem:[#allocation28_spill]] }
  0xd7   :  { %v371_v11 = vld [vmem:[%s5255_s3 + $0x8] sm:$0xff]  ;;  %v345_v12 = vld [vmem:[%s5225_s9 + $0x58] sm:$0xff]  ;;  %v344_v14 = vld [vmem:[%s5225_s9 + $0x50] sm:$0xff]  ;;  %vm1007_vm14 = vcmask 261120   ;;  %s6999_s7 = sld [smem:[#allocation33_spill]]  ;;  %s4474_s18 = sshll.u32 %s5415_s21, 4  ;;  %s4475_s18 = int_to_ptr.hbm [resolvable:$true] %s4474_s18 }
  0xd8   :  { %v343_v15 = vld [vmem:[%s5225_s9 + $0x48] sm:$0xff]  ;;  %v342_v16 = vld [vmem:[%s5225_s9 + $0x40] sm:$0xff]  ;;  %v372_v17 = vld [vmem:[%s5255_s3 + $0x10] sm:$0xff]  ;;  %s7000_s10 = sld [smem:[#allocation34_spill]]  ;;  %s5130_s23 = sshra.s32 %s4475_s18, 4  ;;  %s5131_s23 = int_to_ptr.hbm [resolvable:$true] %s5130_s23 }
  0xd9   :  { %v341_v18 = vld [vmem:[%s5225_s9 + $0x38] sm:$0xff]  ;;  %v340_v19 = vld [vmem:[%s5225_s9 + $0x30] sm:$0xff]  ;;  %v339_v20 = vld [vmem:[%s5225_s9 + $0x28] sm:$0xff]  ;;  %s7001_s1 = sld [smem:[#allocation35_spill]]  ;;  %s5132_s5 = scalar_lea.hbm %s5131_s23, 128 }
  0xda   :  { %v338_v21 = vld [vmem:[%s5225_s9 + $0x20] sm:$0xff]  ;;  %v373_v22 = vld [vmem:[%s5255_s3 + $0x18] sm:$0xff]  ;;  %v336_v24 = vld [vmem:[%s5225_s9 + $0x10] sm:$0xff]  ;;  %s6998_s3 = sld [smem:[#allocation32_spill]]  ;;  %p5133_p13 = scmp.ne.s32.totalorder %s5131_s23, %s5132_s5 }
  0xdb   :  { %v337_v23 = vld [vmem:[%s5225_s9 + $0x18] sm:$0xff]  ;;  %v335_v25 = vld [vmem:[%s5225_s9 + $0x8] sm:$0xff]  ;;  %v334_v26 = vld [vmem:[%s5225_s9] sm:$0xff]  ;;  %s6992_s9 = sld [smem:[#allocation31_spill]]  ;;  %s5134_s16 = scalar_lea.hbm %s5415_s21, 128 }
  0xdc   :  { %v405_v4 = vld.sshfl [vmem:[#allocation1 + $0x10] sm:$0xff pattern:$0x75316420]  ;;  %v406_v5 = vld.sshfl [vmem:[#allocation1 + $0x18] sm:$0xff pattern:$0x75316420]  ;;  %p5135_p0 = scmp.lt.s32.totalorder %s5131_s23, %s5415_s21  ;;  %p5136_p1 = scmp.lt.s32.totalorder %s5134_s16, %s5132_s5 }
  0xdd   :  { %4541 = vmatpush.msk.msra.mxu2 %vm420_vm0, %v405_v4  ;;  %4546 = vmatpush.msk.msra.mxu3 %vm420_vm0, %v406_v5  ;;  %v403_v7 = vld.sshfl [vmem:[#allocation1] sm:$0xff pattern:$0x75316420]  ;;  %v404_v8 = vld.sshfl [vmem:[#allocation1 + $0x8] sm:$0xff pattern:$0x75316420] }
  0xde   :  { %4542 = vmatmul.msk.f32.vlgmr.msra.gmra.mxu2 %vm407_vm1, %v370_v2  ;;  %4547 = vmatmul.msk.f32.vlgmr.msra.gmra.mxu3 %vm407_vm1, %v370_v2  ;;  %565 = vst [vmem:[#allocation1] ss:$2 sm:$0xff] %v5511_v1  ;;  %v350_v44 = vld [vmem:[%s5230_s13] sm:$0xff]  ;;  %v351_v49 = vld [vmem:[%s5230_s13 + $0x8] sm:$0xff]  ;;  %v352_v50 = vld [vmem:[%s5230_s13 + $0x10] sm:$0xff]  ;;  %s7002_s27 = sld [smem:[#allocation36_spill]]  ;;  %p5137_p2 = por %p5136_p1, %p5135_p0 }
  0xdf   :  { %588 = vmatpush.msrb.mxu2 %v349_v3  ;;  %611 = vmatpush.msrb.mxu3 %v349_v3  ;;  %v353_v51 = vld [vmem:[%s5230_s13 + $0x18] sm:$0xff]  ;;  %s6995_s13 = sld [smem:[#allocation30_spill]] }
  0xe0   :  { %4531 = vmatpush.msk.msra.mxu0 %vm420_vm0, %v403_v7  ;;  %4536 = vmatpush.msk.msra.mxu1 %vm420_vm0, %v404_v8  ;;  %s7003_s24 = sld [smem:[#allocation37_spill]]  ;;  %p5138_p3 = pnand %p5137_p2, %p5133_p13 }
  0xe1   :  { %589 = vmatpush.msrb.mxu2 %v348_v6  ;;  %612 = vmatpush.msrb.mxu3 %v348_v6  ;;  %s7004_s0 = sld [smem:[#allocation38_spill]] }
  0xe2   :  { %4532 = vmatmul.msk.f32.vlgmr.msra.gmra.mxu0 %vm407_vm1, %v370_v2  ;;  %4537 = vmatmul.msk.f32.vlgmr.msra.gmra.mxu1 %vm407_vm1, %v370_v2  ;;  %s7005_s22 = sld [smem:[#allocation39_spill]] }
  0xe3   :  { %590 = vmatpush.msrb.mxu2 %v347_v9  ;;  %613 = vmatpush.msrb.mxu3 %v347_v9  ;;  %s7006_s20 = sld [smem:[#allocation40_spill]] }
  0xe4   :  { %545 = vmatpush.msrb.mxu0 %v349_v3  ;;  %568 = vmatpush.msrb.mxu1 %v349_v3  ;;  %s7007_s2 = sld [smem:[#allocation41_spill]] }
  0xe5   :  { %591 = vmatpush.msrb.mxu2 %v346_v10  ;;  %614 = vmatpush.msrb.mxu3 %v346_v10  ;;  %v5531_v13 = vld.sshfl [vmem:[#allocation1 + $0x8] sm:$0xff pattern:$0x75316420]  ;;  %s7008_s12 = sld [smem:[#allocation42_spill]] }
  0xe6   :  { %4543 = vmatmul.msk.f32.gmra.mxu2 %vm407_vm1, %v371_v11  ;;  %4548 = vmatmul.msk.f32.gmra.mxu3 %vm407_vm1, %v371_v11  ;;  %608 = vst [vmem:[#allocation1] ss:$2 sm:$0xff] %v5508_v0  ;;  %s7009_s28 = sld [smem:[#allocation43_spill]] }
  0xe7   :  { %592 = vmatpush.msrb.mxu2 %v345_v12  ;;  %615 = vmatpush.msrb.mxu3 %v345_v12  ;;  %s7010_s19 = sld [smem:[#allocation44_spill]] }
  0xe8   :  { %546 = vmatpush.msrb.mxu0 %v348_v6  ;;  %569 = vmatpush.msrb.mxu1 %v348_v6  ;;  %s7011_s11 = sld [smem:[#allocation45_spill]] }
  0xe9   :  { %593 = vmatpush.msrb.mxu2 %v344_v14  ;;  %616 = vmatpush.msrb.mxu3 %v344_v14  ;;  %s7012_s15 = sld [smem:[#allocation46_spill]] }
  0xea   :  { %547 = vmatpush.msrb.mxu0 %v347_v9  ;;  %570 = vmatpush.msrb.mxu1 %v347_v9  ;;  %s7013_s4 = sld [smem:[#allocation47_spill]] }
  0xeb   :  { %594 = vmatpush.msrb.mxu2 %v343_v15  ;;  %617 = vmatpush.msrb.mxu3 %v343_v15  ;;  %s7014_s6 = sld [smem:[#allocation48_spill]] }
  0xec   :  { %548 = vmatpush.msrb.mxu0 %v346_v10  ;;  %571 = vmatpush.msrb.mxu1 %v346_v10  ;;  %s7015_s30 = sld [smem:[#allocation49_spill]] }
  0xed   :  { %595 = vmatpush.msrb.mxu2 %v342_v16  ;;  %618 = vmatpush.msrb.mxu3 %v342_v16  ;;  %v609_v27 = vld.sshfl [vmem:[#allocation1 + $0x8] sm:$0xff pattern:$0x75316420] }
  0xee   :  { %4544 = vmatmul.msk.f32.gmra.mxu2 %vm407_vm1, %v372_v17  ;;  %4533 = vmatmul.msk.f32.gmra.mxu0 %vm407_vm1, %v371_v11 }
  0xef   :  { %596 = vmatpush.msrb.mxu2 %v341_v18  ;;  %4538 = vmatmul.msk.f32.gmra.mxu1 %vm407_vm1, %v371_v11 }
  0xf0   :  { %4549 = vmatmul.msk.f32.gmra.mxu3 %vm407_vm1, %v372_v17  ;;  %549 = vmatpush.msrb.mxu0 %v345_v12 }
  0xf1   :  { %572 = vmatpush.msrb.mxu1 %v345_v12  ;;  %597 = vmatpush.msrb.mxu2 %v340_v19 }
  0xf2   :  { %619 = vmatpush.msrb.mxu3 %v341_v18  ;;  %550 = vmatpush.msrb.mxu0 %v344_v14 }
  0xf3   :  { %573 = vmatpush.msrb.mxu1 %v344_v14  ;;  %598 = vmatpush.msrb.mxu2 %v339_v20 }
  0xf4   :  { %620 = vmatpush.msrb.mxu3 %v340_v19  ;;  %551 = vmatpush.msrb.mxu0 %v343_v15 }
  0xf5   :  { %574 = vmatpush.msrb.mxu1 %v343_v15  ;;  %599 = vmatpush.msrb.mxu2 %v338_v21 }
  0xf6   :  { %621 = vmatpush.msrb.mxu3 %v339_v20  ;;  %4545 = vmatmul.msk.f32.gmra.mxu2 %vm407_vm1, %v373_v22 }
  0xf7   :  { %552 = vmatpush.msrb.mxu0 %v342_v16  ;;  %575 = vmatpush.msrb.mxu1 %v342_v16 }
  0xf8   :  { %600 = vmatpush.msrb.mxu2 %v337_v23  ;;  %622 = vmatpush.msrb.mxu3 %v338_v21 }
  0xf9   :  { %4534 = vmatmul.msk.f32.gmra.mxu0 %vm407_vm1, %v372_v17  ;;  %4539 = vmatmul.msk.f32.gmra.mxu1 %vm407_vm1, %v372_v17 }
  0xfa   :  { %4550 = vmatmul.msk.f32.gmra.mxu3 %vm407_vm1, %v373_v22  ;;  %553 = vmatpush.msrb.mxu0 %v341_v18 }
  0xfb   :  { %576 = vmatpush.msrb.mxu1 %v341_v18  ;;  %601 = vmatpush.msrb.mxu2 %v336_v24 }
  0xfc   :  { %623 = vmatpush.msrb.mxu3 %v337_v23  ;;  %554 = vmatpush.msrb.mxu0 %v340_v19 }
  0xfd   :  { %577 = vmatpush.msrb.mxu1 %v340_v19  ;;  %602 = vmatpush.msrb.mxu2 %v335_v25 }
  0xfe   :  { %624 = vmatpush.msrb.mxu3 %v336_v24  ;;  %555 = vmatpush.msrb.mxu0 %v339_v20 }
  0xff   :  { %578 = vmatpush.msrb.mxu1 %v339_v20  ;;  %603 = vmatpush.msrb.mxu2 %v334_v26 }
 0x100   :  { %625 = vmatpush.msrb.mxu3 %v335_v25  ;;  %604 = vmatmul.f32.vlgmr.msrb.gmra.mxu2 %v5508_v0 }
 0x101   :  { %556 = vmatpush.msrb.mxu0 %v338_v21  ;;  %579 = vmatpush.msrb.mxu1 %v338_v21 }
 0x102   :  { %626 = vmatpush.msrb.mxu3 %v334_v26  ;;  %4535 = vmatmul.msk.f32.gmra.mxu0 %vm407_vm1, %v373_v22 }
 0x103   :  { %4540 = vmatmul.msk.f32.gmra.mxu1 %vm407_vm1, %v373_v22  ;;  %627 = vmatmul.f32.vlgmr.msrb.gmra.mxu3 %v609_v27 }
 0x104   :  { %557 = vmatpush.msrb.mxu0 %v337_v23  ;;  %580 = vmatpush.msrb.mxu1 %v337_v23 }
 0x106   :  { %558 = vmatpush.msrb.mxu0 %v336_v24  ;;  %581 = vmatpush.msrb.mxu1 %v336_v24 }
 0x108   :  { %559 = vmatpush.msrb.mxu0 %v335_v25  ;;  %582 = vmatpush.msrb.mxu1 %v335_v25 }
 0x10a   :  { %560 = vmatpush.msrb.mxu0 %v334_v26  ;;  %583 = vmatpush.msrb.mxu1 %v334_v26 }
 0x10b   :  { %561 = vmatmul.f32.vlgmr.msrb.gmra.mxu0 %v5511_v1  ;;  %584 = vmatmul.f32.vlgmr.msrb.gmra.mxu1 %v5531_v13 }
 0x15f   :  { %v5565_v30 = vpop.f32.mrf.mxu0  ;;  %v5567_v31 = vpop.f32.mrf.mxu1 }
 0x161   :  { %v5561_v28 = vpop.f32.mrf.mxu2  ;;  %v5563_v29 = vpop.f32.mrf.mxu3 }
 0x169   :  { %v5569_v32 = vpop.f32.mrf.mxu2  ;;  %v5571_v33 = vpop.f32.mrf.mxu3 }
 0x16b   :  { %v5573_v34 = vpop.f32.mrf.mxu0 }
 0x16c   :  { %v5575_v35 = vpop.f32.mrf.mxu1 }
 0x171   :  { %v5577_v36 = vpop.f32.mrf.mxu2 }
 0x173   :  { %v5579_v37 = vpop.f32.mrf.mxu3 }
 0x176   :  { %v5581_v38 = vpop.f32.mrf.mxu0  ;;  %v5583_v39 = vpop.f32.mrf.mxu1 }
 0x179   :  { %v5585_v40 = vpop.f32.mrf.mxu2 }
 0x17d   :  { %v5587_v41 = vpop.f32.mrf.mxu3 }
 0x17f   :  { %v5589_v42 = vpop.f32.mrf.mxu0 }
 0x180   :  { %v5591_v43 = vpop.f32.mrf.mxu1 }
 0x183   :  { %v605_v45 = vpop.f32.mrf.mxu2 }
 0x184   :  { %4561 = vmatpush.msk.msra.mxu2 %vm420_vm0, %v605_v45 }
 0x185   :  { %4562 = vmatmul.msk.f32.vlgmr.msra.gmra.mxu2 %vm407_vm1, %v350_v44 }
 0x186   :  { %v628_v46 = vpop.f32.mrf.mxu3 }
 0x187   :  { %4566 = vmatpush.msk.msra.mxu3 %vm420_vm0, %v628_v46 }
 0x188   :  { %v562_v47 = vpop.f32.mrf.mxu0  ;;  %v585_v48 = vpop.f32.mrf.mxu1  ;;  %4567 = vmatmul.msk.f32.vlgmr.msra.gmra.mxu3 %vm407_vm1, %v350_v44 }
 0x189   :  { %4551 = vmatpush.msk.msra.mxu0 %vm420_vm0, %v562_v47  ;;  %4556 = vmatpush.msk.msra.mxu1 %vm420_vm0, %v585_v48 }
 0x18a   :  { %4552 = vmatmul.msk.f32.vlgmr.msra.gmra.mxu0 %vm407_vm1, %v350_v44  ;;  %4557 = vmatmul.msk.f32.vlgmr.msra.gmra.mxu1 %vm407_vm1, %v350_v44 }
 0x18d   :  { %4563 = vmatmul.msk.f32.gmra.mxu2 %vm407_vm1, %v351_v49 }
 0x190   :  { %4568 = vmatmul.msk.f32.gmra.mxu3 %vm407_vm1, %v351_v49 }
 0x192   :  { %4553 = vmatmul.msk.f32.gmra.mxu0 %vm407_vm1, %v351_v49  ;;  %4558 = vmatmul.msk.f32.gmra.mxu1 %vm407_vm1, %v351_v49 }
 0x195   :  { %4564 = vmatmul.msk.f32.gmra.mxu2 %vm407_vm1, %v352_v50 }
 0x198   :  { %4569 = vmatmul.msk.f32.gmra.mxu3 %vm407_vm1, %v352_v50 }
 0x19a   :  { %4554 = vmatmul.msk.f32.gmra.mxu0 %vm407_vm1, %v352_v50  ;;  %4559 = vmatmul.msk.f32.gmra.mxu1 %vm407_vm1, %v352_v50 }
 0x19d   :  { %4565 = vmatmul.msk.f32.gmra.mxu2 %vm407_vm1, %v353_v51 }
 0x1a0   :  { %4570 = vmatmul.msk.f32.gmra.mxu3 %vm407_vm1, %v353_v51 }
 0x1a2   :  { %4555 = vmatmul.msk.f32.gmra.mxu0 %vm407_vm1, %v353_v51  ;;  %4560 = vmatmul.msk.f32.gmra.mxu1 %vm407_vm1, %v353_v51 }
 0x207   :  { %v5617_v52 = vpop.f32.mrf.mxu0  ;;  %v5619_v53 = vpop.f32.mrf.mxu1 }
 0x208   :  { %v5621_v54 = vpop.f32.mrf.mxu2  ;;  %v771_v13 = vadd.f32 %v5619_v53, %v5617_v52  ;;  %v795_v22 = vmul.f32 %v5617_v52, %v5617_v52  ;;  %v796_v24 = vmul.f32 %v5619_v53, %v5619_v53 }
 0x20a   :  { %v772_v26 = vadd.f32 %v771_v13, %v5621_v54 }
 0x20b   :  { %v5623_v55 = vpop.f32.mrf.mxu3 }
 0x20c   :  { %v773_v50 = vadd.f32 %v772_v26, %v5623_v55 }
 0x20f   :  { %v5625_v56 = vpop.f32.mrf.mxu0  ;;  %v5627_v57 = vpop.f32.mrf.mxu1 }
 0x210   :  { %v5629_v58 = vpop.f32.mrf.mxu2  ;;  %v776_v59 = vadd.f32 %v5627_v57, %v5625_v56  ;;  %v799_v14 = vmul.f32 %v5625_v56, %v5625_v56  ;;  %v800_v17 = vmul.f32 %v5627_v57, %v5627_v57 }
 0x211   :  { %v801_v45 = vmul.f32 %v5629_v58, %v5629_v58 }
 0x212   :  { %v777_v60 = vadd.f32 %v776_v59, %v5629_v58  ;;  %v816_v49 = vadd.f32 %v800_v17, %v799_v14  ;;  %v797_v59 = vmul.f32 %v5621_v54, %v5621_v54 }
 0x213   :  { %v5634_v61 = vpop.f32.mrf.mxu3 }
 0x214   :  { %v778_v62 = vadd.f32 %v777_v60, %v5634_v61  ;;  %v811_v60 = vadd.f32 %v796_v24, %v795_v22 }
 0x216   :  { %779 = vadd.xlane.f32.xlu1 %v778_v62  ;;  %v802_v62 = vmul.f32 %v5634_v61, %v5634_v61 }
 0x217   :  { %v5637_v63 = vpop.f32.mrf.mxu0  ;;  %v5639_v0 = vpop.f32.mrf.mxu1 }
 0x218   :  { %v803_v1 = vmul.f32 %v5637_v63, %v5637_v63  ;;  %v804_v2 = vmul.f32 %v5639_v0, %v5639_v0  ;;  %v5645_v3 = vpop.f32.mrf.mxu2  ;;  %v781_v4 = vadd.f32 %v5639_v0, %v5637_v63 }
 0x219   :  { %v805_v5 = vmul.f32 %v5645_v3, %v5645_v3 }
 0x21a   :  { %v782_v6 = vadd.f32 %v781_v4, %v5645_v3  ;;  %v821_v7 = vadd.f32 %v804_v2, %v803_v1  ;;  %v817_v1 = vadd.f32 %v816_v49, %v801_v45  ;;  %v798_v2 = vmul.f32 %v5623_v55, %v5623_v55 }
 0x21b   :  { %v5652_v8 = vpop.f32.mrf.mxu3  ;;  %v812_v4 = vadd.f32 %v811_v60, %v797_v59 }
 0x21c   :  { %v783_v9 = vadd.f32 %v782_v6, %v5652_v8  ;;  %v806_v10 = vmul.f32 %v5652_v8, %v5652_v8  ;;  %v822_v11 = vadd.f32 %v821_v7, %v805_v5  ;;  %v818_v5 = vadd.f32 %v817_v1, %v802_v62 }
 0x21d   :  { %v813_v6 = vadd.f32 %v812_v4, %v798_v2  ;;  %v5208_v7 = vmov 0  }
 0x21e   :  { %784 = vadd.xlane.f32.xlu0 %v783_v9  ;;  %v823_v12 = vadd.f32 %v822_v11, %v806_v10  ;;  %4804 = vset.pattern.permute.xlu2 %v5208_v7 }
 0x21f   :  { %v5661_v15 = vpop.f32.mrf.mxu0  ;;  %v5663_v16 = vpop.f32.mrf.mxu1  ;;  %4803 = vset.pattern.permute.xlu0 %v5208_v7  ;;  %4805 = vset.pattern.permute.xlu1 %v5208_v7 }
 0x220   :  { %v807_v18 = vmul.f32 %v5661_v15, %v5661_v15  ;;  %v808_v19 = vmul.f32 %v5663_v16, %v5663_v16  ;;  %824 = vadd.xlane.f32.xlu2 %v823_v12  ;;  %v5671_v20 = vpop.f32.mrf.mxu2  ;;  %v786_v21 = vadd.f32 %v5663_v16, %v5661_v15 }
 0x221   :  { %v809_v23 = vmul.f32 %v5671_v20, %v5671_v20 }
 0x222   :  { %v787_v25 = vadd.f32 %v786_v21, %v5671_v20  ;;  %v826_v27 = vadd.f32 %v808_v19, %v807_v18 }
 0x223   :  { %v5683_v44 = vpop.f32.mrf.mxu3 }
 0x224   :  { %v788_v46 = vadd.f32 %v787_v25, %v5683_v44  ;;  %v810_v47 = vmul.f32 %v5683_v44, %v5683_v44  ;;  %v827_v48 = vadd.f32 %v826_v27, %v809_v23 }
 0x226   :  { %789 = vadd.xlane.f32.xlu0 %v788_v46  ;;  %v828_v51 = vadd.f32 %v827_v48, %v810_v47 }
 0x228   :  { %774 = vadd.xlane.f32.xlu2 %v773_v50  ;;  %829 = vadd.xlane.f32.xlu1 %v828_v51 }
 0x22e   :  { %819 = vadd.xlane.f32.xlu0 %v818_v5 }
 0x230   :  { %814 = vadd.xlane.f32.xlu1 %v813_v6 }
 0x289   :  { %v780_v11 = vpop.xlane.xlu1 %779 }
 0x28a   :  { %v5705_v26 = vmul.f32 0.0026041667, %v780_v11 }
 0x28c   :  { %v836_v50 = vmul.f32 %v5705_v26, %v5705_v26 }
 0x291   :  { %v785_v9 = vpop.xlane.xlu0 %784 }
 0x292   :  { %v5697_v10 = vmul.f32 0.0026041667, %v785_v9 }
 0x293   :  { %v825_v12 = vpop.xlane.xlu2 %824 }
 0x294   :  { %v837_v13 = vmul.f32 %v5697_v10, %v5697_v10  ;;  %v833_v14 = vmul.f32 0.0026041667, %v825_v12 }
 0x296   :  { %v841_v17 = vsub.f32 %v833_v14, %v837_v13  ;;  %v356_v13 = vld [vmem:[%s5235_s17 + $0x10] sm:$0xff] }
 0x298   :  { %v845_v18 = vadd.f32 1e-05, %v841_v17 }
 0x299   :  { %v790_v19 = vpop.xlane.xlu0 %789 }
 0x29a   :  { %4806 = vrsqrt.f32 %v845_v18  ;;  %v5701_v21 = vmul.f32 0.0026041667, %v790_v19  ;;  %vm873_vm3 = vweird.f32 %v845_v18 }
 0x29b   :  { %v830_v22 = vpop.xlane.xlu1 %829  ;;  %v775_v25 = vpop.xlane.xlu2 %774 }
 0x29c   :  { %v838_v23 = vmul.f32 %v5701_v21, %v5701_v21  ;;  %v834_v24 = vmul.f32 0.0026041667, %v830_v22  ;;  %v5707_v46 = vmul.f32 0.0026041667, %v775_v25 }
 0x29e   :  { %v842_v27 = vsub.f32 %v834_v24, %v838_v23  ;;  %v835_v62 = vmul.f32 %v5707_v46, %v5707_v46 }
 0x2a0   :  { %v4807_v45 = vpop.eup %4806  ;;  %v846_v47 = vadd.f32 1e-05, %v842_v27 }
 0x2a1   :  { %v868_v48 = vmul.f32 %v4807_v45, %v845_v18  ;;  %v820_v49 = vpop.xlane.xlu0 %819  ;;  %vm874_vm2 = vweird.f32 %v4807_v45 }
 0x2a2   :  { %4808 = vrsqrt.f32 %v846_v47  ;;  %v832_v51 = vmul.f32 0.0026041667, %v820_v49  ;;  %vm875_vm4 = vmor %vm873_vm3, %vm874_vm2  ;;  %vm883_vm7 = vweird.f32 %v846_v47 }
 0x2a3   :  { %v869_v59 = vmul.f32 %v4807_v45, %v868_v48  ;;  %v815_v60 = vpop.xlane.xlu1 %814 }
 0x2a4   :  { %v840_v1 = vsub.f32 %v832_v51, %v836_v50  ;;  %v831_v2 = vmul.f32 0.0026041667, %v815_v60 }
 0x2a5   :  { %v870_v4 = vmul.f32 0.5, %v869_v59  ;;  %v374_v59 = vld [vmem:[%s6992_s9] sm:$0xff] }
 0x2a6   :  { %v844_v5 = vadd.f32 1e-05, %v840_v1  ;;  %v839_v6 = vsub.f32 %v831_v2, %v835_v62 }
 0x2a7   :  { %v871_v7 = vsub.f32 1.5, %v870_v4  ;;  %v355_v4 = vld [vmem:[%s5235_s17 + $0x8] sm:$0xff] }
 0x2a8   :  { %v4809_v9 = vpop.eup %4808  ;;  %4810 = vrsqrt.f32 %v844_v5  ;;  %v843_v11 = vadd.f32 1e-05, %v839_v6  ;;  %vm863_vm9 = vweird.f32 %v844_v5 }
 0x2a9   :  { %v878_v12 = vmul.f32 %v4809_v9, %v846_v47  ;;  %v872_v14 = vmul.f32 %v4807_v45, %v871_v7  ;;  %vm884_vm5 = vweird.f32 %v4809_v9 }
 0x2aa   :  { %4812 = vrsqrt.f32 %v843_v11  ;;  %vm5715_vm8 = vmor %vm883_vm7, %vm884_vm5  ;;  %vm853_vm12 = vweird.f32 %v843_v11 }
 0x2ab   :  { %v879_v17 = vmul.f32 %v4809_v9, %v878_v12  ;;  %v876_v19 = vsel %vm875_vm4, %v4807_v45, %v872_v14  ;;  %v354_v12 = vld [vmem:[%s5235_s17] sm:$0xff]  ;;  %v357_v14 = vld [vmem:[%s5235_s17 + $0x18] sm:$0xff]  ;;  %v376_v45 = vld [vmem:[%s6992_s9 + $0x10] sm:$0xff]  ;;  %s6997_s17 = sld [smem:[#allocation29_spill]] }
 0x2ac   :  { %v889_v22 = vmul.f32 %v876_v19, %v356_v13 }
 0x2ad   :  { %v880_v23 = vmul.f32 0.5, %v879_v17 }
 0x2ae   :  { %v4811_v24 = vpop.eup %4810  ;;  %911 = vperm.xlu0 %4803, %v889_v22  }
 0x2af   :  { %v858_v25 = vmul.f32 %v4811_v24, %v844_v5  ;;  %v881_v48 = vsub.f32 1.5, %v880_v23  ;;  %vm864_vm6 = vweird.f32 %v4811_v24  ;;  %v367_v5 = vld [vmem:[%s6995_s13 + $0x8] sm:$0xff] }
 0x2b0   :  { %v4813_v27 = vpop.eup %4812  ;;  %vm865_vm11 = vmor %vm863_vm9, %vm864_vm6 }
 0x2b1   :  { %v859_v49 = vmul.f32 %v4811_v24, %v858_v25  ;;  %v848_v50 = vmul.f32 %v4813_v27, %v843_v11  ;;  %v882_v60 = vmul.f32 %v4809_v9, %v881_v48  ;;  %vm854_vm10 = vweird.f32 %v4813_v27 }
 0x2b2   :  { %vm855_vm13 = vmor %vm853_vm12, %vm854_vm10  ;;  %v893_v11 = vmul.f32 %v889_v22, %v5697_v10  ;;  %v359_v22 = vld [vmem:[%s6996_s29 + $0x8] sm:$0xff] }
 0x2b3   :  { %v860_v51 = vmul.f32 0.5, %v859_v49  ;;  %v849_v18 = vmul.f32 %v4813_v27, %v848_v50  ;;  %v886_v47 = vsel %vm5715_vm8, %v4809_v9, %v882_v60  ;;  %v361_v49 = vld [vmem:[%s6996_s29 + $0x18] sm:$0xff]  ;;  %v375_v60 = vld [vmem:[%s6992_s9 + $0x8] sm:$0xff] }
 0x2b4   :  { %v890_v25 = vmul.f32 %v886_v47, %v357_v14  ;;  %v377_v9 = vld [vmem:[%s6992_s9 + $0x18] sm:$0xff] }
 0x2b5   :  { %v861_v62 = vsub.f32 1.5, %v860_v51  ;;  %v850_v1 = vmul.f32 0.5, %v849_v18  ;;  %v358_v18 = vld [vmem:[%s6996_s29] sm:$0xff] }
 0x2b6   :  { %380 = vperm.xlu0 %4803, %v374_v59   ;;  %v894_v48 = vmul.f32 %v890_v25, %v5701_v21 }
 0x2b7   :  { %v851_v2 = vsub.f32 1.5, %v850_v1  ;;  %v862_v6 = vmul.f32 %v4811_v24, %v861_v62  ;;  %v366_v62 = vld [vmem:[%s6995_s13] sm:$0xff]  ;;  %v368_v1 = vld [vmem:[%s6995_s13 + $0x10] sm:$0xff] }
 0x2b9   :  { %v866_v7 = vsel %vm865_vm11, %v4811_v24, %v862_v6  ;;  %v852_v13 = vmul.f32 %v4813_v27, %v851_v2  ;;  %v360_v24 = vld [vmem:[%s6996_s29 + $0x10] sm:$0xff]  ;;  %v369_v2 = vld [vmem:[%s6995_s13 + $0x18] sm:$0xff] }
 0x2ba   :  { %v888_v17 = vmul.f32 %v866_v7, %v355_v4  ;;  %v897_v50 = vsub.f32 %v360_v24, %v893_v11 }
 0x2bb   :  { %v856_v19 = vsel %vm855_vm13, %v4813_v27, %v852_v13  ;;  %v898_v27 = vsub.f32 %v361_v49, %v894_v48 }
 0x2bc   :  { %906 = vperm.xlu2 %4804, %v888_v17   ;;  %v887_v23 = vmul.f32 %v856_v19, %v354_v12  ;;  %v892_v21 = vmul.f32 %v888_v17, %v5705_v26 }
 0x2be   :  { %901 = vperm.xlu1 %4805, %v887_v23   ;;  %994 = vperm.xlu0 %4803, %v367_v5   ;;  %v891_v51 = vmul.f32 %v887_v23, %v5707_v46  ;;  %v896_v59 = vsub.f32 %v359_v22, %v892_v21 }
 0x2c0   :  { %v895_v10 = vsub.f32 %v358_v18, %v891_v51 }
 0x2c4   :  { %947 = vperm.xlu2 %4804, %v897_v50  }
 0x2c6   :  { %395 = vperm.xlu0 %4803, %v377_v9   ;;  %952 = vperm.xlu1 %4805, %v898_v27  }
 0x2cc   :  { %916 = vperm.xlu2 %4804, %v890_v25  }
 0x2ce   :  { %937 = vperm.xlu1 %4805, %v895_v10  }
 0x2d4   :  { %942 = vperm.xlu2 %4804, %v896_v59  }
 0x2d6   :  { %385 = vperm.xlu1 %4805, %v375_v60  }
 0x2dc   :  { %989 = vperm.xlu2 %4804, %v366_v62  }
 0x2de   :  { %999 = vperm.xlu1 %4805, %v368_v1  }
 0x2e4   :  { %390 = vperm.xlu2 %4804, %v376_v45  }
 0x2ec   :  { %1004 = vperm.xlu2 %4804, %v369_v2  }
 0x316   :  { %v907_v46 = vpop.permute.xlu2 %906 }
 0x317   :  { %v923_v14 = vmul.f32 %v907_v46, %v5625_v56  ;;  %v924_v47 = vmul.f32 %v907_v46, %v5627_v57 }
 0x31e   :  { %v948_v4 = vpop.permute.xlu2 %947 }
 0x320   :  { %v912_v12 = vpop.permute.xlu0 %911 }
 0x321   :  { %v927_v26 = vmul.f32 %v912_v12, %v5637_v63  ;;  %v928_v13 = vmul.f32 %v912_v12, %v5639_v0  ;;  %v929_v17 = vmul.f32 %v912_v12, %v5645_v3  ;;  %v930_v19 = vmul.f32 %v912_v12, %v5652_v8 }
 0x322   :  { %v925_v63 = vmul.f32 %v907_v46, %v5629_v58  ;;  %v926_v0 = vmul.f32 %v907_v46, %v5634_v61 }
 0x323   :  { %v963_v48 = vadd.f32 %v948_v4, %v927_v26  ;;  %v964_v57 = vadd.f32 %v948_v4, %v928_v13  ;;  %v965_v9 = vadd.f32 %v948_v4, %v929_v17  ;;  %v1167_v17 = vld [vmem:[%s6998_s3 + $0x78] sm:$0xff] }
 0x325   :  { %v979_v58 = vmax.f32 %v963_v48, 0.0  ;;  %v980_v61 = vmax.f32 %v964_v57, 0.0  ;;  %v981_v59 = vmax.f32 %v965_v9, 0.0  ;;  %v1159_v48 = vld [vmem:[%s6998_s3 + $0x38] sm:$0xff]  ;;  %v1154_v9 = vld [vmem:[%s6998_s3 + $0x10] sm:$0xff] }
 0x326   :  { %v917_v6 = vpop.permute.xlu2 %916  ;;  %v365_v57 = vld [vmem:[%s6997_s17 + $0x18] sm:$0xff] }
 0x327   :  { %v931_v5 = vmul.f32 %v917_v6, %v5661_v15  ;;  %v932_v23 = vmul.f32 %v917_v6, %v5663_v16  ;;  %v933_v25 = vmul.f32 %v917_v6, %v5671_v20  ;;  %v934_v11 = vmul.f32 %v917_v6, %v5683_v44 }
 0x328   :  { %v966_v15 = vadd.f32 %v948_v4, %v930_v19  ;;  %v1166_v19 = vld [vmem:[%s6998_s3 + $0x70] sm:$0xff] }
 0x32a   :  { %v982_v60 = vmax.f32 %v966_v15, 0.0  ;;  %v1153_v15 = vld [vmem:[%s6998_s3 + $0x8] sm:$0xff] }
 0x32e   :  { %v943_v24 = vpop.permute.xlu2 %942 }
 0x32f   :  { %v959_v27 = vadd.f32 %v943_v24, %v923_v14  ;;  %v960_v16 = vadd.f32 %v943_v24, %v924_v47  ;;  %v961_v10 = vadd.f32 %v943_v24, %v925_v63  ;;  %v962_v21 = vadd.f32 %v943_v24, %v926_v0  ;;  %v1162_v24 = vld [vmem:[%s6998_s3 + $0x50] sm:$0xff]  ;;  %v1161_v0 = vld [vmem:[%s6998_s3 + $0x48] sm:$0xff] }
 0x330   :  { %v902_v7 = vpop.permute.xlu1 %901  ;;  %v364_v63 = vld [vmem:[%s6997_s17 + $0x10] sm:$0xff] }
 0x331   :  { %v919_v22 = vmul.f32 %v902_v7, %v5617_v52  ;;  %v920_v62 = vmul.f32 %v902_v7, %v5619_v53  ;;  %v921_v1 = vmul.f32 %v902_v7, %v5621_v54  ;;  %v975_v45 = vmax.f32 %v959_v27, 0.0  ;;  %v1152_v27 = vld [vmem:[%s6998_s3] sm:$0xff] }
 0x332   :  { %v976_v2 = vmax.f32 %v960_v16, 0.0  ;;  %v922_v46 = vmul.f32 %v902_v7, %v5623_v55  ;;  %v977_v6 = vmax.f32 %v961_v10, 0.0  ;;  %v978_v52 = vmax.f32 %v962_v21, 0.0  ;;  %v362_v7 = vld [vmem:[%s6997_s17] sm:$0xff]  ;;  %v381_v16 = vpop.permute.xlu0 %380 }
 0x333   :  { %v476_v21 = vadd.f32 %v5567_v31, %v381_v16 }
 0x338   :  { %v953_v56 = vpop.permute.xlu1 %952 }
 0x339   :  { %v967_v49 = vadd.f32 %v953_v56, %v931_v5  ;;  %v968_v3 = vadd.f32 %v953_v56, %v932_v23  ;;  %v969_v50 = vadd.f32 %v953_v56, %v933_v25  ;;  %v970_v8 = vadd.f32 %v953_v56, %v934_v11  ;;  %v1165_v5 = vld [vmem:[%s6998_s3 + $0x68] sm:$0xff]  ;;  %v1164_v25 = vld [vmem:[%s6998_s3 + $0x60] sm:$0xff]  ;;  %v1163_v11 = vld [vmem:[%s6998_s3 + $0x58] sm:$0xff] }
 0x33a   :  { %v363_v23 = vld [vmem:[%s6997_s17 + $0x8] sm:$0xff]  ;;  %v1160_v56 = vld [vmem:[%s6998_s3 + $0x40] sm:$0xff] }
 0x33b   :  { %v983_v51 = vmax.f32 %v967_v49, 0.0  ;;  %v984_v20 = vmax.f32 %v968_v3, 0.0  ;;  %v985_v18 = vmax.f32 %v969_v50, 0.0  ;;  %v986_v44 = vmax.f32 %v970_v8, 0.0  ;;  %v1158_v49 = vld [vmem:[%s6998_s3 + $0x30] sm:$0xff]  ;;  %v1157_v3 = vld [vmem:[%s6998_s3 + $0x28] sm:$0xff] }
 0x33c   :  { %v1156_v50 = vld [vmem:[%s6998_s3 + $0x20] sm:$0xff]  ;;  %v1155_v8 = vld [vmem:[%s6998_s3 + $0x18] sm:$0xff] }
 0x33d   :  { %1032 = vmatpush.msrb.mxu0 %v983_v51  ;;  %1061 = vmatpush.msrb.mxu1 %v984_v20  ;;  %v990_v51 = vpop.permute.xlu2 %989 }
 0x33e   :  { %1090 = vmatpush.msrb.mxu2 %v985_v18  ;;  %1119 = vmatpush.msrb.mxu3 %v986_v44  ;;  %v447_v44 = vadd.f32 %v5565_v30, %v381_v16  ;;  %v534_v30 = vadd.f32 %v5563_v29, %v381_v16 }
 0x33f   :  { %1033 = vmatpush.msrb.mxu0 %v979_v58  ;;  %1062 = vmatpush.msrb.mxu1 %v980_v61 }
 0x340   :  { %1091 = vmatpush.msrb.mxu2 %v981_v59  ;;  %1120 = vmatpush.msrb.mxu3 %v982_v60  ;;  %v938_v4 = vpop.permute.xlu1 %937  ;;  %v995_v60 = vpop.permute.xlu0 %994 }
 0x341   :  { %1034 = vmatpush.msrb.mxu0 %v975_v45  ;;  %1063 = vmatpush.msrb.mxu1 %v976_v2  ;;  %v955_v12 = vadd.f32 %v938_v4, %v919_v22  ;;  %v956_v26 = vadd.f32 %v938_v4, %v920_v62  ;;  %v957_v53 = vadd.f32 %v938_v4, %v921_v1 }
 0x342   :  { %1092 = vmatpush.msrb.mxu2 %v977_v6  ;;  %1121 = vmatpush.msrb.mxu3 %v978_v52  ;;  %v958_v54 = vadd.f32 %v938_v4, %v922_v46  ;;  %v505_v45 = vadd.f32 %v5561_v28, %v381_v16 }
 0x343   :  { %v971_v13 = vmax.f32 %v955_v12, 0.0  ;;  %v972_v14 = vmax.f32 %v956_v26, 0.0  ;;  %v973_v47 = vmax.f32 %v957_v53, 0.0 }
 0x344   :  { %v974_v55 = vmax.f32 %v958_v54, 0.0 }
 0x345   :  { %1035 = vmatpush.msrb.mxu0 %v971_v13  ;;  %1064 = vmatpush.msrb.mxu1 %v972_v14  ;;  %v391_v28 = vpop.permute.xlu2 %390 }
 0x346   :  { %1093 = vmatpush.msrb.mxu2 %v973_v47  ;;  %1122 = vmatpush.msrb.mxu3 %v974_v55 }
 0x347   :  { %4571 = vmatmul.msk.f32.vlgmr.msrb.gmra.mxu0 %vm1007_vm14, %v362_v7  ;;  %4575 = vmatmul.msk.f32.vlgmr.msrb.gmra.mxu1 %vm1007_vm14, %v362_v7 }
 0x348   :  { %4579 = vmatmul.msk.f32.vlgmr.msrb.gmra.mxu2 %vm1007_vm14, %v362_v7  ;;  %4583 = vmatmul.msk.f32.vlgmr.msrb.gmra.mxu3 %vm1007_vm14, %v362_v7  ;;  %v386_v59 = vpop.permute.xlu1 %385 }
 0x349   :  { %1188 = vmatpush.msra.mxu0 %v1167_v17  ;;  %1217 = vmatpush.msra.mxu1 %v1167_v17  ;;  %v450_v12 = vadd.f32 %v5573_v34, %v386_v59  ;;  %v479_v26 = vadd.f32 %v5575_v35, %v386_v59 }
 0x34a   :  { %1246 = vmatpush.msra.mxu2 %v1167_v17  ;;  %1275 = vmatpush.msra.mxu3 %v1167_v17 }
 0x34b   :  { %1189 = vmatpush.msra.mxu0 %v1166_v19  ;;  %1218 = vmatpush.msra.mxu1 %v1166_v19 }
 0x34c   :  { %1247 = vmatpush.msra.mxu2 %v1166_v19  ;;  %1276 = vmatpush.msra.mxu3 %v1166_v19  ;;  %v508_v19 = vadd.f32 %v5569_v32, %v386_v59  ;;  %v396_v32 = vpop.permute.xlu0 %395 }
 0x34d   :  { %1190 = vmatpush.msra.mxu0 %v1165_v5  ;;  %1219 = vmatpush.msra.mxu1 %v1165_v5  ;;  %v456_v16 = vadd.f32 %v5589_v42, %v396_v32 }
 0x34e   :  { %1248 = vmatpush.msra.mxu2 %v1165_v5  ;;  %1277 = vmatpush.msra.mxu3 %v1165_v5  ;;  %v537_v5 = vadd.f32 %v5571_v33, %v386_v59  ;;  %v1005_v33 = vpop.permute.xlu2 %1004 }
 0x34f   :  { %4572 = vmatmul.msk.f32.gmra.mxu0 %vm1007_vm14, %v363_v23  ;;  %4576 = vmatmul.msk.f32.gmra.mxu1 %vm1007_vm14, %v363_v23 }
 0x350   :  { %4580 = vmatmul.msk.f32.gmra.mxu2 %vm1007_vm14, %v363_v23  ;;  %4584 = vmatmul.msk.f32.gmra.mxu3 %vm1007_vm14, %v363_v23  ;;  %v1000_v29 = vpop.permute.xlu1 %999 }
 0x351   :  { %1191 = vmatpush.msra.mxu0 %v1164_v25  ;;  %1220 = vmatpush.msra.mxu1 %v1164_v25 }
 0x352   :  { %1249 = vmatpush.msra.mxu2 %v1164_v25  ;;  %1278 = vmatpush.msra.mxu3 %v1164_v25 }
 0x353   :  { %1192 = vmatpush.msra.mxu0 %v1163_v11  ;;  %1221 = vmatpush.msra.mxu1 %v1163_v11 }
 0x354   :  { %1250 = vmatpush.msra.mxu2 %v1163_v11  ;;  %1279 = vmatpush.msra.mxu3 %v1163_v11  ;;  %v453_v11 = vadd.f32 %v5581_v38, %v391_v28 }
 0x355   :  { %1193 = vmatpush.msra.mxu0 %v1162_v24  ;;  %1222 = vmatpush.msra.mxu1 %v1162_v24 }
 0x356   :  { %1251 = vmatpush.msra.mxu2 %v1162_v24  ;;  %1280 = vmatpush.msra.mxu3 %v1162_v24  ;;  %v482_v24 = vadd.f32 %v5583_v39, %v391_v28 }
 0x357   :  { %4573 = vmatmul.msk.f32.gmra.mxu0 %vm1007_vm14, %v364_v63  ;;  %4577 = vmatmul.msk.f32.gmra.mxu1 %vm1007_vm14, %v364_v63 }
 0x358   :  { %4581 = vmatmul.msk.f32.gmra.mxu2 %vm1007_vm14, %v364_v63  ;;  %4585 = vmatmul.msk.f32.gmra.mxu3 %vm1007_vm14, %v364_v63 }
 0x359   :  { %1194 = vmatpush.msra.mxu0 %v1161_v0  ;;  %1223 = vmatpush.msra.mxu1 %v1161_v0 }
 0x35a   :  { %1252 = vmatpush.msra.mxu2 %v1161_v0  ;;  %1281 = vmatpush.msra.mxu3 %v1161_v0 }
 0x35b   :  { %1195 = vmatpush.msra.mxu0 %v1160_v56  ;;  %1224 = vmatpush.msra.mxu1 %v1160_v56 }
 0x35c   :  { %1253 = vmatpush.msra.mxu2 %v1160_v56  ;;  %1282 = vmatpush.msra.mxu3 %v1160_v56 }
 0x35d   :  { %1196 = vmatpush.msra.mxu0 %v1159_v48  ;;  %1225 = vmatpush.msra.mxu1 %v1159_v48 }
 0x35e   :  { %1254 = vmatpush.msra.mxu2 %v1159_v48  ;;  %1283 = vmatpush.msra.mxu3 %v1159_v48 }
 0x35f   :  { %4574 = vmatmul.msk.f32.gmra.mxu0 %vm1007_vm14, %v365_v57  ;;  %4578 = vmatmul.msk.f32.gmra.mxu1 %vm1007_vm14, %v365_v57 }
 0x360   :  { %4582 = vmatmul.msk.f32.gmra.mxu2 %vm1007_vm14, %v365_v57  ;;  %4586 = vmatmul.msk.f32.gmra.mxu3 %vm1007_vm14, %v365_v57 }
 0x361   :  { %1197 = vmatpush.msra.mxu0 %v1158_v49  ;;  %1226 = vmatpush.msra.mxu1 %v1158_v49 }
 0x362   :  { %1255 = vmatpush.msra.mxu2 %v1158_v49  ;;  %1284 = vmatpush.msra.mxu3 %v1158_v49 }
 0x363   :  { %1198 = vmatpush.msra.mxu0 %v1157_v3  ;;  %1227 = vmatpush.msra.mxu1 %v1157_v3 }
 0x364   :  { %1256 = vmatpush.msra.mxu2 %v1157_v3  ;;  %1285 = vmatpush.msra.mxu3 %v1157_v3 }
 0x365   :  { %1199 = vmatpush.msra.mxu0 %v1156_v50  ;;  %1228 = vmatpush.msra.mxu1 %v1156_v50 }
 0x366   :  { %1257 = vmatpush.msra.mxu2 %v1156_v50  ;;  %1286 = vmatpush.msra.mxu3 %v1156_v50 }
 0x367   :  { %1200 = vmatpush.msra.mxu0 %v1155_v8  ;;  %1229 = vmatpush.msra.mxu1 %v1155_v8 }
 0x368   :  { %1258 = vmatpush.msra.mxu2 %v1155_v8  ;;  %1287 = vmatpush.msra.mxu3 %v1155_v8  ;;  %v511_v8 = vadd.f32 %v5577_v36, %v391_v28 }
 0x369   :  { %1201 = vmatpush.msra.mxu0 %v1154_v9  ;;  %1230 = vmatpush.msra.mxu1 %v1154_v9 }
 0x36a   :  { %1259 = vmatpush.msra.mxu2 %v1154_v9  ;;  %1288 = vmatpush.msra.mxu3 %v1154_v9  ;;  %v540_v9 = vadd.f32 %v5579_v37, %v391_v28  ;;  %v1168_v28 = vld [vmem:[%s6999_s7] sm:$0xff] }
 0x36b   :  { %1202 = vmatpush.msra.mxu0 %v1153_v15  ;;  %1231 = vmatpush.msra.mxu1 %v1153_v15 }
 0x36c   :  { %1260 = vmatpush.msra.mxu2 %v1153_v15  ;;  %1289 = vmatpush.msra.mxu3 %v1153_v15 }
 0x36d   :  { %1203 = vmatpush.msra.mxu0 %v1152_v27  ;;  %1232 = vmatpush.msra.mxu1 %v1152_v27 }
 0x36e   :  { %1261 = vmatpush.msra.mxu2 %v1152_v27  ;;  %1290 = vmatpush.msra.mxu3 %v1152_v27 }
 0x3c4   :  { %v1037_v20 = vpop.f32.mrf.mxu0  ;;  %v1066_v18 = vpop.f32.mrf.mxu1 }
 0x3c5   :  { %v1038_v10 = vadd.f32 %v1037_v20, %v990_v51  ;;  %v1067_v58 = vadd.f32 %v1066_v18, %v990_v51 }
 0x3c7   :  { %v5793_v61 = vadd.f32 %v1038_v10, %v447_v44  ;;  %v5795_v22 = vadd.f32 %v1067_v58, %v476_v21  ;;  %v514_v21 = vadd.f32 %v5585_v40, %v396_v32  ;;  %v543_v58 = vadd.f32 %v5587_v41, %v396_v32 }
 0x3c9   :  { %1204 = vmatmul.f32.vlgmr.msra.gmra.mxu0 %v5793_v61  ;;  %1233 = vmatmul.f32.vlgmr.msra.gmra.mxu1 %v5795_v22 }
 0x3cb   :  { %v1095_v62 = vpop.f32.mrf.mxu2  ;;  %v1124_v1 = vpop.f32.mrf.mxu3 }
 0x3cc   :  { %v1096_v2 = vadd.f32 %v1095_v62, %v990_v51  ;;  %v1125_v46 = vadd.f32 %v1124_v1, %v990_v51  ;;  %v1040_v31 = vpop.f32.mrf.mxu0  ;;  %v1069_v4 = vpop.f32.mrf.mxu1  ;;  %v485_v51 = vadd.f32 %v5591_v43, %v396_v32 }
 0x3cd   :  { %v1041_v6 = vadd.f32 %v1040_v31, %v995_v60  ;;  %v1070_v52 = vadd.f32 %v1069_v4, %v995_v60 }
 0x3ce   :  { %v5803_v53 = vadd.f32 %v1096_v2, %v505_v45  ;;  %v5805_v54 = vadd.f32 %v1125_v46, %v534_v30 }
 0x3cf   :  { %v5807_v13 = vadd.f32 %v1041_v6, %v450_v12  ;;  %v5809_v14 = vadd.f32 %v1070_v52, %v479_v26 }
 0x3d0   :  { %1262 = vmatmul.f32.vlgmr.msra.gmra.mxu2 %v5803_v53  ;;  %1291 = vmatmul.f32.vlgmr.msra.gmra.mxu3 %v5805_v54 }
 0x3d1   :  { %1207 = vmatmul.f32.gmra.mxu0 %v5807_v13  ;;  %1236 = vmatmul.f32.gmra.mxu1 %v5809_v14 }
 0x3d3   :  { %v1098_v34 = vpop.f32.mrf.mxu2  ;;  %v1127_v35 = vpop.f32.mrf.mxu3 }
 0x3d4   :  { %v1099_v47 = vadd.f32 %v1098_v34, %v995_v60  ;;  %v1128_v55 = vadd.f32 %v1127_v35, %v995_v60  ;;  %v1043_v7 = vpop.f32.mrf.mxu0  ;;  %v1072_v17 = vpop.f32.mrf.mxu1  ;;  %v1169_v35 = vld [vmem:[%s6999_s7 + $0x8] sm:$0xff] }
 0x3d5   :  { %v1044_v23 = vadd.f32 %v1043_v7, %v1000_v29  ;;  %v1073_v25 = vadd.f32 %v1072_v17, %v1000_v29 }
 0x3d6   :  { %v5819_v63 = vadd.f32 %v1099_v47, %v508_v19  ;;  %v5821_v0 = vadd.f32 %v1128_v55, %v537_v5  ;;  %v1170_v47 = vld [vmem:[%s6999_s7 + $0x10] sm:$0xff]  ;;  %v1171_v55 = vld [vmem:[%s6999_s7 + $0x18] sm:$0xff] }
 0x3d7   :  { %v5823_v56 = vadd.f32 %v1044_v23, %v453_v11  ;;  %v5825_v48 = vadd.f32 %v1073_v25, %v482_v24 }
 0x3d8   :  { %1265 = vmatmul.f32.gmra.mxu2 %v5819_v63  ;;  %1294 = vmatmul.f32.gmra.mxu3 %v5821_v0 }
 0x3d9   :  { %1210 = vmatmul.f32.gmra.mxu0 %v5823_v56  ;;  %1239 = vmatmul.f32.gmra.mxu1 %v5825_v48 }
 0x3db   :  { %v1101_v38 = vpop.f32.mrf.mxu2  ;;  %v1130_v39 = vpop.f32.mrf.mxu3 }
 0x3dc   :  { %v1102_v57 = vadd.f32 %v1101_v38, %v1000_v29  ;;  %v1131_v49 = vadd.f32 %v1130_v39, %v1000_v29  ;;  %v1046_v3 = vpop.f32.mrf.mxu0  ;;  %v1075_v50 = vpop.f32.mrf.mxu1 }
 0x3dd   :  { %v1047_v15 = vadd.f32 %v1046_v3, %v1005_v33  ;;  %v1076_v27 = vadd.f32 %v1075_v50, %v1005_v33 }
 0x3de   :  { %v5835_v20 = vadd.f32 %v1102_v57, %v511_v8  ;;  %v5837_v18 = vadd.f32 %v1131_v49, %v540_v9 }
 0x3df   :  { %v5839_v44 = vadd.f32 %v1047_v15, %v456_v16  ;;  %v5841_v10 = vadd.f32 %v1076_v27, %v485_v51 }
 0x3e0   :  { %1268 = vmatmul.f32.gmra.mxu2 %v5835_v20  ;;  %1297 = vmatmul.f32.gmra.mxu3 %v5837_v18 }
 0x3e1   :  { %1213 = vmatmul.f32.gmra.mxu0 %v5839_v44  ;;  %1242 = vmatmul.f32.gmra.mxu1 %v5841_v10 }
 0x3e3   :  { %v1104_v36 = vpop.f32.mrf.mxu2  ;;  %v1133_v37 = vpop.f32.mrf.mxu3 }
 0x3e4   :  { %v1105_v42 = vadd.f32 %v1104_v36, %v1005_v33  ;;  %v1134_v43 = vadd.f32 %v1133_v37, %v1005_v33 }
 0x3e6   :  { %v5849_v59 = vadd.f32 %v1105_v42, %v514_v21  ;;  %v5851_v60 = vadd.f32 %v1134_v43, %v543_v58 }
 0x3e8   :  { %1271 = vmatmul.f32.gmra.mxu2 %v5849_v59  ;;  %1300 = vmatmul.f32.gmra.mxu3 %v5851_v60 }
 0x446   :  { %v1205_v62 = vpop.f32.mrf.mxu0  ;;  %v1234_v1 = vpop.f32.mrf.mxu1 }
 0x44e   :  { %v1208_v45 = vpop.f32.mrf.mxu0  ;;  %v1237_v2 = vpop.f32.mrf.mxu1 }
 0x453   :  { %v1263_v30 = vpop.f32.mrf.mxu2  ;;  %v1292_v46 = vpop.f32.mrf.mxu3 }
 0x456   :  { %v1211_v31 = vpop.f32.mrf.mxu0  ;;  %v1240_v4 = vpop.f32.mrf.mxu1 }
 0x45b   :  { %v1266_v40 = vpop.f32.mrf.mxu2  ;;  %v1295_v6 = vpop.f32.mrf.mxu3 }
 0x45e   :  { %v1214_v41 = vpop.f32.mrf.mxu0  ;;  %v1243_v52 = vpop.f32.mrf.mxu1 }
 0x45f   :  { %1328 = vmatpush.msrb.mxu0 %v1214_v41  ;;  %1357 = vmatpush.msrb.mxu1 %v1243_v52 }
 0x461   :  { %1329 = vmatpush.msrb.mxu0 %v1211_v31  ;;  %1358 = vmatpush.msrb.mxu1 %v1240_v4 }
 0x463   :  { %v1269_v12 = vpop.f32.mrf.mxu2  ;;  %v1298_v26 = vpop.f32.mrf.mxu3  ;;  %1330 = vmatpush.msrb.mxu0 %v1208_v45  ;;  %1359 = vmatpush.msrb.mxu1 %v1237_v2 }
 0x465   :  { %1331 = vmatpush.msrb.mxu0 %v1205_v62  ;;  %1360 = vmatpush.msrb.mxu1 %v1234_v1 }
 0x466   :  { %4587 = vmatmul.msk.f32.vlgmr.msrb.gmra.mxu0 %vm1007_vm14, %v1168_v28  ;;  %4591 = vmatmul.msk.f32.vlgmr.msrb.gmra.mxu1 %vm1007_vm14, %v1168_v28 }
 0x46b   :  { %v1272_v29 = vpop.f32.mrf.mxu2  ;;  %v1301_v34 = vpop.f32.mrf.mxu3 }
 0x46c   :  { %1386 = vmatpush.msrb.mxu2 %v1272_v29  ;;  %1415 = vmatpush.msrb.mxu3 %v1301_v34 }
 0x46e   :  { %1387 = vmatpush.msrb.mxu2 %v1269_v12  ;;  %1416 = vmatpush.msrb.mxu3 %v1298_v26 }
 0x46f   :  { %4588 = vmatmul.msk.f32.gmra.mxu0 %vm1007_vm14, %v1169_v35  ;;  %4592 = vmatmul.msk.f32.gmra.mxu1 %vm1007_vm14, %v1169_v35 }
 0x470   :  { %1388 = vmatpush.msrb.mxu2 %v1266_v40  ;;  %1417 = vmatpush.msrb.mxu3 %v1295_v6 }
 0x472   :  { %1389 = vmatpush.msrb.mxu2 %v1263_v30  ;;  %1418 = vmatpush.msrb.mxu3 %v1292_v46 }
 0x473   :  { %4595 = vmatmul.msk.f32.vlgmr.msrb.gmra.mxu2 %vm1007_vm14, %v1168_v28  ;;  %4599 = vmatmul.msk.f32.vlgmr.msrb.gmra.mxu3 %vm1007_vm14, %v1168_v28 }
 0x477   :  { %4589 = vmatmul.msk.f32.gmra.mxu0 %vm1007_vm14, %v1170_v47  ;;  %4593 = vmatmul.msk.f32.gmra.mxu1 %vm1007_vm14, %v1170_v47 }
 0x47b   :  { %4596 = vmatmul.msk.f32.gmra.mxu2 %vm1007_vm14, %v1169_v35  ;;  %4600 = vmatmul.msk.f32.gmra.mxu3 %vm1007_vm14, %v1169_v35 }
 0x47f   :  { %4590 = vmatmul.msk.f32.gmra.mxu0 %vm1007_vm14, %v1171_v55  ;;  %4594 = vmatmul.msk.f32.gmra.mxu1 %vm1007_vm14, %v1171_v55 }
 0x483   :  { %4597 = vmatmul.msk.f32.gmra.mxu2 %vm1007_vm14, %v1170_v47  ;;  %4601 = vmatmul.msk.f32.gmra.mxu3 %vm1007_vm14, %v1170_v47 }
 0x48b   :  { %4598 = vmatmul.msk.f32.gmra.mxu2 %vm1007_vm14, %v1171_v55  ;;  %4602 = vmatmul.msk.f32.gmra.mxu3 %vm1007_vm14, %v1171_v55 }
 0x4e3   :  { %v5875_v7 = vpop.f32.mrf.mxu0  ;;  %v5877_v17 = vpop.f32.mrf.mxu1 }
 0x4e4   :  { %v1432_v42 = vadd.f32 %v5877_v17, %v5875_v7  ;;  %v1456_v4 = vmul.f32 %v5875_v7, %v5875_v7  ;;  %v1457_v41 = vmul.f32 %v5877_v17, %v5877_v17 }
 0x4ec   :  { %v5879_v19 = vpop.f32.mrf.mxu0  ;;  %v5881_v5 = vpop.f32.mrf.mxu1 }
 0x4ed   :  { %v1437_v11 = vadd.f32 %v5881_v5, %v5879_v19  ;;  %v1460_v2 = vmul.f32 %v5879_v19, %v5879_v19  ;;  %v1461_v30 = vmul.f32 %v5881_v5, %v5881_v5 }
 0x4ef   :  { %v1477_v28 = vadd.f32 %v1461_v30, %v1460_v2 }
 0x4f4   :  { %v5889_v24 = vpop.f32.mrf.mxu0  ;;  %v5891_v32 = vpop.f32.mrf.mxu1 }
 0x4f5   :  { %v1464_v49 = vmul.f32 %v5889_v24, %v5889_v24  ;;  %v1465_v3 = vmul.f32 %v5891_v32, %v5891_v32  ;;  %v1442_v50 = vadd.f32 %v5891_v32, %v5889_v24 }
 0x4f6   :  { %v5883_v23 = vpop.f32.mrf.mxu2  ;;  %v5885_v25 = vpop.f32.mrf.mxu3 }
 0x4f7   :  { %v1482_v15 = vadd.f32 %v1465_v3, %v1464_v49  ;;  %v1433_v46 = vadd.f32 %v1432_v42, %v5883_v23  ;;  %v1459_v3 = vmul.f32 %v5885_v25, %v5885_v25 }
 0x4f9   :  { %v1434_v29 = vadd.f32 %v1433_v46, %v5885_v25 }
 0x4fc   :  { %v5905_v8 = vpop.f32.mrf.mxu0  ;;  %v5907_v9 = vpop.f32.mrf.mxu1 }
 0x4fd   :  { %v1468_v21 = vmul.f32 %v5905_v8, %v5905_v8  ;;  %v1469_v58 = vmul.f32 %v5907_v9, %v5907_v9  ;;  %v1447_v45 = vadd.f32 %v5907_v9, %v5905_v8 }
 0x4fe   :  { %v5893_v33 = vpop.f32.mrf.mxu2  ;;  %v5895_v38 = vpop.f32.mrf.mxu3 }
 0x4ff   :  { %v1438_v39 = vadd.f32 %v1437_v11, %v5893_v33  ;;  %v1487_v31 = vadd.f32 %v1469_v58, %v1468_v21  ;;  %v1462_v47 = vmul.f32 %v5893_v33, %v5893_v33  ;;  %v1458_v11 = vmul.f32 %v5883_v23, %v5883_v23 }
 0x501   :  { %v1439_v57 = vadd.f32 %v1438_v39, %v5895_v38  ;;  %v1472_v39 = vadd.f32 %v1457_v41, %v1456_v4  ;;  %v1478_v49 = vadd.f32 %v1477_v28, %v1462_v47 }
 0x503   :  { %1440 = vadd.xlane.f32.xlu1 %v1439_v57  ;;  %v1463_v57 = vmul.f32 %v5895_v38, %v5895_v38 }
 0x506   :  { %v5909_v27 = vpop.f32.mrf.mxu2  ;;  %v5911_v16 = vpop.f32.mrf.mxu3 }
 0x507   :  { %v1443_v51 = vadd.f32 %v1442_v50, %v5909_v27  ;;  %v1466_v36 = vmul.f32 %v5909_v27, %v5909_v27  ;;  %v1467_v37 = vmul.f32 %v5911_v16, %v5911_v16  ;;  %v1473_v50 = vadd.f32 %v1472_v39, %v1458_v11 }
 0x509   :  { %v1444_v43 = vadd.f32 %v1443_v51, %v5911_v16  ;;  %v1483_v62 = vadd.f32 %v1482_v15, %v1466_v36  ;;  %v1479_v15 = vadd.f32 %v1478_v49, %v1463_v57  ;;  %v1474_v51 = vadd.f32 %v1473_v50, %v1459_v3 }
 0x50b   :  { %1445 = vadd.xlane.f32.xlu0 %v1444_v43  ;;  %v1484_v1 = vadd.f32 %v1483_v62, %v1467_v37 }
 0x50d   :  { %1485 = vadd.xlane.f32.xlu2 %v1484_v1 }
 0x50e   :  { %v5934_v40 = vpop.f32.mrf.mxu2  ;;  %v5936_v6 = vpop.f32.mrf.mxu3 }
 0x50f   :  { %v1448_v52 = vadd.f32 %v1447_v45, %v5934_v40  ;;  %v1470_v12 = vmul.f32 %v5934_v40, %v5934_v40  ;;  %v1471_v26 = vmul.f32 %v5936_v6, %v5936_v6 }
 0x511   :  { %v1449_v34 = vadd.f32 %v1448_v52, %v5936_v6  ;;  %v1488_v35 = vadd.f32 %v1487_v31, %v1470_v12 }
 0x513   :  { %1435 = vadd.xlane.f32.xlu0 %v1434_v29  ;;  %1450 = vadd.xlane.f32.xlu1 %v1449_v34  ;;  %v1489_v55 = vadd.f32 %v1488_v35, %v1471_v26 }
 0x515   :  { %1490 = vadd.xlane.f32.xlu2 %v1489_v55 }
 0x51b   :  { %1480 = vadd.xlane.f32.xlu1 %v1479_v15 }
 0x51d   :  { %1475 = vadd.xlane.f32.xlu2 %v1474_v51 }
 0x576   :  { %v1441_v36 = vpop.xlane.xlu1 %1440 }
 0x577   :  { %v5955_v41 = vmul.f32 0.0026041667, %v1441_v36 }
 0x579   :  { %v1497_v35 = vmul.f32 %v5955_v41, %v5955_v41 }
 0x57e   :  { %v1446_v37 = vpop.xlane.xlu0 %1445 }
 0x57f   :  { %v1454_v42 = vmul.f32 0.0026041667, %v1446_v37 }
 0x580   :  { %v1486_v43 = vpop.xlane.xlu2 %1485 }
 0x581   :  { %v1498_v21 = vmul.f32 %v1454_v42, %v1454_v42  ;;  %v1494_v58 = vmul.f32 0.0026041667, %v1486_v43 }
 0x583   :  { %v1502_v62 = vsub.f32 %v1494_v58, %v1498_v21  ;;  %v1174_v21 = vld [vmem:[%s7000_s10 + $0x10] sm:$0xff] }
 0x585   :  { %v1506_v1 = vadd.f32 1e-05, %v1502_v62 }
 0x586   :  { %v1451_v45 = vpop.xlane.xlu1 %1450  ;;  %v1436_v4 = vpop.xlane.xlu0 %1435 }
 0x587   :  { %4814 = vrsqrt.f32 %v1506_v1  ;;  %v1455_v2 = vmul.f32 0.0026041667, %v1451_v45  ;;  %v5957_v26 = vmul.f32 0.0026041667, %v1436_v4  ;;  %vm1534_vm0 = vweird.f32 %v1506_v1 }
 0x588   :  { %v1491_v30 = vpop.xlane.xlu2 %1490 }
 0x589   :  { %v1499_v46 = vmul.f32 %v1455_v2, %v1455_v2  ;;  %v1495_v31 = vmul.f32 0.0026041667, %v1491_v30  ;;  %v1496_v39 = vmul.f32 %v5957_v26, %v5957_v26 }
 0x58b   :  { %v1503_v52 = vsub.f32 %v1495_v31, %v1499_v46 }
 0x58d   :  { %v4815_v12 = vpop.eup %4814  ;;  %v1507_v28 = vadd.f32 1e-05, %v1503_v52 }
 0x58e   :  { %v1529_v29 = vmul.f32 %v4815_v12, %v1506_v1  ;;  %v1481_v34 = vpop.xlane.xlu1 %1480  ;;  %vm1535_vm15 = vweird.f32 %v4815_v12 }
 0x58f   :  { %4816 = vrsqrt.f32 %v1507_v28  ;;  %v1493_v47 = vmul.f32 0.0026041667, %v1481_v34  ;;  %vm1536_vm1 = vmor %vm1534_vm0, %vm1535_vm15  ;;  %vm1544_vm3 = vweird.f32 %v1507_v28 }
 0x590   :  { %v1530_v55 = vmul.f32 %v4815_v12, %v1529_v29  ;;  %v1476_v11 = vpop.xlane.xlu2 %1475 }
 0x591   :  { %v1501_v57 = vsub.f32 %v1493_v47, %v1497_v35  ;;  %v1492_v49 = vmul.f32 0.0026041667, %v1476_v11  ;;  %v1175_v11 = vld [vmem:[%s7000_s10 + $0x18] sm:$0xff] }
 0x592   :  { %v1531_v3 = vmul.f32 0.5, %v1530_v55  ;;  %v1178_v55 = vld [vmem:[%s7001_s1 + $0x10] sm:$0xff] }
 0x593   :  { %v1505_v50 = vadd.f32 1e-05, %v1501_v57  ;;  %v1500_v15 = vsub.f32 %v1492_v49, %v1496_v39 }
 0x594   :  { %v1532_v51 = vsub.f32 1.5, %v1531_v3 }
 0x595   :  { %v4817_v36 = vpop.eup %4816  ;;  %4818 = vrsqrt.f32 %v1505_v50  ;;  %v1504_v37 = vadd.f32 1e-05, %v1500_v15  ;;  %vm1524_vm6 = vweird.f32 %v1505_v50 }
 0x596   :  { %v1539_v43 = vmul.f32 %v4817_v36, %v1507_v28  ;;  %v1533_v58 = vmul.f32 %v4815_v12, %v1532_v51  ;;  %vm1545_vm2 = vweird.f32 %v4817_v36 }
 0x597   :  { %4820 = vrsqrt.f32 %v1504_v37  ;;  %vm1546_vm4 = vmor %vm1544_vm3, %vm1545_vm2  ;;  %vm1514_vm9 = vweird.f32 %v1504_v37 }
 0x598   :  { %v1540_v62 = vmul.f32 %v4817_v36, %v1539_v43  ;;  %v1537_v45 = vsel %vm1536_vm1, %v4815_v12, %v1533_v58  ;;  %v1179_v43 = vld [vmem:[%s7001_s1 + $0x18] sm:$0xff] }
 0x599   :  { %v1550_v30 = vmul.f32 %v1537_v45, %v1174_v21  ;;  %v1173_v21 = vld [vmem:[%s7000_s10 + $0x8] sm:$0xff] }
 0x59a   :  { %v1541_v46 = vmul.f32 0.5, %v1540_v62 }
 0x59b   :  { %v4819_v31 = vpop.eup %4818  ;;  %1572 = vperm.xlu1 %4805, %v1550_v30   ;;  %v1554_v34 = vmul.f32 %v1550_v30, %v1454_v42  ;;  %v1172_v30 = vld [vmem:[%s7000_s10] sm:$0xff] }
 0x59c   :  { %v1542_v4 = vsub.f32 1.5, %v1541_v46  ;;  %v1519_v52 = vmul.f32 %v4819_v31, %v1505_v50  ;;  %vm1525_vm5 = vweird.f32 %v4819_v31 }
 0x59d   :  { %v4821_v29 = vpop.eup %4820  ;;  %v1558_v49 = vsub.f32 %v1178_v55, %v1554_v34  ;;  %vm1526_vm8 = vmor %vm1524_vm6, %vm1525_vm5  ;;  %v1177_v34 = vld [vmem:[%s7001_s1 + $0x8] sm:$0xff]  ;;  %v1187_v55 = vld [vmem:[%s7002_s27 + $0x18] sm:$0xff] }
 0x59e   :  { %v1543_v1 = vmul.f32 %v4817_v36, %v1542_v4  ;;  %v1520_v35 = vmul.f32 %v4819_v31, %v1519_v52  ;;  %v1509_v47 = vmul.f32 %v4821_v29, %v1504_v37  ;;  %vm1515_vm7 = vweird.f32 %v4821_v29  ;;  %v1176_v52 = vld [vmem:[%s7001_s1] sm:$0xff] }
 0x59f   :  { %vm1516_vm10 = vmor %vm1514_vm9, %vm1515_vm7 }
 0x5a0   :  { %v1521_v39 = vmul.f32 0.5, %v1520_v35  ;;  %v1510_v12 = vmul.f32 %v4821_v29, %v1509_v47  ;;  %v1547_v57 = vsel %vm1546_vm4, %v4817_v36, %v1543_v1  ;;  %v1185_v47 = vld [vmem:[%s7002_s27 + $0x8] sm:$0xff] }
 0x5a1   :  { %v1551_v3 = vmul.f32 %v1547_v57, %v1175_v11 }
 0x5a2   :  { %v1522_v15 = vsub.f32 1.5, %v1521_v39  ;;  %v1511_v51 = vmul.f32 0.5, %v1510_v12 }
 0x5a3   :  { %1608 = vperm.xlu1 %4805, %v1558_v49   ;;  %v1555_v42 = vmul.f32 %v1551_v3, %v1455_v2 }
 0x5a4   :  { %v1512_v28 = vsub.f32 1.5, %v1511_v51  ;;  %v1523_v58 = vmul.f32 %v4819_v31, %v1522_v15 }
 0x5a5   :  { %v1559_v62 = vsub.f32 %v1179_v43, %v1555_v42 }
 0x5a6   :  { %v1513_v45 = vmul.f32 %v4821_v29, %v1512_v28  ;;  %v1527_v36 = vsel %vm1526_vm8, %v4819_v31, %v1523_v58  ;;  %v1186_v31 = vld [vmem:[%s7002_s27 + $0x10] sm:$0xff] }
 0x5a7   :  { %1613 = vperm.xlu2 %4804, %v1559_v62   ;;  %v1549_v46 = vmul.f32 %v1527_v36, %v1173_v21 }
 0x5a8   :  { %v1517_v4 = vsel %vm1516_vm10, %v4821_v29, %v1513_v45  ;;  %v1184_v29 = vld [vmem:[%s7002_s27] sm:$0xff] }
 0x5a9   :  { %1567 = vperm.xlu0 %4803, %v1549_v46   ;;  %v1548_v2 = vmul.f32 %v1517_v4, %v1172_v30  ;;  %v1553_v50 = vmul.f32 %v1549_v46, %v5955_v41 }
 0x5ab   :  { %v1552_v1 = vmul.f32 %v1548_v2, %v5957_v26  ;;  %v1557_v37 = vsub.f32 %v1177_v34, %v1553_v50 }
 0x5ad   :  { %v1556_v35 = vsub.f32 %v1176_v52, %v1552_v1 }
 0x5af   :  { %1598 = vperm.xlu1 %4805, %v1556_v35   ;;  %1603 = vperm.xlu2 %4804, %v1557_v37  }
 0x5b1   :  { %1577 = vperm.xlu0 %4803, %v1551_v3  }
 0x5b7   :  { %1660 = vperm.xlu1 %4805, %v1186_v31   ;;  %1655 = vperm.xlu2 %4804, %v1185_v47  }
 0x5b9   :  { %1562 = vperm.xlu0 %4803, %v1548_v2  }
 0x5c1   :  { %1650 = vperm.xlu0 %4803, %v1184_v29  }
 0x5c9   :  { %1665 = vperm.xlu0 %4803, %v1187_v55  }
 0x601   :  { %v1614_v39 = vpop.permute.xlu2 %1613 }
 0x609   :  { %v1604_v62 = vpop.permute.xlu2 %1603 }
 0x60d   :  { %v1573_v41 = vpop.permute.xlu1 %1572 }
 0x60e   :  { %v1588_v12 = vmul.f32 %v1573_v41, %v5889_v24  ;;  %v1589_v57 = vmul.f32 %v1573_v41, %v5891_v32  ;;  %v1590_v49 = vmul.f32 %v1573_v41, %v5909_v27  ;;  %v1591_v3 = vmul.f32 %v1573_v41, %v5911_v16 }
 0x615   :  { %v1609_v26 = vpop.permute.xlu1 %1608 }
 0x616   :  { %v1624_v27 = vadd.f32 %v1609_v26, %v1588_v12  ;;  %v1625_v30 = vadd.f32 %v1609_v26, %v1589_v57  ;;  %v1627_v46 = vadd.f32 %v1609_v26, %v1591_v3 }
 0x618   :  { %v1641_v34 = vmax.f32 %v1625_v30, 0.0  ;;  %v1643_v35 = vmax.f32 %v1627_v46, 0.0  ;;  %v1816_v30 = vld [vmem:[%s7003_s24 + $0x20] sm:$0xff]  ;;  %v1814_v46 = vld [vmem:[%s7003_s24 + $0x10] sm:$0xff] }
 0x61b   :  { %v1568_v11 = vpop.permute.xlu0 %1567 }
 0x61c   :  { %v1584_v15 = vmul.f32 %v1568_v11, %v5879_v19  ;;  %v1585_v24 = vmul.f32 %v1568_v11, %v5881_v5  ;;  %v1586_v58 = vmul.f32 %v1568_v11, %v5893_v33  ;;  %v1587_v32 = vmul.f32 %v1568_v11, %v5895_v38 }
 0x61d   :  { %v1640_v33 = vmax.f32 %v1624_v27, 0.0  ;;  %v1821_v27 = vld [vmem:[%s7003_s24 + $0x48] sm:$0xff] }
 0x61e   :  { %v1621_v50 = vadd.f32 %v1604_v62, %v1585_v24  ;;  %v1622_v5 = vadd.f32 %v1604_v62, %v1586_v58  ;;  %v1623_v38 = vadd.f32 %v1604_v62, %v1587_v32  ;;  %v1823_v24 = vld [vmem:[%s7003_s24 + $0x58] sm:$0xff]  ;;  %v1822_v58 = vld [vmem:[%s7003_s24 + $0x50] sm:$0xff]  ;;  %v1182_v32 = vld [vmem:[#allocation5 + $0x10] sm:$0xff] }
 0x620   :  { %v1637_v11 = vmax.f32 %v1621_v50, 0.0  ;;  %v1639_v12 = vmax.f32 %v1623_v38, 0.0 }
 0x621   :  { %v1599_v41 = vpop.permute.xlu1 %1598 }
 0x623   :  { %v1578_v51 = vpop.permute.xlu0 %1577 }
 0x624   :  { %v1592_v43 = vmul.f32 %v1578_v51, %v5905_v8  ;;  %v1593_v42 = vmul.f32 %v1578_v51, %v5907_v9  ;;  %v1594_v28 = vmul.f32 %v1578_v51, %v5934_v40  ;;  %v1595_v21 = vmul.f32 %v1578_v51, %v5936_v6  ;;  %v1827_v51 = vld [vmem:[%s7003_s24 + $0x78] sm:$0xff] }
 0x625   :  { %v1626_v8 = vadd.f32 %v1609_v26, %v1590_v49  ;;  %v1620_v9 = vadd.f32 %v1604_v62, %v1584_v15  ;;  %v1180_v15 = vld [vmem:[#allocation5] sm:$0xff]  ;;  %v1820_v62 = vld [vmem:[%s7003_s24 + $0x40] sm:$0xff] }
 0x626   :  { %v1628_v16 = vadd.f32 %v1614_v39, %v1592_v43  ;;  %v1629_v45 = vadd.f32 %v1614_v39, %v1593_v42  ;;  %v1630_v19 = vadd.f32 %v1614_v39, %v1594_v28  ;;  %v1631_v36 = vadd.f32 %v1614_v39, %v1595_v21  ;;  %v1826_v43 = vld [vmem:[%s7003_s24 + $0x70] sm:$0xff]  ;;  %v1825_v42 = vld [vmem:[%s7003_s24 + $0x68] sm:$0xff]  ;;  %v1181_v28 = vld [vmem:[#allocation5 + $0x8] sm:$0xff] }
 0x627   :  { %v1642_v1 = vmax.f32 %v1626_v8, 0.0  ;;  %v1636_v37 = vmax.f32 %v1620_v9, 0.0  ;;  %v1638_v39 = vmax.f32 %v1622_v5, 0.0  ;;  %v1824_v21 = vld [vmem:[%s7003_s24 + $0x60] sm:$0xff]  ;;  %v1815_v8 = vld [vmem:[%s7003_s24 + $0x18] sm:$0xff]  ;;  %v1813_v9 = vld [vmem:[%s7003_s24 + $0x8] sm:$0xff] }
 0x628   :  { %v1644_v4 = vmax.f32 %v1628_v16, 0.0  ;;  %v1645_v40 = vmax.f32 %v1629_v45, 0.0  ;;  %v1646_v2 = vmax.f32 %v1630_v19, 0.0  ;;  %v1647_v6 = vmax.f32 %v1631_v36, 0.0  ;;  %v1819_v16 = vld [vmem:[%s7003_s24 + $0x38] sm:$0xff]  ;;  %v1183_v45 = vld [vmem:[#allocation5 + $0x18] sm:$0xff] }
 0x629   :  { %v1818_v19 = vld [vmem:[%s7003_s24 + $0x30] sm:$0xff]  ;;  %v1817_v36 = vld [vmem:[%s7003_s24 + $0x28] sm:$0xff] }
 0x62a   :  { %1692 = vmatpush.msra.mxu0 %v1644_v4  ;;  %1721 = vmatpush.msra.mxu1 %v1645_v40  ;;  %v1812_v4 = vld [vmem:[%s7003_s24] sm:$0xff] }
 0x62b   :  { %1750 = vmatpush.msra.mxu2 %v1646_v2  ;;  %1779 = vmatpush.msra.mxu3 %v1647_v6  ;;  %v1563_v52 = vpop.permute.xlu0 %1562 }
 0x62c   :  { %v1580_v31 = vmul.f32 %v1563_v52, %v5875_v7  ;;  %v1581_v47 = vmul.f32 %v1563_v52, %v5877_v17  ;;  %v1582_v29 = vmul.f32 %v1563_v52, %v5883_v23  ;;  %v1583_v55 = vmul.f32 %v1563_v52, %v5885_v25  ;;  %1693 = vmatpush.msra.mxu0 %v1640_v33  ;;  %v1656_v52 = vpop.permute.xlu2 %1655 }
 0x62d   :  { %1722 = vmatpush.msra.mxu1 %v1641_v34  ;;  %1751 = vmatpush.msra.mxu2 %v1642_v1 }
 0x62e   :  { %1780 = vmatpush.msra.mxu3 %v1643_v35  ;;  %1694 = vmatpush.msra.mxu0 %v1636_v37  ;;  %v1616_v26 = vadd.f32 %v1599_v41, %v1580_v31  ;;  %v1617_v57 = vadd.f32 %v1599_v41, %v1581_v47  ;;  %v1618_v49 = vadd.f32 %v1599_v41, %v1582_v29 }
 0x62f   :  { %1723 = vmatpush.msra.mxu1 %v1637_v11  ;;  %1752 = vmatpush.msra.mxu2 %v1638_v39  ;;  %v1619_v7 = vadd.f32 %v1599_v41, %v1583_v55  ;;  %v1661_v39 = vpop.permute.xlu1 %1660 }
 0x630   :  { %1781 = vmatpush.msra.mxu3 %v1639_v12  ;;  %v1632_v17 = vmax.f32 %v1616_v26, 0.0  ;;  %v1633_v23 = vmax.f32 %v1617_v57, 0.0  ;;  %v1634_v25 = vmax.f32 %v1618_v49, 0.0 }
 0x631   :  { %v1635_v3 = vmax.f32 %v1619_v7, 0.0 }
 0x632   :  { %1695 = vmatpush.msra.mxu0 %v1632_v17  ;;  %1724 = vmatpush.msra.mxu1 %v1633_v23 }
 0x633   :  { %1753 = vmatpush.msra.mxu2 %v1634_v25  ;;  %1782 = vmatpush.msra.mxu3 %v1635_v3  ;;  %v1651_v40 = vpop.permute.xlu0 %1650 }
 0x634   :  { %4603 = vmatmul.msk.f32.vlgmr.msra.gmra.mxu0 %vm1007_vm14, %v1180_v15  ;;  %4607 = vmatmul.msk.f32.vlgmr.msra.gmra.mxu1 %vm1007_vm14, %v1180_v15 }
 0x635   :  { %4611 = vmatmul.msk.f32.vlgmr.msra.gmra.mxu2 %vm1007_vm14, %v1180_v15  ;;  %4615 = vmatmul.msk.f32.vlgmr.msra.gmra.mxu3 %vm1007_vm14, %v1180_v15 }
 0x636   :  { %1848 = vmatpush.msrb.mxu0 %v1827_v51  ;;  %1877 = vmatpush.msrb.mxu1 %v1827_v51 }
 0x637   :  { %1906 = vmatpush.msrb.mxu2 %v1827_v51  ;;  %1935 = vmatpush.msrb.mxu3 %v1827_v51 }
 0x638   :  { %1849 = vmatpush.msrb.mxu0 %v1826_v43  ;;  %1878 = vmatpush.msrb.mxu1 %v1826_v43 }
 0x639   :  { %1907 = vmatpush.msrb.mxu2 %v1826_v43  ;;  %1936 = vmatpush.msrb.mxu3 %v1826_v43 }
 0x63a   :  { %1850 = vmatpush.msrb.mxu0 %v1825_v42  ;;  %1879 = vmatpush.msrb.mxu1 %v1825_v42 }
 0x63b   :  { %1908 = vmatpush.msrb.mxu2 %v1825_v42  ;;  %1937 = vmatpush.msrb.mxu3 %v1825_v42  ;;  %v1666_v3 = vpop.permute.xlu0 %1665 }
 0x63c   :  { %4604 = vmatmul.msk.f32.gmra.mxu0 %vm1007_vm14, %v1181_v28  ;;  %4608 = vmatmul.msk.f32.gmra.mxu1 %vm1007_vm14, %v1181_v28 }
 0x63d   :  { %4612 = vmatmul.msk.f32.gmra.mxu2 %vm1007_vm14, %v1181_v28  ;;  %4616 = vmatmul.msk.f32.gmra.mxu3 %vm1007_vm14, %v1181_v28 }
 0x63e   :  { %1851 = vmatpush.msrb.mxu0 %v1824_v21  ;;  %1880 = vmatpush.msrb.mxu1 %v1824_v21 }
 0x63f   :  { %1909 = vmatpush.msrb.mxu2 %v1824_v21  ;;  %1938 = vmatpush.msrb.mxu3 %v1824_v21 }
 0x640   :  { %1852 = vmatpush.msrb.mxu0 %v1823_v24  ;;  %1881 = vmatpush.msrb.mxu1 %v1823_v24 }
 0x641   :  { %1910 = vmatpush.msrb.mxu2 %v1823_v24  ;;  %1939 = vmatpush.msrb.mxu3 %v1823_v24 }
 0x642   :  { %1853 = vmatpush.msrb.mxu0 %v1822_v58  ;;  %1882 = vmatpush.msrb.mxu1 %v1822_v58 }
 0x643   :  { %1911 = vmatpush.msrb.mxu2 %v1822_v58  ;;  %1940 = vmatpush.msrb.mxu3 %v1822_v58 }
 0x644   :  { %4605 = vmatmul.msk.f32.gmra.mxu0 %vm1007_vm14, %v1182_v32  ;;  %4609 = vmatmul.msk.f32.gmra.mxu1 %vm1007_vm14, %v1182_v32 }
 0x645   :  { %4613 = vmatmul.msk.f32.gmra.mxu2 %vm1007_vm14, %v1182_v32  ;;  %4617 = vmatmul.msk.f32.gmra.mxu3 %vm1007_vm14, %v1182_v32 }
 0x646   :  { %1854 = vmatpush.msrb.mxu0 %v1821_v27  ;;  %1883 = vmatpush.msrb.mxu1 %v1821_v27 }
 0x647   :  { %1912 = vmatpush.msrb.mxu2 %v1821_v27  ;;  %1941 = vmatpush.msrb.mxu3 %v1821_v27 }
 0x648   :  { %1855 = vmatpush.msrb.mxu0 %v1820_v62  ;;  %1884 = vmatpush.msrb.mxu1 %v1820_v62 }
 0x649   :  { %1913 = vmatpush.msrb.mxu2 %v1820_v62  ;;  %1942 = vmatpush.msrb.mxu3 %v1820_v62 }
 0x64a   :  { %1856 = vmatpush.msrb.mxu0 %v1819_v16  ;;  %1885 = vmatpush.msrb.mxu1 %v1819_v16 }
 0x64b   :  { %1914 = vmatpush.msrb.mxu2 %v1819_v16  ;;  %1943 = vmatpush.msrb.mxu3 %v1819_v16 }
 0x64c   :  { %4606 = vmatmul.msk.f32.gmra.mxu0 %vm1007_vm14, %v1183_v45  ;;  %4610 = vmatmul.msk.f32.gmra.mxu1 %vm1007_vm14, %v1183_v45 }
 0x64d   :  { %4614 = vmatmul.msk.f32.gmra.mxu2 %vm1007_vm14, %v1183_v45  ;;  %4618 = vmatmul.msk.f32.gmra.mxu3 %vm1007_vm14, %v1183_v45 }
 0x64e   :  { %1857 = vmatpush.msrb.mxu0 %v1818_v19  ;;  %1886 = vmatpush.msrb.mxu1 %v1818_v19 }
 0x64f   :  { %1915 = vmatpush.msrb.mxu2 %v1818_v19  ;;  %1944 = vmatpush.msrb.mxu3 %v1818_v19 }
 0x650   :  { %1858 = vmatpush.msrb.mxu0 %v1817_v36  ;;  %1887 = vmatpush.msrb.mxu1 %v1817_v36 }
 0x651   :  { %1916 = vmatpush.msrb.mxu2 %v1817_v36  ;;  %1945 = vmatpush.msrb.mxu3 %v1817_v36 }
 0x652   :  { %1859 = vmatpush.msrb.mxu0 %v1816_v30  ;;  %1888 = vmatpush.msrb.mxu1 %v1816_v30 }
 0x653   :  { %1917 = vmatpush.msrb.mxu2 %v1816_v30  ;;  %1946 = vmatpush.msrb.mxu3 %v1816_v30 }
 0x654   :  { %1860 = vmatpush.msrb.mxu0 %v1815_v8  ;;  %1889 = vmatpush.msrb.mxu1 %v1815_v8 }
 0x655   :  { %1918 = vmatpush.msrb.mxu2 %v1815_v8  ;;  %1947 = vmatpush.msrb.mxu3 %v1815_v8 }
 0x656   :  { %1861 = vmatpush.msrb.mxu0 %v1814_v46  ;;  %1890 = vmatpush.msrb.mxu1 %v1814_v46 }
 0x657   :  { %1919 = vmatpush.msrb.mxu2 %v1814_v46  ;;  %1948 = vmatpush.msrb.mxu3 %v1814_v46 }
 0x658   :  { %1862 = vmatpush.msrb.mxu0 %v1813_v9  ;;  %1891 = vmatpush.msrb.mxu1 %v1813_v9 }
 0x659   :  { %1920 = vmatpush.msrb.mxu2 %v1813_v9  ;;  %1949 = vmatpush.msrb.mxu3 %v1813_v9 }
 0x65a   :  { %1863 = vmatpush.msrb.mxu0 %v1812_v4  ;;  %1892 = vmatpush.msrb.mxu1 %v1812_v4 }
 0x65b   :  { %1921 = vmatpush.msrb.mxu2 %v1812_v4  ;;  %1950 = vmatpush.msrb.mxu3 %v1812_v4 }
 0x6b1   :  { %v1697_v2 = vpop.f32.mrf.mxu0  ;;  %v1726_v6 = vpop.f32.mrf.mxu1 }
 0x6b2   :  { %v1698_v50 = vadd.f32 %v1697_v2, %v1651_v40  ;;  %v1727_v5 = vadd.f32 %v1726_v6, %v1651_v40  ;;  %v1828_v6 = vld [vmem:[#allocation7] sm:$0xff] }
 0x6b4   :  { %v6026_v33 = vadd.f32 %v1698_v50, %v5793_v61  ;;  %v6029_v38 = vadd.f32 %v1727_v5, %v5795_v22 }
 0x6b6   :  { %1864 = vmatmul.f32.vlgmr.msrb.gmra.mxu0 %v6026_v33  ;;  %1893 = vmatmul.f32.vlgmr.msrb.gmra.mxu1 %v6029_v38 }
 0x6b8   :  { %v1755_v34 = vpop.f32.mrf.mxu2  ;;  %v1784_v1 = vpop.f32.mrf.mxu3 }
 0x6b9   :  { %v1756_v35 = vadd.f32 %v1755_v34, %v1651_v40  ;;  %v1785_v37 = vadd.f32 %v1784_v1, %v1651_v40  ;;  %v1700_v31 = vpop.f32.mrf.mxu0  ;;  %v1729_v47 = vpop.f32.mrf.mxu1  ;;  %v1830_v34 = vld [vmem:[#allocation7 + $0x10] sm:$0xff]  ;;  %v1831_v1 = vld [vmem:[#allocation7 + $0x18] sm:$0xff] }
 0x6ba   :  { %v1701_v29 = vadd.f32 %v1700_v31, %v1656_v52  ;;  %v1730_v55 = vadd.f32 %v1729_v47, %v1656_v52 }
 0x6bb   :  { %v6034_v41 = vadd.f32 %v1756_v35, %v5803_v53  ;;  %v6037_v61 = vadd.f32 %v1785_v37, %v5805_v54 }
 0x6bc   :  { %v6040_v22 = vadd.f32 %v1701_v29, %v5807_v13  ;;  %v6043_v11 = vadd.f32 %v1730_v55, %v5809_v14 }
 0x6bd   :  { %1922 = vmatmul.f32.vlgmr.msrb.gmra.mxu2 %v6034_v41  ;;  %1951 = vmatmul.f32.vlgmr.msrb.gmra.mxu3 %v6037_v61 }
 0x6be   :  { %1867 = vmatmul.f32.gmra.mxu0 %v6040_v22  ;;  %1896 = vmatmul.f32.gmra.mxu1 %v6043_v11 }
 0x6c0   :  { %v1758_v53 = vpop.f32.mrf.mxu2  ;;  %v1787_v12 = vpop.f32.mrf.mxu3 }
 0x6c1   :  { %v1759_v26 = vadd.f32 %v1758_v53, %v1656_v52  ;;  %v1788_v54 = vadd.f32 %v1787_v12, %v1656_v52  ;;  %v1703_v57 = vpop.f32.mrf.mxu0  ;;  %v1732_v49 = vpop.f32.mrf.mxu1  ;;  %v1829_v52 = vld [vmem:[#allocation7 + $0x8] sm:$0xff] }
 0x6c2   :  { %v1704_v13 = vadd.f32 %v1703_v57, %v1661_v39  ;;  %v1733_v7 = vadd.f32 %v1732_v49, %v1661_v39 }
 0x6c3   :  { %v6050_v14 = vadd.f32 %v1759_v26, %v5819_v63  ;;  %v6053_v17 = vadd.f32 %v1788_v54, %v5821_v0 }
 0x6c4   :  { %v6056_v23 = vadd.f32 %v1704_v13, %v5823_v56  ;;  %v6059_v25 = vadd.f32 %v1733_v7, %v5825_v48 }
 0x6c5   :  { %1925 = vmatmul.f32.gmra.mxu2 %v6050_v14  ;;  %1954 = vmatmul.f32.gmra.mxu3 %v6053_v17 }
 0x6c6   :  { %1870 = vmatmul.f32.gmra.mxu0 %v6056_v23  ;;  %1899 = vmatmul.f32.gmra.mxu1 %v6059_v25 }
 0x6c8   :  { %v1761_v63 = vpop.f32.mrf.mxu2  ;;  %v1790_v15 = vpop.f32.mrf.mxu3 }
 0x6c9   :  { %v1762_v51 = vadd.f32 %v1761_v63, %v1661_v39  ;;  %v1791_v0 = vadd.f32 %v1790_v15, %v1661_v39  ;;  %v1706_v43 = vpop.f32.mrf.mxu0  ;;  %v1735_v42 = vpop.f32.mrf.mxu1 }
 0x6ca   :  { %v1707_v56 = vadd.f32 %v1706_v43, %v1666_v3  ;;  %v1736_v28 = vadd.f32 %v1735_v42, %v1666_v3 }
 0x6cb   :  { %v6066_v48 = vadd.f32 %v1762_v51, %v5835_v20  ;;  %v6069_v21 = vadd.f32 %v1791_v0, %v5837_v18 }
 0x6cc   :  { %v6072_v24 = vadd.f32 %v1707_v56, %v5839_v44  ;;  %v6075_v58 = vadd.f32 %v1736_v28, %v5841_v10 }
 0x6cd   :  { %1928 = vmatmul.f32.gmra.mxu2 %v6066_v48  ;;  %1957 = vmatmul.f32.gmra.mxu3 %v6069_v21 }
 0x6ce   :  { %1873 = vmatmul.f32.gmra.mxu0 %v6072_v24  ;;  %1902 = vmatmul.f32.gmra.mxu1 %v6075_v58 }
 0x6d0   :  { %v1764_v32 = vpop.f32.mrf.mxu2  ;;  %v1793_v20 = vpop.f32.mrf.mxu3 }
 0x6d1   :  { %v1765_v27 = vadd.f32 %v1764_v32, %v1666_v3  ;;  %v1794_v62 = vadd.f32 %v1793_v20, %v1666_v3 }
 0x6d3   :  { %v6082_v18 = vadd.f32 %v1765_v27, %v5849_v59  ;;  %v6085_v44 = vadd.f32 %v1794_v62, %v5851_v60 }
 0x6d5   :  { %1931 = vmatmul.f32.gmra.mxu2 %v6082_v18  ;;  %1960 = vmatmul.f32.gmra.mxu3 %v6085_v44 }
 0x733   :  { %v1865_v10 = vpop.f32.mrf.mxu0  ;;  %v1894_v16 = vpop.f32.mrf.mxu1 }
 0x73b   :  { %v1868_v45 = vpop.f32.mrf.mxu0  ;;  %v1897_v19 = vpop.f32.mrf.mxu1 }
 0x740   :  { %v1923_v36 = vpop.f32.mrf.mxu2  ;;  %v1952_v30 = vpop.f32.mrf.mxu3 }
 0x743   :  { %v1871_v8 = vpop.f32.mrf.mxu0  ;;  %v1900_v46 = vpop.f32.mrf.mxu1 }
 0x748   :  { %v1926_v9 = vpop.f32.mrf.mxu2  ;;  %v1955_v4 = vpop.f32.mrf.mxu3 }
 0x74b   :  { %v1874_v40 = vpop.f32.mrf.mxu0  ;;  %v1903_v59 = vpop.f32.mrf.mxu1 }
 0x74c   :  { %1988 = vmatpush.msra.mxu0 %v1874_v40  ;;  %2017 = vmatpush.msra.mxu1 %v1903_v59 }
 0x74e   :  { %1989 = vmatpush.msra.mxu0 %v1871_v8  ;;  %2018 = vmatpush.msra.mxu1 %v1900_v46 }
 0x750   :  { %v1929_v60 = vpop.f32.mrf.mxu2  ;;  %v1958_v2 = vpop.f32.mrf.mxu3  ;;  %1990 = vmatpush.msra.mxu0 %v1868_v45  ;;  %2019 = vmatpush.msra.mxu1 %v1897_v19 }
 0x752   :  { %1991 = vmatpush.msra.mxu0 %v1865_v10  ;;  %2020 = vmatpush.msra.mxu1 %v1894_v16 }
 0x753   :  { %4619 = vmatmul.msk.f32.vlgmr.msra.gmra.mxu0 %vm1007_vm14, %v1828_v6  ;;  %4623 = vmatmul.msk.f32.vlgmr.msra.gmra.mxu1 %vm1007_vm14, %v1828_v6 }
 0x758   :  { %v1932_v50 = vpop.f32.mrf.mxu2  ;;  %v1961_v5 = vpop.f32.mrf.mxu3 }
 0x759   :  { %2046 = vmatpush.msra.mxu2 %v1932_v50  ;;  %2075 = vmatpush.msra.mxu3 %v1961_v5 }
 0x75b   :  { %2047 = vmatpush.msra.mxu2 %v1929_v60  ;;  %2076 = vmatpush.msra.mxu3 %v1958_v2 }
 0x75c   :  { %4620 = vmatmul.msk.f32.gmra.mxu0 %vm1007_vm14, %v1829_v52  ;;  %4624 = vmatmul.msk.f32.gmra.mxu1 %vm1007_vm14, %v1829_v52 }
 0x75d   :  { %2048 = vmatpush.msra.mxu2 %v1926_v9  ;;  %2077 = vmatpush.msra.mxu3 %v1955_v4 }
 0x75f   :  { %2049 = vmatpush.msra.mxu2 %v1923_v36  ;;  %2078 = vmatpush.msra.mxu3 %v1952_v30 }
 0x760   :  { %4627 = vmatmul.msk.f32.vlgmr.msra.gmra.mxu2 %vm1007_vm14, %v1828_v6  ;;  %4631 = vmatmul.msk.f32.vlgmr.msra.gmra.mxu3 %vm1007_vm14, %v1828_v6 }
 0x764   :  { %4621 = vmatmul.msk.f32.gmra.mxu0 %vm1007_vm14, %v1830_v34  ;;  %4625 = vmatmul.msk.f32.gmra.mxu1 %vm1007_vm14, %v1830_v34 }
 0x768   :  { %4628 = vmatmul.msk.f32.gmra.mxu2 %vm1007_vm14, %v1829_v52  ;;  %4632 = vmatmul.msk.f32.gmra.mxu3 %vm1007_vm14, %v1829_v52 }
 0x76c   :  { %4622 = vmatmul.msk.f32.gmra.mxu0 %vm1007_vm14, %v1831_v1  ;;  %4626 = vmatmul.msk.f32.gmra.mxu1 %vm1007_vm14, %v1831_v1 }
 0x770   :  { %4629 = vmatmul.msk.f32.gmra.mxu2 %vm1007_vm14, %v1830_v34  ;;  %4633 = vmatmul.msk.f32.gmra.mxu3 %vm1007_vm14, %v1830_v34 }
 0x778   :  { %4630 = vmatmul.msk.f32.gmra.mxu2 %vm1007_vm14, %v1831_v1  ;;  %4634 = vmatmul.msk.f32.gmra.mxu3 %vm1007_vm14, %v1831_v1 }
 0x7d0   :  { %v6105_v35 = vpop.f32.mrf.mxu0  ;;  %v6107_v37 = vpop.f32.mrf.mxu1 }
 0x7d1   :  { %v2116_v62 = vmul.f32 %v6105_v35, %v6105_v35  ;;  %v2117_v10 = vmul.f32 %v6107_v37, %v6107_v37  ;;  %v2092_v1 = vadd.f32 %v6107_v37, %v6105_v35 }
 0x7d3   :  { %v2132_v60 = vadd.f32 %v2117_v10, %v2116_v62 }
 0x7d9   :  { %v6109_v31 = vpop.f32.mrf.mxu0  ;;  %v6111_v47 = vpop.f32.mrf.mxu1 }
 0x7da   :  { %v2097_v39 = vadd.f32 %v6111_v47, %v6109_v31  ;;  %v2120_v16 = vmul.f32 %v6109_v31, %v6109_v31  ;;  %v2121_v45 = vmul.f32 %v6111_v47, %v6111_v47 }
 0x7dc   :  { %v2137_v2 = vadd.f32 %v2121_v45, %v2120_v16 }
 0x7e1   :  { %v6119_v53 = vpop.f32.mrf.mxu0  ;;  %v6121_v12 = vpop.f32.mrf.mxu1 }
 0x7e2   :  { %v2102_v13 = vadd.f32 %v6121_v12, %v6119_v53  ;;  %v2124_v7 = vmul.f32 %v6119_v53, %v6119_v53  ;;  %v2125_v3 = vmul.f32 %v6121_v12, %v6121_v12 }
 0x7e3   :  { %v6113_v29 = vpop.f32.mrf.mxu2  ;;  %v6115_v55 = vpop.f32.mrf.mxu3 }
 0x7e4   :  { %v2142_v42 = vadd.f32 %v2125_v3, %v2124_v7  ;;  %v2118_v59 = vmul.f32 %v6113_v29, %v6113_v29  ;;  %v2093_v7 = vadd.f32 %v2092_v1, %v6113_v29 }
 0x7e9   :  { %v6135_v63 = vpop.f32.mrf.mxu0  ;;  %v6137_v15 = vpop.f32.mrf.mxu1 }
 0x7ea   :  { %v2128_v28 = vmul.f32 %v6135_v63, %v6135_v63  ;;  %v2129_v32 = vmul.f32 %v6137_v15, %v6137_v15  ;;  %v2107_v27 = vadd.f32 %v6137_v15, %v6135_v63 }
 0x7eb   :  { %v6123_v26 = vpop.f32.mrf.mxu2  ;;  %v6125_v54 = vpop.f32.mrf.mxu3 }
 0x7ec   :  { %v2098_v57 = vadd.f32 %v2097_v39, %v6123_v26  ;;  %v2147_v30 = vadd.f32 %v2129_v32, %v2128_v28  ;;  %v2122_v52 = vmul.f32 %v6123_v26, %v6123_v26  ;;  %v2119_v39 = vmul.f32 %v6115_v55, %v6115_v55 }
 0x7ee   :  { %v2099_v49 = vadd.f32 %v2098_v57, %v6125_v54  ;;  %v2133_v57 = vadd.f32 %v2132_v60, %v2118_v59 }
 0x7f0   :  { %2100 = vadd.xlane.f32.xlu2 %v2099_v49  ;;  %v2123_v49 = vmul.f32 %v6125_v54, %v6125_v54  ;;  %v2134_v3 = vadd.f32 %v2133_v57, %v2119_v39 }
 0x7f3   :  { %v6139_v51 = vpop.f32.mrf.mxu2  ;;  %v6141_v0 = vpop.f32.mrf.mxu3 }
 0x7f4   :  { %v2103_v43 = vadd.f32 %v2102_v13, %v6139_v51  ;;  %v2126_v20 = vmul.f32 %v6139_v51, %v6139_v51  ;;  %v2127_v19 = vmul.f32 %v6141_v0, %v6141_v0  ;;  %v2138_v13 = vadd.f32 %v2137_v2, %v2122_v52 }
 0x7f6   :  { %v2104_v56 = vadd.f32 %v2103_v43, %v6141_v0  ;;  %v2143_v36 = vadd.f32 %v2142_v42, %v2126_v20  ;;  %v2139_v43 = vadd.f32 %v2138_v13, %v2123_v49  ;;  %v2094_v42 = vadd.f32 %v2093_v7, %v6115_v55 }
 0x7f8   :  { %2105 = vadd.xlane.f32.xlu1 %v2104_v56  ;;  %v2144_v6 = vadd.f32 %v2143_v36, %v2127_v19 }
 0x7fb   :  { %v6163_v8 = vpop.f32.mrf.mxu2  ;;  %v6165_v46 = vpop.f32.mrf.mxu3 }
 0x7fc   :  { %v2108_v9 = vadd.f32 %v2107_v27, %v6163_v8  ;;  %v2130_v4 = vmul.f32 %v6163_v8, %v6163_v8  ;;  %v2131_v40 = vmul.f32 %v6165_v46, %v6165_v46 }
 0x7fe   :  { %v2109_v50 = vadd.f32 %v2108_v9, %v6165_v46  ;;  %v2148_v5 = vadd.f32 %v2147_v30, %v2130_v4 }
 0x800   :  { %2145 = vadd.xlane.f32.xlu1 %v2144_v6  ;;  %2110 = vadd.xlane.f32.xlu2 %v2109_v50  ;;  %v2149_v34 = vadd.f32 %v2148_v5, %v2131_v40 }
 0x802   :  { %2150 = vadd.xlane.f32.xlu0 %v2149_v34 }
 0x808   :  { %2135 = vadd.xlane.f32.xlu1 %v2134_v3  ;;  %2140 = vadd.xlane.f32.xlu2 %v2139_v43 }
 0x80a   :  { %2095 = vadd.xlane.f32.xlu0 %v2094_v42 }
 0x863   :  { %v2101_v56 = vpop.xlane.xlu2 %2100 }
 0x864   :  { %v6189_v9 = vmul.f32 0.0026041667, %v2101_v56 }
 0x866   :  { %v2157_v2 = vmul.f32 %v6189_v9, %v6189_v9 }
 0x86b   :  { %v2106_v28 = vpop.xlane.xlu1 %2105 }
 0x86c   :  { %v6185_v32 = vmul.f32 0.0026041667, %v2106_v28 }
 0x86e   :  { %v2158_v62 = vmul.f32 %v6185_v32, %v6185_v32 }
 0x873   :  { %v2146_v20 = vpop.xlane.xlu1 %2145  ;;  %v2111_v27 = vpop.xlane.xlu2 %2110 }
 0x874   :  { %v2154_v10 = vmul.f32 0.0026041667, %v2146_v20  ;;  %v2115_v16 = vmul.f32 0.0026041667, %v2111_v27 }
 0x875   :  { %v2151_v45 = vpop.xlane.xlu0 %2150 }
 0x876   :  { %v2162_v19 = vsub.f32 %v2154_v10, %v2158_v62  ;;  %v2159_v36 = vmul.f32 %v2115_v16, %v2115_v16  ;;  %v2155_v30 = vmul.f32 0.0026041667, %v2151_v45 }
 0x878   :  { %v2166_v4 = vadd.f32 1e-05, %v2162_v19  ;;  %v2163_v40 = vsub.f32 %v2155_v30, %v2159_v36  ;;  %v1834_v36 = vld [vmem:[%s7004_s0 + $0x10] sm:$0xff] }
 0x87a   :  { %4822 = vrsqrt.f32 %v2166_v4  ;;  %v2167_v59 = vadd.f32 1e-05, %v2163_v40  ;;  %vm2194_vm12 = vweird.f32 %v2166_v4 }
 0x87b   :  { %v2141_v60 = vpop.xlane.xlu2 %2140  ;;  %v2136_v50 = vpop.xlane.xlu1 %2135 }
 0x87c   :  { %4824 = vrsqrt.f32 %v2167_v59  ;;  %v2153_v6 = vmul.f32 0.0026041667, %v2141_v60  ;;  %v2152_v39 = vmul.f32 0.0026041667, %v2136_v50  ;;  %vm2204_vm0 = vweird.f32 %v2167_v59 }
 0x87d   :  { %v2096_v5 = vpop.xlane.xlu0 %2095 }
 0x87e   :  { %v2161_v52 = vsub.f32 %v2153_v6, %v2157_v2  ;;  %v6193_v34 = vmul.f32 0.0026041667, %v2096_v5  ;;  %v1835_v6 = vld [vmem:[%s7004_s0 + $0x18] sm:$0xff] }
 0x880   :  { %v4823_v1 = vpop.eup %4822  ;;  %v2165_v57 = vadd.f32 1e-05, %v2161_v52  ;;  %v2156_v49 = vmul.f32 %v6193_v34, %v6193_v34 }
 0x881   :  { %v2189_v13 = vmul.f32 %v4823_v1, %v2166_v4  ;;  %vm2195_vm11 = vweird.f32 %v4823_v1 }
 0x882   :  { %v4825_v7 = vpop.eup %4824  ;;  %4826 = vrsqrt.f32 %v2165_v57  ;;  %v2160_v3 = vsub.f32 %v2152_v39, %v2156_v49  ;;  %vm2196_vm15 = vmor %vm2194_vm12, %vm2195_vm11  ;;  %vm2184_vm3 = vweird.f32 %v2165_v57 }
 0x883   :  { %v2190_v43 = vmul.f32 %v4823_v1, %v2189_v13  ;;  %v2199_v42 = vmul.f32 %v4825_v7, %v2167_v59  ;;  %vm2205_vm13 = vweird.f32 %v4825_v7 }
 0x884   :  { %v2164_v56 = vadd.f32 1e-05, %v2160_v3  ;;  %vm2206_vm1 = vmor %vm2204_vm0, %vm2205_vm13 }
 0x885   :  { %v2191_v28 = vmul.f32 0.5, %v2190_v43  ;;  %v2200_v20 = vmul.f32 %v4825_v7, %v2199_v42  ;;  %v1839_v43 = vld [vmem:[%s7005_s22 + $0x18] sm:$0xff] }
 0x886   :  { %4828 = vrsqrt.f32 %v2164_v56  ;;  %vm2174_vm6 = vweird.f32 %v2164_v56 }
 0x887   :  { %v2192_v27 = vsub.f32 1.5, %v2191_v28  ;;  %v2201_v62 = vmul.f32 0.5, %v2200_v20  ;;  %v1838_v28 = vld [vmem:[%s7005_s22 + $0x10] sm:$0xff]  ;;  %v1833_v20 = vld [vmem:[%s7004_s0 + $0x8] sm:$0xff] }
 0x888   :  { %v4827_v10 = vpop.eup %4826 }
 0x889   :  { %v2202_v45 = vsub.f32 1.5, %v2201_v62  ;;  %v2179_v19 = vmul.f32 %v4827_v10, %v2165_v57  ;;  %v2193_v30 = vmul.f32 %v4823_v1, %v2192_v27  ;;  %vm2185_vm2 = vweird.f32 %v4827_v10  ;;  %v1837_v57 = vld [vmem:[%s7005_s22 + $0x8] sm:$0xff] }
 0x88a   :  { %vm2186_vm4 = vmor %vm2184_vm3, %vm2185_vm2 }
 0x88b   :  { %v2203_v40 = vmul.f32 %v4825_v7, %v2202_v45  ;;  %v2180_v60 = vmul.f32 %v4827_v10, %v2179_v19  ;;  %v2197_v2 = vsel %vm2196_vm15, %v4823_v1, %v2193_v30  ;;  %v1832_v30 = vld [vmem:[%s7004_s0] sm:$0xff] }
 0x88c   :  { %v4829_v50 = vpop.eup %4828  ;;  %v2210_v5 = vmul.f32 %v2197_v2, %v1834_v36  ;;  %v1836_v2 = vld [vmem:[%s7005_s22] sm:$0xff] }
 0x88d   :  { %v2181_v52 = vmul.f32 0.5, %v2180_v60  ;;  %v2169_v39 = vmul.f32 %v4829_v50, %v2164_v56  ;;  %v2207_v4 = vsel %vm2206_vm1, %v4825_v7, %v2203_v40  ;;  %vm2175_vm5 = vweird.f32 %v4829_v50  ;;  %v1845_v56 = vld [vmem:[%s7006_s20 + $0x8] sm:$0xff] }
 0x88e   :  { %2232 = vperm.xlu2 %4804, %v2210_v5   ;;  %v2211_v49 = vmul.f32 %v2207_v4, %v1835_v6  ;;  %v2214_v59 = vmul.f32 %v2210_v5, %v6185_v32  ;;  %vm2176_vm7 = vmor %vm2174_vm6, %vm2175_vm5 }
 0x88f   :  { %v2182_v13 = vsub.f32 1.5, %v2181_v52  ;;  %v2170_v3 = vmul.f32 %v4829_v50, %v2169_v39  ;;  %v1846_v52 = vld [vmem:[%s7006_s20 + $0x10] sm:$0xff]  ;;  %v1844_v39 = vld [vmem:[%s7006_s20] sm:$0xff] }
 0x890   :  { %v2215_v42 = vmul.f32 %v2211_v49, %v2115_v16  ;;  %v2218_v19 = vsub.f32 %v1838_v28, %v2214_v59 }
 0x891   :  { %v2171_v1 = vmul.f32 0.5, %v2170_v3  ;;  %v2183_v27 = vmul.f32 %v4827_v10, %v2182_v13 }
 0x892   :  { %v2219_v62 = vsub.f32 %v1839_v43, %v2215_v42 }
 0x893   :  { %v2172_v45 = vsub.f32 1.5, %v2171_v1  ;;  %v2187_v7 = vsel %vm2186_vm4, %v4827_v10, %v2183_v27 }
 0x894   :  { %2273 = vperm.xlu1 %4805, %v2219_v62   ;;  %v2209_v36 = vmul.f32 %v2187_v7, %v1833_v20 }
 0x895   :  { %v2173_v40 = vmul.f32 %v4829_v50, %v2172_v45 }
 0x896   :  { %2268 = vperm.xlu2 %4804, %v2218_v19   ;;  %2227 = vperm.xlu0 %4803, %v2209_v36   ;;  %v2213_v32 = vmul.f32 %v2209_v36, %v6189_v9  ;;  %v1847_v9 = vld [vmem:[%s7006_s20 + $0x18] sm:$0xff] }
 0x897   :  { %v2177_v16 = vsel %vm2176_vm7, %v4829_v50, %v2173_v40 }
 0x898   :  { %v2208_v60 = vmul.f32 %v2177_v16, %v1832_v30  ;;  %v2217_v6 = vsub.f32 %v1837_v57, %v2213_v32 }
 0x89a   :  { %v2212_v10 = vmul.f32 %v2208_v60, %v6193_v34 }
 0x89c   :  { %2263 = vperm.xlu1 %4805, %v2217_v6   ;;  %v2216_v5 = vsub.f32 %v1836_v2, %v2212_v10 }
 0x89e   :  { %2258 = vperm.xlu2 %4804, %v2216_v5   ;;  %2237 = vperm.xlu0 %4803, %v2211_v49  }
 0x8a4   :  { %2315 = vperm.xlu1 %4805, %v1845_v56  }
 0x8a6   :  { %2320 = vperm.xlu2 %4804, %v1846_v52   ;;  %2222 = vperm.xlu0 %4803, %v2208_v60  }
 0x8ae   :  { %2310 = vperm.xlu0 %4803, %v1844_v39  }
 0x8b6   :  { %2325 = vperm.xlu0 %4803, %v1847_v9  }
 0x8e8   :  { %v2233_v50 = vpop.permute.xlu2 %2232 }
 0x8e9   :  { %v2248_v34 = vmul.f32 %v2233_v50, %v6119_v53  ;;  %v2249_v43 = vmul.f32 %v2233_v50, %v6121_v12  ;;  %v2250_v42 = vmul.f32 %v2233_v50, %v6139_v51  ;;  %v2251_v49 = vmul.f32 %v2233_v50, %v6141_v0 }
 0x8f0   :  { %v2269_v3 = vpop.permute.xlu2 %2268 }
 0x8f1   :  { %v2284_v1 = vadd.f32 %v2269_v3, %v2248_v34  ;;  %v2285_v53 = vadd.f32 %v2269_v3, %v2249_v43  ;;  %v2286_v19 = vadd.f32 %v2269_v3, %v2250_v42  ;;  %v2287_v12 = vadd.f32 %v2269_v3, %v2251_v49 }
 0x8f3   :  { %v2300_v2 = vmax.f32 %v2284_v1, 0.0  ;;  %v2301_v5 = vmax.f32 %v2285_v53, 0.0  ;;  %v2303_v56 = vmax.f32 %v2287_v12, 0.0  ;;  %v2487_v1 = vld [vmem:[%s7007_s2 + $0x78] sm:$0xff]  ;;  %v1842_v53 = vld [vmem:[#allocation8 + $0x10] sm:$0xff]  ;;  %v2480_v12 = vld [vmem:[%s7007_s2 + $0x40] sm:$0xff] }
 0x8f8   :  { %v2259_v50 = vpop.permute.xlu2 %2258 }
 0x906   :  { %v2274_v4 = vpop.permute.xlu1 %2273 }
 0x908   :  { %v2228_v13 = vpop.permute.xlu0 %2227 }
 0x909   :  { %v2244_v7 = vmul.f32 %v2228_v13, %v6109_v31  ;;  %v2245_v40 = vmul.f32 %v2228_v13, %v6111_v47  ;;  %v2246_v32 = vmul.f32 %v2228_v13, %v6123_v26  ;;  %v2302_v47 = vmax.f32 %v2286_v19, 0.0  ;;  %v2481_v19 = vld [vmem:[%s7007_s2 + $0x48] sm:$0xff] }
 0x90e   :  { %v2264_v28 = vpop.permute.xlu1 %2263 }
 0x90f   :  { %v2281_v60 = vadd.f32 %v2264_v28, %v2245_v40  ;;  %v2282_v31 = vadd.f32 %v2264_v28, %v2246_v32  ;;  %v2476_v40 = vld [vmem:[%s7007_s2 + $0x20] sm:$0xff]  ;;  %v2475_v32 = vld [vmem:[%s7007_s2 + $0x18] sm:$0xff] }
 0x910   :  { %v2238_v59 = vpop.permute.xlu0 %2237 }
 0x911   :  { %v2252_v20 = vmul.f32 %v2238_v59, %v6135_v63  ;;  %v2253_v27 = vmul.f32 %v2238_v59, %v6137_v15  ;;  %v2254_v62 = vmul.f32 %v2238_v59, %v6163_v8  ;;  %v2255_v45 = vmul.f32 %v2238_v59, %v6165_v46  ;;  %v1840_v59 = vld [vmem:[#allocation8] sm:$0xff] }
 0x912   :  { %v2247_v63 = vmul.f32 %v2228_v13, %v6125_v54  ;;  %v2280_v15 = vadd.f32 %v2264_v28, %v2244_v7  ;;  %v2298_v13 = vmax.f32 %v2282_v31, 0.0  ;;  %v2482_v7 = vld [vmem:[%s7007_s2 + $0x50] sm:$0xff] }
 0x913   :  { %v2288_v36 = vadd.f32 %v2274_v4, %v2252_v20  ;;  %v2289_v51 = vadd.f32 %v2274_v4, %v2253_v27  ;;  %v2290_v30 = vadd.f32 %v2274_v4, %v2254_v62  ;;  %v2291_v0 = vadd.f32 %v2274_v4, %v2255_v45  ;;  %v2485_v20 = vld [vmem:[%s7007_s2 + $0x68] sm:$0xff]  ;;  %v1841_v27 = vld [vmem:[#allocation8 + $0x8] sm:$0xff]  ;;  %v2483_v45 = vld [vmem:[%s7007_s2 + $0x58] sm:$0xff] }
 0x914   :  { %v2283_v10 = vadd.f32 %v2264_v28, %v2247_v63  ;;  %v2296_v26 = vmax.f32 %v2280_v15, 0.0  ;;  %v2297_v4 = vmax.f32 %v2281_v60, 0.0  ;;  %v2486_v28 = vld [vmem:[%s7007_s2 + $0x70] sm:$0xff]  ;;  %v2484_v62 = vld [vmem:[%s7007_s2 + $0x60] sm:$0xff]  ;;  %v2473_v15 = vld [vmem:[%s7007_s2 + $0x8] sm:$0xff] }
 0x915   :  { %v2304_v16 = vmax.f32 %v2288_v36, 0.0  ;;  %v2305_v8 = vmax.f32 %v2289_v51, 0.0  ;;  %v2306_v57 = vmax.f32 %v2290_v30, 0.0  ;;  %v2307_v46 = vmax.f32 %v2291_v0, 0.0  ;;  %v2479_v36 = vld [vmem:[%s7007_s2 + $0x38] sm:$0xff]  ;;  %v1843_v51 = vld [vmem:[#allocation8 + $0x18] sm:$0xff] }
 0x916   :  { %v2299_v3 = vmax.f32 %v2283_v10, 0.0  ;;  %v2478_v30 = vld [vmem:[%s7007_s2 + $0x30] sm:$0xff]  ;;  %v2477_v0 = vld [vmem:[%s7007_s2 + $0x28] sm:$0xff] }
 0x917   :  { %2352 = vmatpush.msrb.mxu0 %v2304_v16  ;;  %2381 = vmatpush.msrb.mxu1 %v2305_v8  ;;  %v2474_v63 = vld [vmem:[%s7007_s2 + $0x10] sm:$0xff]  ;;  %v2472_v16 = vld [vmem:[%s7007_s2] sm:$0xff] }
 0x918   :  { %2410 = vmatpush.msrb.mxu2 %v2306_v57  ;;  %2439 = vmatpush.msrb.mxu3 %v2307_v46  ;;  %v2223_v6 = vpop.permute.xlu0 %2222 }
 0x919   :  { %v2240_v54 = vmul.f32 %v2223_v6, %v6105_v35  ;;  %v2241_v52 = vmul.f32 %v2223_v6, %v6107_v37  ;;  %v2242_v39 = vmul.f32 %v2223_v6, %v6113_v29  ;;  %v2243_v9 = vmul.f32 %v2223_v6, %v6115_v55  ;;  %2353 = vmatpush.msrb.mxu0 %v2300_v2  ;;  %v2316_v6 = vpop.permute.xlu1 %2315 }
 0x91a   :  { %2382 = vmatpush.msrb.mxu1 %v2301_v5  ;;  %2411 = vmatpush.msrb.mxu2 %v2302_v47 }
 0x91b   :  { %2440 = vmatpush.msrb.mxu3 %v2303_v56  ;;  %2354 = vmatpush.msrb.mxu0 %v2296_v26  ;;  %v2276_v34 = vadd.f32 %v2259_v50, %v2240_v54  ;;  %v2277_v43 = vadd.f32 %v2259_v50, %v2241_v52  ;;  %v2278_v42 = vadd.f32 %v2259_v50, %v2242_v39 }
 0x91c   :  { %2383 = vmatpush.msrb.mxu1 %v2297_v4  ;;  %2412 = vmatpush.msrb.mxu2 %v2298_v13  ;;  %v2279_v35 = vadd.f32 %v2259_v50, %v2243_v9  ;;  %v2321_v13 = vpop.permute.xlu2 %2320 }
 0x91d   :  { %2441 = vmatpush.msrb.mxu3 %v2299_v3  ;;  %v2292_v37 = vmax.f32 %v2276_v34, 0.0  ;;  %v2293_v29 = vmax.f32 %v2277_v43, 0.0  ;;  %v2294_v55 = vmax.f32 %v2278_v42, 0.0 }
 0x91e   :  { %v2295_v49 = vmax.f32 %v2279_v35, 0.0 }
 0x91f   :  { %2355 = vmatpush.msrb.mxu0 %v2292_v37  ;;  %2384 = vmatpush.msrb.mxu1 %v2293_v29 }
 0x920   :  { %2413 = vmatpush.msrb.mxu2 %v2294_v55  ;;  %2442 = vmatpush.msrb.mxu3 %v2295_v49  ;;  %v2311_v8 = vpop.permute.xlu0 %2310 }
 0x921   :  { %4635 = vmatmul.msk.f32.vlgmr.msrb.gmra.mxu0 %vm1007_vm14, %v1840_v59  ;;  %4639 = vmatmul.msk.f32.vlgmr.msrb.gmra.mxu1 %vm1007_vm14, %v1840_v59 }
 0x922   :  { %4643 = vmatmul.msk.f32.vlgmr.msrb.gmra.mxu2 %vm1007_vm14, %v1840_v59  ;;  %4647 = vmatmul.msk.f32.vlgmr.msrb.gmra.mxu3 %vm1007_vm14, %v1840_v59 }
 0x923   :  { %2508 = vmatpush.msra.mxu0 %v2487_v1  ;;  %2537 = vmatpush.msra.mxu1 %v2487_v1 }
 0x924   :  { %2566 = vmatpush.msra.mxu2 %v2487_v1  ;;  %2595 = vmatpush.msra.mxu3 %v2487_v1 }
 0x925   :  { %2509 = vmatpush.msra.mxu0 %v2486_v28  ;;  %2538 = vmatpush.msra.mxu1 %v2486_v28 }
 0x926   :  { %2567 = vmatpush.msra.mxu2 %v2486_v28  ;;  %2596 = vmatpush.msra.mxu3 %v2486_v28 }
 0x927   :  { %2510 = vmatpush.msra.mxu0 %v2485_v20  ;;  %2539 = vmatpush.msra.mxu1 %v2485_v20 }
 0x928   :  { %2568 = vmatpush.msra.mxu2 %v2485_v20  ;;  %2597 = vmatpush.msra.mxu3 %v2485_v20  ;;  %v2326_v49 = vpop.permute.xlu0 %2325 }
 0x929   :  { %4636 = vmatmul.msk.f32.gmra.mxu0 %vm1007_vm14, %v1841_v27  ;;  %4640 = vmatmul.msk.f32.gmra.mxu1 %vm1007_vm14, %v1841_v27 }
 0x92a   :  { %4644 = vmatmul.msk.f32.gmra.mxu2 %vm1007_vm14, %v1841_v27  ;;  %4648 = vmatmul.msk.f32.gmra.mxu3 %vm1007_vm14, %v1841_v27 }
 0x92b   :  { %2511 = vmatpush.msra.mxu0 %v2484_v62  ;;  %2540 = vmatpush.msra.mxu1 %v2484_v62 }
 0x92c   :  { %2569 = vmatpush.msra.mxu2 %v2484_v62  ;;  %2598 = vmatpush.msra.mxu3 %v2484_v62 }
 0x92d   :  { %2512 = vmatpush.msra.mxu0 %v2483_v45  ;;  %2541 = vmatpush.msra.mxu1 %v2483_v45 }
 0x92e   :  { %2570 = vmatpush.msra.mxu2 %v2483_v45  ;;  %2599 = vmatpush.msra.mxu3 %v2483_v45 }
 0x92f   :  { %2513 = vmatpush.msra.mxu0 %v2482_v7  ;;  %2542 = vmatpush.msra.mxu1 %v2482_v7 }
 0x930   :  { %2571 = vmatpush.msra.mxu2 %v2482_v7  ;;  %2600 = vmatpush.msra.mxu3 %v2482_v7 }
 0x931   :  { %4637 = vmatmul.msk.f32.gmra.mxu0 %vm1007_vm14, %v1842_v53  ;;  %4641 = vmatmul.msk.f32.gmra.mxu1 %vm1007_vm14, %v1842_v53 }
 0x932   :  { %4645 = vmatmul.msk.f32.gmra.mxu2 %vm1007_vm14, %v1842_v53  ;;  %4649 = vmatmul.msk.f32.gmra.mxu3 %vm1007_vm14, %v1842_v53 }
 0x933   :  { %2514 = vmatpush.msra.mxu0 %v2481_v19  ;;  %2543 = vmatpush.msra.mxu1 %v2481_v19 }
 0x934   :  { %2572 = vmatpush.msra.mxu2 %v2481_v19  ;;  %2601 = vmatpush.msra.mxu3 %v2481_v19 }
 0x935   :  { %2515 = vmatpush.msra.mxu0 %v2480_v12  ;;  %2544 = vmatpush.msra.mxu1 %v2480_v12 }
 0x936   :  { %2573 = vmatpush.msra.mxu2 %v2480_v12  ;;  %2602 = vmatpush.msra.mxu3 %v2480_v12 }
 0x937   :  { %2516 = vmatpush.msra.mxu0 %v2479_v36  ;;  %2545 = vmatpush.msra.mxu1 %v2479_v36 }
 0x938   :  { %2574 = vmatpush.msra.mxu2 %v2479_v36  ;;  %2603 = vmatpush.msra.mxu3 %v2479_v36 }
 0x939   :  { %4638 = vmatmul.msk.f32.gmra.mxu0 %vm1007_vm14, %v1843_v51  ;;  %4642 = vmatmul.msk.f32.gmra.mxu1 %vm1007_vm14, %v1843_v51 }
 0x93a   :  { %4646 = vmatmul.msk.f32.gmra.mxu2 %vm1007_vm14, %v1843_v51  ;;  %4650 = vmatmul.msk.f32.gmra.mxu3 %vm1007_vm14, %v1843_v51 }
 0x93b   :  { %2517 = vmatpush.msra.mxu0 %v2478_v30  ;;  %2546 = vmatpush.msra.mxu1 %v2478_v30 }
 0x93c   :  { %2575 = vmatpush.msra.mxu2 %v2478_v30  ;;  %2604 = vmatpush.msra.mxu3 %v2478_v30 }
 0x93d   :  { %2518 = vmatpush.msra.mxu0 %v2477_v0  ;;  %2547 = vmatpush.msra.mxu1 %v2477_v0 }
 0x93e   :  { %2576 = vmatpush.msra.mxu2 %v2477_v0  ;;  %2605 = vmatpush.msra.mxu3 %v2477_v0 }
 0x93f   :  { %2519 = vmatpush.msra.mxu0 %v2476_v40  ;;  %2548 = vmatpush.msra.mxu1 %v2476_v40 }
 0x940   :  { %2577 = vmatpush.msra.mxu2 %v2476_v40  ;;  %2606 = vmatpush.msra.mxu3 %v2476_v40 }
 0x941   :  { %2520 = vmatpush.msra.mxu0 %v2475_v32  ;;  %2549 = vmatpush.msra.mxu1 %v2475_v32 }
 0x942   :  { %2578 = vmatpush.msra.mxu2 %v2475_v32  ;;  %2607 = vmatpush.msra.mxu3 %v2475_v32 }
 0x943   :  { %2521 = vmatpush.msra.mxu0 %v2474_v63  ;;  %2550 = vmatpush.msra.mxu1 %v2474_v63 }
 0x944   :  { %2579 = vmatpush.msra.mxu2 %v2474_v63  ;;  %2608 = vmatpush.msra.mxu3 %v2474_v63 }
 0x945   :  { %2522 = vmatpush.msra.mxu0 %v2473_v15  ;;  %2551 = vmatpush.msra.mxu1 %v2473_v15 }
 0x946   :  { %2580 = vmatpush.msra.mxu2 %v2473_v15  ;;  %2609 = vmatpush.msra.mxu3 %v2473_v15 }
 0x947   :  { %2523 = vmatpush.msra.mxu0 %v2472_v16  ;;  %2552 = vmatpush.msra.mxu1 %v2472_v16 }
 0x948   :  { %2581 = vmatpush.msra.mxu2 %v2472_v16  ;;  %2610 = vmatpush.msra.mxu3 %v2472_v16 }
 0x99e   :  { %v2357_v57 = vpop.f32.mrf.mxu0  ;;  %v2386_v46 = vpop.f32.mrf.mxu1 }
 0x99f   :  { %v2358_v60 = vadd.f32 %v2357_v57, %v2311_v8  ;;  %v2387_v31 = vadd.f32 %v2386_v46, %v2311_v8  ;;  %v2488_v46 = vld [vmem:[#allocation10] sm:$0xff] }
 0x9a1   :  { %v6261_v2 = vadd.f32 %v2358_v60, %v6026_v33  ;;  %v6264_v10 = vadd.f32 %v2387_v31, %v6029_v38 }
 0x9a3   :  { %2524 = vmatmul.f32.vlgmr.msra.gmra.mxu0 %v6261_v2  ;;  %2553 = vmatmul.f32.vlgmr.msra.gmra.mxu1 %v6264_v10 }
 0x9a5   :  { %v2415_v5 = vpop.f32.mrf.mxu2  ;;  %v2444_v47 = vpop.f32.mrf.mxu3 }
 0x9a6   :  { %v2416_v56 = vadd.f32 %v2415_v5, %v2311_v8  ;;  %v2445_v26 = vadd.f32 %v2444_v47, %v2311_v8  ;;  %v2360_v54 = vpop.f32.mrf.mxu0  ;;  %v2389_v52 = vpop.f32.mrf.mxu1  ;;  %v2490_v5 = vld [vmem:[#allocation10 + $0x10] sm:$0xff]  ;;  %v2491_v47 = vld [vmem:[#allocation10 + $0x18] sm:$0xff] }
 0x9a7   :  { %v2361_v39 = vadd.f32 %v2360_v54, %v2316_v6  ;;  %v2390_v9 = vadd.f32 %v2389_v52, %v2316_v6 }
 0x9a8   :  { %v6269_v50 = vadd.f32 %v2416_v56, %v6034_v41  ;;  %v6272_v33 = vadd.f32 %v2445_v26, %v6037_v61 }
 0x9a9   :  { %v6275_v38 = vadd.f32 %v2361_v39, %v6040_v22  ;;  %v6278_v4 = vadd.f32 %v2390_v9, %v6043_v11 }
 0x9aa   :  { %2582 = vmatmul.f32.vlgmr.msra.gmra.mxu2 %v6269_v50  ;;  %2611 = vmatmul.f32.vlgmr.msra.gmra.mxu3 %v6272_v33 }
 0x9ab   :  { %2527 = vmatmul.f32.gmra.mxu0 %v6275_v38  ;;  %2556 = vmatmul.f32.gmra.mxu1 %v6278_v4 }
 0x9ad   :  { %v2418_v41 = vpop.f32.mrf.mxu2  ;;  %v2447_v3 = vpop.f32.mrf.mxu3 }
 0x9ae   :  { %v2419_v34 = vadd.f32 %v2418_v41, %v2316_v6  ;;  %v2448_v61 = vadd.f32 %v2447_v3, %v2316_v6  ;;  %v2363_v43 = vpop.f32.mrf.mxu0  ;;  %v2392_v42 = vpop.f32.mrf.mxu1  ;;  %v2489_v6 = vld [vmem:[#allocation10 + $0x8] sm:$0xff] }
 0x9af   :  { %v2364_v22 = vadd.f32 %v2363_v43, %v2321_v13  ;;  %v2393_v35 = vadd.f32 %v2392_v42, %v2321_v13 }
 0x9b0   :  { %v6285_v11 = vadd.f32 %v2419_v34, %v6050_v14  ;;  %v6288_v37 = vadd.f32 %v2448_v61, %v6053_v17 }
 0x9b1   :  { %v6291_v29 = vadd.f32 %v2364_v22, %v6056_v23  ;;  %v6294_v55 = vadd.f32 %v2393_v35, %v6059_v25 }
 0x9b2   :  { %2585 = vmatmul.f32.gmra.mxu2 %v6285_v11  ;;  %2614 = vmatmul.f32.gmra.mxu3 %v6288_v37 }
 0x9b3   :  { %2530 = vmatmul.f32.gmra.mxu0 %v6291_v29  ;;  %2559 = vmatmul.f32.gmra.mxu1 %v6294_v55 }
 0x9b5   :  { %v2421_v14 = vpop.f32.mrf.mxu2  ;;  %v2450_v59 = vpop.f32.mrf.mxu3 }
 0x9b6   :  { %v2422_v1 = vadd.f32 %v2421_v14, %v2321_v13  ;;  %v2451_v17 = vadd.f32 %v2450_v59, %v2321_v13  ;;  %v2366_v28 = vpop.f32.mrf.mxu0  ;;  %v2395_v20 = vpop.f32.mrf.mxu1 }
 0x9b7   :  { %v2367_v23 = vadd.f32 %v2366_v28, %v2326_v49  ;;  %v2396_v27 = vadd.f32 %v2395_v20, %v2326_v49 }
 0x9b8   :  { %v6301_v25 = vadd.f32 %v2422_v1, %v6066_v48  ;;  %v6304_v62 = vadd.f32 %v2451_v17, %v6069_v21 }
 0x9b9   :  { %v6307_v45 = vadd.f32 %v2367_v23, %v6072_v24  ;;  %v6310_v7 = vadd.f32 %v2396_v27, %v6075_v58 }
 0x9ba   :  { %2588 = vmatmul.f32.gmra.mxu2 %v6301_v25  ;;  %2617 = vmatmul.f32.gmra.mxu3 %v6304_v62 }
 0x9bb   :  { %2533 = vmatmul.f32.gmra.mxu0 %v6307_v45  ;;  %2562 = vmatmul.f32.gmra.mxu1 %v6310_v7 }
 0x9bd   :  { %v2424_v53 = vpop.f32.mrf.mxu2  ;;  %v2453_v48 = vpop.f32.mrf.mxu3 }
 0x9be   :  { %v2425_v19 = vadd.f32 %v2424_v53, %v2326_v49  ;;  %v2454_v12 = vadd.f32 %v2453_v48, %v2326_v49 }
 0x9c0   :  { %v6317_v21 = vadd.f32 %v2425_v19, %v6082_v18  ;;  %v6320_v24 = vadd.f32 %v2454_v12, %v6085_v44 }
 0x9c2   :  { %2591 = vmatmul.f32.gmra.mxu2 %v6317_v21  ;;  %2620 = vmatmul.f32.gmra.mxu3 %v6320_v24 }
 0xa20   :  { %v2525_v58 = vpop.f32.mrf.mxu0  ;;  %v2554_v36 = vpop.f32.mrf.mxu1 }
 0xa28   :  { %v2528_v51 = vpop.f32.mrf.mxu0  ;;  %v2557_v30 = vpop.f32.mrf.mxu1 }
 0xa2d   :  { %v2583_v0 = vpop.f32.mrf.mxu2  ;;  %v2612_v40 = vpop.f32.mrf.mxu3 }
 0xa30   :  { %v2531_v32 = vpop.f32.mrf.mxu0  ;;  %v2560_v63 = vpop.f32.mrf.mxu1 }
 0xa35   :  { %v2586_v15 = vpop.f32.mrf.mxu2  ;;  %v2615_v16 = vpop.f32.mrf.mxu3 }
 0xa38   :  { %v2534_v8 = vpop.f32.mrf.mxu0  ;;  %v2563_v18 = vpop.f32.mrf.mxu1 }
 0xa39   :  { %2648 = vmatpush.msrb.mxu0 %v2534_v8  ;;  %2677 = vmatpush.msrb.mxu1 %v2563_v18 }
 0xa3b   :  { %2649 = vmatpush.msrb.mxu0 %v2531_v32  ;;  %2678 = vmatpush.msrb.mxu1 %v2560_v63 }
 0xa3d   :  { %v2589_v44 = vpop.f32.mrf.mxu2  ;;  %v2618_v57 = vpop.f32.mrf.mxu3  ;;  %2650 = vmatpush.msrb.mxu0 %v2528_v51  ;;  %2679 = vmatpush.msrb.mxu1 %v2557_v30 }
 0xa3f   :  { %2651 = vmatpush.msrb.mxu0 %v2525_v58  ;;  %2680 = vmatpush.msrb.mxu1 %v2554_v36 }
 0xa40   :  { %4651 = vmatmul.msk.f32.vlgmr.msrb.gmra.mxu0 %vm1007_vm14, %v2488_v46  ;;  %4655 = vmatmul.msk.f32.vlgmr.msrb.gmra.mxu1 %vm1007_vm14, %v2488_v46 }
 0xa45   :  { %v2592_v60 = vpop.f32.mrf.mxu2  ;;  %v2621_v31 = vpop.f32.mrf.mxu3 }
 0xa46   :  { %2706 = vmatpush.msrb.mxu2 %v2592_v60  ;;  %2735 = vmatpush.msrb.mxu3 %v2621_v31 }
 0xa48   :  { %2707 = vmatpush.msrb.mxu2 %v2589_v44  ;;  %2736 = vmatpush.msrb.mxu3 %v2618_v57 }
 0xa49   :  { %4652 = vmatmul.msk.f32.gmra.mxu0 %vm1007_vm14, %v2489_v6  ;;  %4656 = vmatmul.msk.f32.gmra.mxu1 %vm1007_vm14, %v2489_v6 }
 0xa4a   :  { %2708 = vmatpush.msrb.mxu2 %v2586_v15  ;;  %2737 = vmatpush.msrb.mxu3 %v2615_v16 }
 0xa4c   :  { %2709 = vmatpush.msrb.mxu2 %v2583_v0  ;;  %2738 = vmatpush.msrb.mxu3 %v2612_v40 }
 0xa4d   :  { %4659 = vmatmul.msk.f32.vlgmr.msrb.gmra.mxu2 %vm1007_vm14, %v2488_v46  ;;  %4663 = vmatmul.msk.f32.vlgmr.msrb.gmra.mxu3 %vm1007_vm14, %v2488_v46 }
 0xa51   :  { %4653 = vmatmul.msk.f32.gmra.mxu0 %vm1007_vm14, %v2490_v5  ;;  %4657 = vmatmul.msk.f32.gmra.mxu1 %vm1007_vm14, %v2490_v5 }
 0xa55   :  { %4660 = vmatmul.msk.f32.gmra.mxu2 %vm1007_vm14, %v2489_v6  ;;  %4664 = vmatmul.msk.f32.gmra.mxu3 %vm1007_vm14, %v2489_v6 }
 0xa59   :  { %4654 = vmatmul.msk.f32.gmra.mxu0 %vm1007_vm14, %v2491_v47  ;;  %4658 = vmatmul.msk.f32.gmra.mxu1 %vm1007_vm14, %v2491_v47 }
 0xa5d   :  { %4661 = vmatmul.msk.f32.gmra.mxu2 %vm1007_vm14, %v2490_v5  ;;  %4665 = vmatmul.msk.f32.gmra.mxu3 %vm1007_vm14, %v2490_v5 }
 0xa65   :  { %4662 = vmatmul.msk.f32.gmra.mxu2 %vm1007_vm14, %v2491_v47  ;;  %4666 = vmatmul.msk.f32.gmra.mxu3 %vm1007_vm14, %v2491_v47 }
 0xabd   :  { %v6340_v56 = vpop.f32.mrf.mxu0  ;;  %v6342_v26 = vpop.f32.mrf.mxu1 }
 0xabe   :  { %v2776_v12 = vmul.f32 %v6340_v56, %v6340_v56  ;;  %v2777_v58 = vmul.f32 %v6342_v26, %v6342_v26  ;;  %v2752_v47 = vadd.f32 %v6342_v26, %v6340_v56 }
 0xac0   :  { %v2792_v44 = vadd.f32 %v2777_v58, %v2776_v12 }
 0xac6   :  { %v6344_v54 = vpop.f32.mrf.mxu0  ;;  %v6346_v52 = vpop.f32.mrf.mxu1 }
 0xac7   :  { %v2757_v13 = vadd.f32 %v6346_v52, %v6344_v54  ;;  %v2780_v36 = vmul.f32 %v6344_v54, %v6344_v54  ;;  %v2781_v51 = vmul.f32 %v6346_v52, %v6346_v52 }
 0xac9   :  { %v2797_v57 = vadd.f32 %v2781_v51, %v2780_v36 }
 0xace   :  { %v6354_v41 = vpop.f32.mrf.mxu0  ;;  %v6356_v3 = vpop.f32.mrf.mxu1 }
 0xacf   :  { %v2762_v22 = vadd.f32 %v6356_v3, %v6354_v41  ;;  %v2784_v35 = vmul.f32 %v6354_v41, %v6354_v41  ;;  %v2785_v49 = vmul.f32 %v6356_v3, %v6356_v3 }
 0xad0   :  { %v6348_v39 = vpop.f32.mrf.mxu2  ;;  %v6350_v9 = vpop.f32.mrf.mxu3 }
 0xad1   :  { %v2802_v20 = vadd.f32 %v2785_v49, %v2784_v35  ;;  %v2778_v18 = vmul.f32 %v6348_v39, %v6348_v39  ;;  %v2753_v35 = vadd.f32 %v2752_v47, %v6348_v39 }
 0xad6   :  { %v6370_v14 = vpop.f32.mrf.mxu0  ;;  %v6372_v59 = vpop.f32.mrf.mxu1 }
 0xad7   :  { %v2788_v27 = vmul.f32 %v6370_v14, %v6370_v14  ;;  %v2789_v53 = vmul.f32 %v6372_v59, %v6372_v59  ;;  %v2767_v19 = vadd.f32 %v6372_v59, %v6370_v14 }
 0xad8   :  { %v6358_v34 = vpop.f32.mrf.mxu2  ;;  %v6360_v61 = vpop.f32.mrf.mxu3 }
 0xad9   :  { %v2758_v43 = vadd.f32 %v2757_v13, %v6358_v34  ;;  %v2807_v40 = vadd.f32 %v2789_v53, %v2788_v27  ;;  %v2782_v6 = vmul.f32 %v6358_v34, %v6358_v34  ;;  %v2779_v13 = vmul.f32 %v6350_v9, %v6350_v9 }
 0xadb   :  { %v2759_v42 = vadd.f32 %v2758_v43, %v6360_v61  ;;  %v2793_v43 = vadd.f32 %v2792_v44, %v2778_v18 }
 0xadd   :  { %2760 = vadd.xlane.f32.xlu1 %v2759_v42  ;;  %v2783_v42 = vmul.f32 %v6360_v61, %v6360_v61  ;;  %v2794_v49 = vadd.f32 %v2793_v43, %v2779_v13 }
 0xae0   :  { %v6374_v1 = vpop.f32.mrf.mxu2  ;;  %v6376_v17 = vpop.f32.mrf.mxu3 }
 0xae1   :  { %v2763_v28 = vadd.f32 %v2762_v22, %v6374_v1  ;;  %v2786_v48 = vmul.f32 %v6374_v1, %v6374_v1  ;;  %v2787_v30 = vmul.f32 %v6376_v17, %v6376_v17  ;;  %v2798_v22 = vadd.f32 %v2797_v57, %v2782_v6 }
 0xae3   :  { %v2764_v23 = vadd.f32 %v2763_v28, %v6376_v17  ;;  %v2803_v0 = vadd.f32 %v2802_v20, %v2786_v48  ;;  %v2799_v28 = vadd.f32 %v2798_v22, %v2783_v42  ;;  %v2754_v20 = vadd.f32 %v2753_v35, %v6350_v9 }
 0xae5   :  { %2765 = vadd.xlane.f32.xlu2 %v2764_v23  ;;  %v2804_v46 = vadd.f32 %v2803_v0, %v2787_v30 }
 0xae8   :  { %v6398_v32 = vpop.f32.mrf.mxu2  ;;  %v6400_v63 = vpop.f32.mrf.mxu3 }
 0xae9   :  { %v2768_v15 = vadd.f32 %v2767_v19, %v6398_v32  ;;  %v2790_v16 = vmul.f32 %v6398_v32, %v6398_v32  ;;  %v2791_v8 = vmul.f32 %v6400_v63, %v6400_v63 }
 0xaeb   :  { %v2769_v60 = vadd.f32 %v2768_v15, %v6400_v63  ;;  %v2808_v31 = vadd.f32 %v2807_v40, %v2790_v16 }
 0xaed   :  { %2805 = vadd.xlane.f32.xlu2 %v2804_v46  ;;  %2770 = vadd.xlane.f32.xlu1 %v2769_v60  ;;  %v2809_v5 = vadd.f32 %v2808_v31, %v2791_v8 }
 0xaef   :  { %2810 = vadd.xlane.f32.xlu0 %v2809_v5 }
 0xaf5   :  { %2795 = vadd.xlane.f32.xlu2 %v2794_v49  ;;  %2800 = vadd.xlane.f32.xlu1 %v2799_v28 }
 0xaf7   :  { %2755 = vadd.xlane.f32.xlu0 %v2754_v20 }
 0xb50   :  { %v2761_v23 = vpop.xlane.xlu1 %2760 }
 0xb51   :  { %v6424_v15 = vmul.f32 0.0026041667, %v2761_v23 }
 0xb53   :  { %v2817_v57 = vmul.f32 %v6424_v15, %v6424_v15 }
 0xb58   :  { %v2766_v27 = vpop.xlane.xlu2 %2765 }
 0xb59   :  { %v6420_v53 = vmul.f32 0.0026041667, %v2766_v27 }
 0xb5b   :  { %v2818_v12 = vmul.f32 %v6420_v53, %v6420_v53 }
 0xb60   :  { %v2806_v48 = vpop.xlane.xlu2 %2805  ;;  %v2771_v19 = vpop.xlane.xlu1 %2770 }
 0xb61   :  { %v2814_v58 = vmul.f32 0.0026041667, %v2806_v48  ;;  %v2775_v36 = vmul.f32 0.0026041667, %v2771_v19 }
 0xb62   :  { %v2811_v51 = vpop.xlane.xlu0 %2810 }
 0xb63   :  { %v2822_v30 = vsub.f32 %v2814_v58, %v2818_v12  ;;  %v2819_v0 = vmul.f32 %v2775_v36, %v2775_v36  ;;  %v2815_v40 = vmul.f32 0.0026041667, %v2811_v51 }
 0xb65   :  { %v2826_v16 = vadd.f32 1e-05, %v2822_v30  ;;  %v2823_v8 = vsub.f32 %v2815_v40, %v2819_v0  ;;  %v2494_v0 = vld [vmem:[%s7008_s12 + $0x10] sm:$0xff] }
 0xb67   :  { %4830 = vrsqrt.f32 %v2826_v16  ;;  %v2827_v18 = vadd.f32 1e-05, %v2823_v8  ;;  %vm2854_vm9 = vweird.f32 %v2826_v16 }
 0xb68   :  { %v2801_v44 = vpop.xlane.xlu1 %2800  ;;  %v2796_v60 = vpop.xlane.xlu2 %2795 }
 0xb69   :  { %4832 = vrsqrt.f32 %v2827_v18  ;;  %v2813_v46 = vmul.f32 0.0026041667, %v2801_v44  ;;  %v2812_v13 = vmul.f32 0.0026041667, %v2796_v60  ;;  %vm2864_vm12 = vweird.f32 %v2827_v18 }
 0xb6a   :  { %v2756_v31 = vpop.xlane.xlu0 %2755 }
 0xb6b   :  { %v2821_v6 = vsub.f32 %v2813_v46, %v2817_v57  ;;  %v6428_v5 = vmul.f32 0.0026041667, %v2756_v31  ;;  %v2495_v46 = vld [vmem:[%s7008_s12 + $0x18] sm:$0xff] }
 0xb6d   :  { %v4831_v47 = vpop.eup %4830  ;;  %v2825_v43 = vadd.f32 1e-05, %v2821_v6  ;;  %v2816_v42 = vmul.f32 %v6428_v5, %v6428_v5 }
 0xb6e   :  { %v2849_v22 = vmul.f32 %v4831_v47, %v2826_v16  ;;  %vm2855_vm8 = vweird.f32 %v4831_v47 }
 0xb6f   :  { %v4833_v35 = vpop.eup %4832  ;;  %4834 = vrsqrt.f32 %v2825_v43  ;;  %v2820_v49 = vsub.f32 %v2812_v13, %v2816_v42  ;;  %vm2856_vm11 = vmor %vm2854_vm9, %vm2855_vm8  ;;  %vm2844_vm0 = vweird.f32 %v2825_v43 }
 0xb70   :  { %v2850_v28 = vmul.f32 %v4831_v47, %v2849_v22  ;;  %v2859_v20 = vmul.f32 %v4833_v35, %v2827_v18  ;;  %vm2865_vm10 = vweird.f32 %v4833_v35 }
 0xb71   :  { %v2824_v23 = vadd.f32 1e-05, %v2820_v49  ;;  %vm2866_vm13 = vmor %vm2864_vm12, %vm2865_vm10 }
 0xb72   :  { %v2851_v27 = vmul.f32 0.5, %v2850_v28  ;;  %v2860_v48 = vmul.f32 %v4833_v35, %v2859_v20  ;;  %v2499_v28 = vld [vmem:[%s7009_s28 + $0x18] sm:$0xff] }
 0xb73   :  { %4836 = vrsqrt.f32 %v2824_v23  ;;  %vm2834_vm3 = vweird.f32 %v2824_v23 }
 0xb74   :  { %v2852_v19 = vsub.f32 1.5, %v2851_v27  ;;  %v2861_v12 = vmul.f32 0.5, %v2860_v48  ;;  %v2493_v27 = vld [vmem:[%s7008_s12 + $0x8] sm:$0xff] }
 0xb75   :  { %v4835_v58 = vpop.eup %4834 }
 0xb76   :  { %v2862_v51 = vsub.f32 1.5, %v2861_v12  ;;  %v2839_v30 = vmul.f32 %v4835_v58, %v2825_v43  ;;  %v2853_v40 = vmul.f32 %v4831_v47, %v2852_v19  ;;  %vm2845_vm15 = vweird.f32 %v4835_v58 }
 0xb77   :  { %vm2846_vm1 = vmor %vm2844_vm0, %vm2845_vm15 }
 0xb78   :  { %v2863_v8 = vmul.f32 %v4833_v35, %v2862_v51  ;;  %v2840_v44 = vmul.f32 %v4835_v58, %v2839_v30  ;;  %v2857_v57 = vsel %vm2856_vm11, %v4831_v47, %v2853_v40  ;;  %v2492_v51 = vld [vmem:[%s7008_s12] sm:$0xff] }
 0xb79   :  { %v4837_v60 = vpop.eup %4836  ;;  %v2870_v31 = vmul.f32 %v2857_v57, %v2494_v0  ;;  %v2497_v0 = vld [vmem:[%s7009_s28 + $0x8] sm:$0xff] }
 0xb7a   :  { %v2841_v6 = vmul.f32 0.5, %v2840_v44  ;;  %v2829_v13 = vmul.f32 %v4837_v60, %v2824_v23  ;;  %v2867_v42 = vsel %vm2866_vm13, %v4833_v35, %v2863_v8  ;;  %vm2835_vm2 = vweird.f32 %v4837_v60  ;;  %v2498_v44 = vld [vmem:[%s7009_s28 + $0x10] sm:$0xff]  ;;  %v2505_v23 = vld [vmem:[%s7010_s19 + $0x8] sm:$0xff] }
 0xb7b   :  { %2892 = vperm.xlu1 %4805, %v2870_v31   ;;  %v2871_v16 = vmul.f32 %v2867_v42, %v2495_v46  ;;  %vm2836_vm4 = vmor %vm2834_vm3, %vm2835_vm2  ;;  %v2874_v8 = vmul.f32 %v2870_v31, %v6420_v53  ;;  %v2504_v46 = vld [vmem:[%s7010_s19] sm:$0xff]  ;;  %v2506_v53 = vld [vmem:[%s7010_s19 + $0x10] sm:$0xff] }
 0xb7c   :  { %v2842_v22 = vsub.f32 1.5, %v2841_v6  ;;  %v2830_v49 = vmul.f32 %v4837_v60, %v2829_v13  ;;  %v2496_v6 = vld [vmem:[%s7009_s28] sm:$0xff] }
 0xb7d   :  { %v2875_v20 = vmul.f32 %v2871_v16, %v2775_v36  ;;  %v2878_v57 = vsub.f32 %v2498_v44, %v2874_v8 }
 0xb7e   :  { %v2831_v18 = vmul.f32 0.5, %v2830_v49  ;;  %v2843_v47 = vmul.f32 %v4835_v58, %v2842_v22 }
 0xb7f   :  { %v2879_v48 = vsub.f32 %v2499_v28, %v2875_v20 }
 0xb80   :  { %v2832_v19 = vsub.f32 1.5, %v2831_v18  ;;  %v2847_v12 = vsel %vm2846_vm1, %v4835_v58, %v2843_v47 }
 0xb81   :  { %2933 = vperm.xlu2 %4804, %v2879_v48   ;;  %v2869_v35 = vmul.f32 %v2847_v12, %v2493_v27 }
 0xb82   :  { %v2833_v30 = vmul.f32 %v4837_v60, %v2832_v19 }
 0xb83   :  { %2887 = vperm.xlu0 %4803, %v2869_v35   ;;  %v2873_v36 = vmul.f32 %v2869_v35, %v6424_v15  ;;  %v2507_v15 = vld [vmem:[%s7010_s19 + $0x18] sm:$0xff] }
 0xb84   :  { %v2837_v43 = vsel %vm2836_vm4, %v4837_v60, %v2833_v30 }
 0xb85   :  { %v2868_v40 = vmul.f32 %v2837_v43, %v2492_v51  ;;  %v2877_v58 = vsub.f32 %v2497_v0, %v2873_v36 }
 0xb87   :  { %2882 = vperm.xlu1 %4805, %v2868_v40   ;;  %v2872_v60 = vmul.f32 %v2868_v40, %v6428_v5 }
 0xb89   :  { %2923 = vperm.xlu2 %4804, %v2877_v58   ;;  %v2876_v13 = vsub.f32 %v2496_v6, %v2872_v60 }
 0xb8b   :  { %2928 = vperm.xlu0 %4803, %v2878_v57  }
 0xb8f   :  { %2970 = vperm.xlu1 %4805, %v2504_v46  }
 0xb91   :  { %2975 = vperm.xlu2 %4804, %v2505_v23  }
 0xb93   :  { %2897 = vperm.xlu0 %4803, %v2871_v16  }
 0xb97   :  { %2985 = vperm.xlu1 %4805, %v2507_v15  }
 0xb9b   :  { %2918 = vperm.xlu0 %4803, %v2876_v13  }
 0xba3   :  { %2980 = vperm.xlu0 %4803, %v2506_v53  }
 0xbdb   :  { %v2934_v22 = vpop.permute.xlu2 %2933 }
 0xbed   :  { %v2893_v49 = vpop.permute.xlu1 %2892 }
 0xbee   :  { %v2908_v28 = vmul.f32 %v2893_v49, %v6354_v41  ;;  %v2909_v20 = vmul.f32 %v2893_v49, %v6356_v3  ;;  %v2910_v18 = vmul.f32 %v2893_v49, %v6374_v1  ;;  %v2911_v16 = vmul.f32 %v2893_v49, %v6376_v17  ;;  %v2924_v17 = vpop.permute.xlu2 %2923 }
 0xbf5   :  { %v2888_v31 = vpop.permute.xlu0 %2887 }
 0xbf6   :  { %v2904_v5 = vmul.f32 %v2888_v31, %v6344_v54  ;;  %v2905_v27 = vmul.f32 %v2888_v31, %v6346_v52  ;;  %v2906_v41 = vmul.f32 %v2888_v31, %v6358_v34  ;;  %v2907_v3 = vmul.f32 %v2888_v31, %v6360_v61 }
 0xbf8   :  { %v2940_v40 = vadd.f32 %v2924_v17, %v2904_v5  ;;  %v2942_v58 = vadd.f32 %v2924_v17, %v2906_v41  ;;  %v2943_v61 = vadd.f32 %v2924_v17, %v2907_v3  ;;  %v2500_v5 = vld [vmem:[#allocation11] sm:$0xff]  ;;  %v3142_v41 = vld [vmem:[%s7011_s11 + $0x50] sm:$0xff]  ;;  %v2502_v3 = vld [vmem:[#allocation11 + $0x10] sm:$0xff] }
 0xbf9   :  { %v2883_v30 = vpop.permute.xlu1 %2882 }
 0xbfa   :  { %v2900_v34 = vmul.f32 %v2883_v30, %v6340_v56  ;;  %v2901_v57 = vmul.f32 %v2883_v30, %v6342_v26  ;;  %v2902_v46 = vmul.f32 %v2883_v30, %v6348_v39  ;;  %v2903_v60 = vmul.f32 %v2883_v30, %v6350_v9  ;;  %v2503_v30 = vld [vmem:[#allocation11 + $0x18] sm:$0xff] }
 0xbfb   :  { %v2956_v31 = vmax.f32 %v2940_v40, 0.0  ;;  %v2958_v39 = vmax.f32 %v2942_v58, 0.0  ;;  %v2959_v49 = vmax.f32 %v2943_v61, 0.0  ;;  %v3132_v40 = vld [vmem:[%s7011_s11] sm:$0xff]  ;;  %v2976_v61 = vpop.permute.xlu2 %2975 }
 0xbfd   :  { %v2929_v42 = vpop.permute.xlu0 %2928 }
 0xbfe   :  { %v2944_v1 = vadd.f32 %v2929_v42, %v2908_v28  ;;  %v2945_v51 = vadd.f32 %v2929_v42, %v2909_v20  ;;  %v2946_v0 = vadd.f32 %v2929_v42, %v2910_v18 }
 0xc00   :  { %v2960_v23 = vmax.f32 %v2944_v1, 0.0  ;;  %v2961_v15 = vmax.f32 %v2945_v51, 0.0  ;;  %v2962_v13 = vmax.f32 %v2946_v0, 0.0  ;;  %v3141_v1 = vld [vmem:[%s7011_s11 + $0x48] sm:$0xff]  ;;  %v3140_v51 = vld [vmem:[%s7011_s11 + $0x40] sm:$0xff]  ;;  %v3134_v0 = vld [vmem:[%s7011_s11 + $0x10] sm:$0xff] }
 0xc05   :  { %v2898_v47 = vpop.permute.xlu0 %2897 }
 0xc06   :  { %v2912_v48 = vmul.f32 %v2898_v47, %v6370_v14  ;;  %v2913_v19 = vmul.f32 %v2898_v47, %v6372_v59  ;;  %v2914_v12 = vmul.f32 %v2898_v47, %v6398_v32  ;;  %v2915_v35 = vmul.f32 %v2898_v47, %v6400_v63  ;;  %v3146_v47 = vld [vmem:[%s7011_s11 + $0x70] sm:$0xff] }
 0xc07   :  { %v2947_v14 = vadd.f32 %v2929_v42, %v2911_v16  ;;  %v2941_v59 = vadd.f32 %v2924_v17, %v2905_v27  ;;  %v3147_v27 = vld [vmem:[%s7011_s11 + $0x78] sm:$0xff] }
 0xc08   :  { %v2948_v54 = vadd.f32 %v2934_v22, %v2912_v48  ;;  %v2949_v36 = vadd.f32 %v2934_v22, %v2913_v19  ;;  %v2950_v52 = vadd.f32 %v2934_v22, %v2914_v12  ;;  %v2951_v43 = vadd.f32 %v2934_v22, %v2915_v35  ;;  %v3145_v48 = vld [vmem:[%s7011_s11 + $0x68] sm:$0xff]  ;;  %v2501_v19 = vld [vmem:[#allocation11 + $0x8] sm:$0xff]  ;;  %v3143_v35 = vld [vmem:[%s7011_s11 + $0x58] sm:$0xff] }
 0xc09   :  { %v2963_v53 = vmax.f32 %v2947_v14, 0.0  ;;  %v2957_v56 = vmax.f32 %v2941_v59, 0.0  ;;  %v3144_v12 = vld [vmem:[%s7011_s11 + $0x60] sm:$0xff]  ;;  %v3139_v17 = vld [vmem:[%s7011_s11 + $0x38] sm:$0xff]  ;;  %v3133_v14 = vld [vmem:[%s7011_s11 + $0x8] sm:$0xff]  ;;  %v2971_v59 = vpop.permute.xlu1 %2970 }
 0xc0a   :  { %v2964_v8 = vmax.f32 %v2948_v54, 0.0  ;;  %v2965_v32 = vmax.f32 %v2949_v36, 0.0  ;;  %v2966_v44 = vmax.f32 %v2950_v52, 0.0  ;;  %v2967_v63 = vmax.f32 %v2951_v43, 0.0  ;;  %v3138_v54 = vld [vmem:[%s7011_s11 + $0x30] sm:$0xff]  ;;  %v3137_v36 = vld [vmem:[%s7011_s11 + $0x28] sm:$0xff] }
 0xc0b   :  { %v3136_v52 = vld [vmem:[%s7011_s11 + $0x20] sm:$0xff]  ;;  %v3135_v43 = vld [vmem:[%s7011_s11 + $0x18] sm:$0xff] }
 0xc0c   :  { %3012 = vmatpush.msra.mxu0 %v2964_v8  ;;  %3041 = vmatpush.msra.mxu1 %v2965_v32 }
 0xc0d   :  { %3070 = vmatpush.msra.mxu2 %v2966_v44  ;;  %3099 = vmatpush.msra.mxu3 %v2967_v63  ;;  %v2919_v6 = vpop.permute.xlu0 %2918 }
 0xc0e   :  { %3013 = vmatpush.msra.mxu0 %v2960_v23  ;;  %3042 = vmatpush.msra.mxu1 %v2961_v15  ;;  %v2936_v42 = vadd.f32 %v2919_v6, %v2900_v34  ;;  %v2937_v22 = vadd.f32 %v2919_v6, %v2901_v57  ;;  %v2938_v26 = vadd.f32 %v2919_v6, %v2902_v46 }
 0xc0f   :  { %3071 = vmatpush.msra.mxu2 %v2962_v13  ;;  %3100 = vmatpush.msra.mxu3 %v2963_v53  ;;  %v2939_v28 = vadd.f32 %v2919_v6, %v2903_v60 }
 0xc10   :  { %3014 = vmatpush.msra.mxu0 %v2956_v31  ;;  %3043 = vmatpush.msra.mxu1 %v2957_v56  ;;  %v2952_v9 = vmax.f32 %v2936_v42, 0.0  ;;  %v2953_v20 = vmax.f32 %v2937_v22, 0.0  ;;  %v2954_v18 = vmax.f32 %v2938_v26, 0.0 }
 0xc11   :  { %3072 = vmatpush.msra.mxu2 %v2958_v39  ;;  %3101 = vmatpush.msra.mxu3 %v2959_v49  ;;  %v2955_v16 = vmax.f32 %v2939_v28, 0.0 }
 0xc12   :  { %3015 = vmatpush.msra.mxu0 %v2952_v9  ;;  %3044 = vmatpush.msra.mxu1 %v2953_v20 }
 0xc13   :  { %3073 = vmatpush.msra.mxu2 %v2954_v18  ;;  %3102 = vmatpush.msra.mxu3 %v2955_v16  ;;  %v2986_v16 = vpop.permute.xlu1 %2985 }
 0xc14   :  { %4667 = vmatmul.msk.f32.vlgmr.msra.gmra.mxu0 %vm1007_vm14, %v2500_v5  ;;  %4671 = vmatmul.msk.f32.vlgmr.msra.gmra.mxu1 %vm1007_vm14, %v2500_v5 }
 0xc15   :  { %4675 = vmatmul.msk.f32.vlgmr.msra.gmra.mxu2 %vm1007_vm14, %v2500_v5  ;;  %4679 = vmatmul.msk.f32.vlgmr.msra.gmra.mxu3 %vm1007_vm14, %v2500_v5  ;;  %v2981_v42 = vpop.permute.xlu0 %2980 }
 0xc16   :  { %3168 = vmatpush.msrb.mxu0 %v3147_v27  ;;  %3197 = vmatpush.msrb.mxu1 %v3147_v27 }
 0xc17   :  { %3226 = vmatpush.msrb.mxu2 %v3147_v27  ;;  %3255 = vmatpush.msrb.mxu3 %v3147_v27 }
 0xc18   :  { %3169 = vmatpush.msrb.mxu0 %v3146_v47  ;;  %3198 = vmatpush.msrb.mxu1 %v3146_v47 }
 0xc19   :  { %3227 = vmatpush.msrb.mxu2 %v3146_v47  ;;  %3256 = vmatpush.msrb.mxu3 %v3146_v47 }
 0xc1a   :  { %3170 = vmatpush.msrb.mxu0 %v3145_v48  ;;  %3199 = vmatpush.msrb.mxu1 %v3145_v48 }
 0xc1b   :  { %3228 = vmatpush.msrb.mxu2 %v3145_v48  ;;  %3257 = vmatpush.msrb.mxu3 %v3145_v48 }
 0xc1c   :  { %4668 = vmatmul.msk.f32.gmra.mxu0 %vm1007_vm14, %v2501_v19  ;;  %4672 = vmatmul.msk.f32.gmra.mxu1 %vm1007_vm14, %v2501_v19 }
 0xc1d   :  { %4676 = vmatmul.msk.f32.gmra.mxu2 %vm1007_vm14, %v2501_v19  ;;  %4680 = vmatmul.msk.f32.gmra.mxu3 %vm1007_vm14, %v2501_v19 }
 0xc1e   :  { %3171 = vmatpush.msrb.mxu0 %v3144_v12  ;;  %3200 = vmatpush.msrb.mxu1 %v3144_v12 }
 0xc1f   :  { %3229 = vmatpush.msrb.mxu2 %v3144_v12  ;;  %3258 = vmatpush.msrb.mxu3 %v3144_v12 }
 0xc20   :  { %3172 = vmatpush.msrb.mxu0 %v3143_v35  ;;  %3201 = vmatpush.msrb.mxu1 %v3143_v35 }
 0xc21   :  { %3230 = vmatpush.msrb.mxu2 %v3143_v35  ;;  %3259 = vmatpush.msrb.mxu3 %v3143_v35 }
 0xc22   :  { %3173 = vmatpush.msrb.mxu0 %v3142_v41  ;;  %3202 = vmatpush.msrb.mxu1 %v3142_v41 }
 0xc23   :  { %3231 = vmatpush.msrb.mxu2 %v3142_v41  ;;  %3260 = vmatpush.msrb.mxu3 %v3142_v41 }
 0xc24   :  { %4669 = vmatmul.msk.f32.gmra.mxu0 %vm1007_vm14, %v2502_v3  ;;  %4673 = vmatmul.msk.f32.gmra.mxu1 %vm1007_vm14, %v2502_v3 }
 0xc25   :  { %4677 = vmatmul.msk.f32.gmra.mxu2 %vm1007_vm14, %v2502_v3  ;;  %4681 = vmatmul.msk.f32.gmra.mxu3 %vm1007_vm14, %v2502_v3 }
 0xc26   :  { %3174 = vmatpush.msrb.mxu0 %v3141_v1  ;;  %3203 = vmatpush.msrb.mxu1 %v3141_v1 }
 0xc27   :  { %3232 = vmatpush.msrb.mxu2 %v3141_v1  ;;  %3261 = vmatpush.msrb.mxu3 %v3141_v1 }
 0xc28   :  { %3175 = vmatpush.msrb.mxu0 %v3140_v51  ;;  %3204 = vmatpush.msrb.mxu1 %v3140_v51 }
 0xc29   :  { %3233 = vmatpush.msrb.mxu2 %v3140_v51  ;;  %3262 = vmatpush.msrb.mxu3 %v3140_v51 }
 0xc2a   :  { %3176 = vmatpush.msrb.mxu0 %v3139_v17  ;;  %3205 = vmatpush.msrb.mxu1 %v3139_v17 }
 0xc2b   :  { %3234 = vmatpush.msrb.mxu2 %v3139_v17  ;;  %3263 = vmatpush.msrb.mxu3 %v3139_v17 }
 0xc2c   :  { %4670 = vmatmul.msk.f32.gmra.mxu0 %vm1007_vm14, %v2503_v30  ;;  %4674 = vmatmul.msk.f32.gmra.mxu1 %vm1007_vm14, %v2503_v30 }
 0xc2d   :  { %4678 = vmatmul.msk.f32.gmra.mxu2 %vm1007_vm14, %v2503_v30  ;;  %4682 = vmatmul.msk.f32.gmra.mxu3 %vm1007_vm14, %v2503_v30 }
 0xc2e   :  { %3177 = vmatpush.msrb.mxu0 %v3138_v54  ;;  %3206 = vmatpush.msrb.mxu1 %v3138_v54 }
 0xc2f   :  { %3235 = vmatpush.msrb.mxu2 %v3138_v54  ;;  %3264 = vmatpush.msrb.mxu3 %v3138_v54 }
 0xc30   :  { %3178 = vmatpush.msrb.mxu0 %v3137_v36  ;;  %3207 = vmatpush.msrb.mxu1 %v3137_v36 }
 0xc31   :  { %3236 = vmatpush.msrb.mxu2 %v3137_v36  ;;  %3265 = vmatpush.msrb.mxu3 %v3137_v36 }
 0xc32   :  { %3179 = vmatpush.msrb.mxu0 %v3136_v52  ;;  %3208 = vmatpush.msrb.mxu1 %v3136_v52 }
 0xc33   :  { %3237 = vmatpush.msrb.mxu2 %v3136_v52  ;;  %3266 = vmatpush.msrb.mxu3 %v3136_v52 }
 0xc34   :  { %3180 = vmatpush.msrb.mxu0 %v3135_v43  ;;  %3209 = vmatpush.msrb.mxu1 %v3135_v43 }
 0xc35   :  { %3238 = vmatpush.msrb.mxu2 %v3135_v43  ;;  %3267 = vmatpush.msrb.mxu3 %v3135_v43 }
 0xc36   :  { %3181 = vmatpush.msrb.mxu0 %v3134_v0  ;;  %3210 = vmatpush.msrb.mxu1 %v3134_v0 }
 0xc37   :  { %3239 = vmatpush.msrb.mxu2 %v3134_v0  ;;  %3268 = vmatpush.msrb.mxu3 %v3134_v0 }
 0xc38   :  { %3182 = vmatpush.msrb.mxu0 %v3133_v14  ;;  %3211 = vmatpush.msrb.mxu1 %v3133_v14 }
 0xc39   :  { %3240 = vmatpush.msrb.mxu2 %v3133_v14  ;;  %3269 = vmatpush.msrb.mxu3 %v3133_v14 }
 0xc3a   :  { %3183 = vmatpush.msrb.mxu0 %v3132_v40  ;;  %3212 = vmatpush.msrb.mxu1 %v3132_v40 }
 0xc3b   :  { %3241 = vmatpush.msrb.mxu2 %v3132_v40  ;;  %3270 = vmatpush.msrb.mxu3 %v3132_v40 }
 0xc91   :  { %v3017_v8 = vpop.f32.mrf.mxu0  ;;  %v3046_v32 = vpop.f32.mrf.mxu1 }
 0xc92   :  { %v3018_v44 = vadd.f32 %v3017_v8, %v2971_v59  ;;  %v3047_v63 = vadd.f32 %v3046_v32, %v2971_v59  ;;  %v3148_v32 = vld [vmem:[#allocation13] sm:$0xff] }
 0xc94   :  { %v6496_v34 = vadd.f32 %v3018_v44, %v6261_v2  ;;  %v6499_v58 = vadd.f32 %v3047_v63, %v6264_v10 }
 0xc96   :  { %3184 = vmatmul.f32.vlgmr.msrb.gmra.mxu0 %v6496_v34  ;;  %3213 = vmatmul.f32.vlgmr.msrb.gmra.mxu1 %v6499_v58 }
 0xc98   :  { %v3075_v57 = vpop.f32.mrf.mxu2  ;;  %v3104_v46 = vpop.f32.mrf.mxu3 }
 0xc99   :  { %v3076_v23 = vadd.f32 %v3075_v57, %v2971_v59  ;;  %v3105_v15 = vadd.f32 %v3104_v46, %v2971_v59  ;;  %v3020_v60 = vpop.f32.mrf.mxu0  ;;  %v3049_v6 = vpop.f32.mrf.mxu1  ;;  %v3150_v57 = vld [vmem:[#allocation13 + $0x10] sm:$0xff]  ;;  %v3151_v46 = vld [vmem:[#allocation13 + $0x18] sm:$0xff] }
 0xc9a   :  { %v3021_v13 = vadd.f32 %v3020_v60, %v2976_v61  ;;  %v3050_v53 = vadd.f32 %v3049_v6, %v2976_v61 }
 0xc9b   :  { %v6504_v31 = vadd.f32 %v3076_v23, %v6269_v50  ;;  %v6507_v2 = vadd.f32 %v3105_v15, %v6272_v33 }
 0xc9c   :  { %v6510_v10 = vadd.f32 %v3021_v13, %v6275_v38  ;;  %v6513_v56 = vadd.f32 %v3050_v53, %v6278_v4 }
 0xc9d   :  { %3242 = vmatmul.f32.vlgmr.msrb.gmra.mxu2 %v6504_v31  ;;  %3271 = vmatmul.f32.vlgmr.msrb.gmra.mxu3 %v6507_v2 }
 0xc9e   :  { %3187 = vmatmul.f32.gmra.mxu0 %v6510_v10  ;;  %3216 = vmatmul.f32.gmra.mxu1 %v6513_v56 }
 0xca0   :  { %v3078_v50 = vpop.f32.mrf.mxu2  ;;  %v3107_v22 = vpop.f32.mrf.mxu3 }
 0xca1   :  { %v3079_v26 = vadd.f32 %v3078_v50, %v2976_v61  ;;  %v3108_v33 = vadd.f32 %v3107_v22, %v2976_v61  ;;  %v3023_v39 = vpop.f32.mrf.mxu0  ;;  %v3052_v49 = vpop.f32.mrf.mxu1  ;;  %v3149_v61 = vld [vmem:[#allocation13 + $0x8] sm:$0xff] }
 0xca2   :  { %v3024_v38 = vadd.f32 %v3023_v39, %v2981_v42  ;;  %v3053_v28 = vadd.f32 %v3052_v49, %v2981_v42 }
 0xca3   :  { %v6520_v4 = vadd.f32 %v3079_v26, %v6285_v11  ;;  %v6523_v9 = vadd.f32 %v3108_v33, %v6288_v37 }
 0xca4   :  { %v6526_v20 = vadd.f32 %v3024_v38, %v6291_v29  ;;  %v6529_v18 = vadd.f32 %v3053_v28, %v6294_v55 }
 0xca5   :  { %3245 = vmatmul.f32.gmra.mxu2 %v6520_v4  ;;  %3274 = vmatmul.f32.gmra.mxu3 %v6523_v9 }
 0xca6   :  { %3190 = vmatmul.f32.gmra.mxu0 %v6526_v20  ;;  %3219 = vmatmul.f32.gmra.mxu1 %v6529_v18 }
 0xca8   :  { %v3081_v11 = vpop.f32.mrf.mxu2  ;;  %v3110_v5 = vpop.f32.mrf.mxu3 }
 0xca9   :  { %v3082_v27 = vadd.f32 %v3081_v11, %v2981_v42  ;;  %v3111_v37 = vadd.f32 %v3110_v5, %v2981_v42  ;;  %v3026_v47 = vpop.f32.mrf.mxu0  ;;  %v3055_v48 = vpop.f32.mrf.mxu1 }
 0xcaa   :  { %v3027_v29 = vadd.f32 %v3026_v47, %v2986_v16  ;;  %v3056_v19 = vadd.f32 %v3055_v48, %v2986_v16 }
 0xcab   :  { %v6536_v55 = vadd.f32 %v3082_v27, %v6301_v25  ;;  %v6539_v12 = vadd.f32 %v3111_v37, %v6304_v62 }
 0xcac   :  { %v6542_v35 = vadd.f32 %v3027_v29, %v6307_v45  ;;  %v6545_v41 = vadd.f32 %v3056_v19, %v6310_v7 }
 0xcad   :  { %3248 = vmatmul.f32.gmra.mxu2 %v6536_v55  ;;  %3277 = vmatmul.f32.gmra.mxu3 %v6539_v12 }
 0xcae   :  { %3193 = vmatmul.f32.gmra.mxu0 %v6542_v35  ;;  %3222 = vmatmul.f32.gmra.mxu1 %v6545_v41 }
 0xcb0   :  { %v3084_v3 = vpop.f32.mrf.mxu2  ;;  %v3113_v25 = vpop.f32.mrf.mxu3 }
 0xcb1   :  { %v3085_v1 = vadd.f32 %v3084_v3, %v2986_v16  ;;  %v3114_v51 = vadd.f32 %v3113_v25, %v2986_v16 }
 0xcb3   :  { %v6552_v62 = vadd.f32 %v3085_v1, %v6317_v21  ;;  %v6555_v45 = vadd.f32 %v3114_v51, %v6320_v24 }
 0xcb5   :  { %3251 = vmatmul.f32.gmra.mxu2 %v6552_v62  ;;  %3280 = vmatmul.f32.gmra.mxu3 %v6555_v45 }
 0xd13   :  { %v3185_v7 = vpop.f32.mrf.mxu0  ;;  %v3214_v17 = vpop.f32.mrf.mxu1 }
 0xd1b   :  { %v3188_v30 = vpop.f32.mrf.mxu0  ;;  %v3217_v54 = vpop.f32.mrf.mxu1 }
 0xd20   :  { %v3243_v36 = vpop.f32.mrf.mxu2  ;;  %v3272_v52 = vpop.f32.mrf.mxu3 }
 0xd23   :  { %v3191_v43 = vpop.f32.mrf.mxu0  ;;  %v3220_v0 = vpop.f32.mrf.mxu1 }
 0xd28   :  { %v3246_v14 = vpop.f32.mrf.mxu2  ;;  %v3275_v40 = vpop.f32.mrf.mxu3 }
 0xd2b   :  { %v3194_v59 = vpop.f32.mrf.mxu0  ;;  %v3223_v21 = vpop.f32.mrf.mxu1 }
 0xd2c   :  { %3308 = vmatpush.msra.mxu0 %v3194_v59  ;;  %3337 = vmatpush.msra.mxu1 %v3223_v21 }
 0xd2e   :  { %3309 = vmatpush.msra.mxu0 %v3191_v43  ;;  %3338 = vmatpush.msra.mxu1 %v3220_v0 }
 0xd30   :  { %v3249_v24 = vpop.f32.mrf.mxu2  ;;  %v3278_v8 = vpop.f32.mrf.mxu3  ;;  %3310 = vmatpush.msra.mxu0 %v3188_v30  ;;  %3339 = vmatpush.msra.mxu1 %v3217_v54 }
 0xd32   :  { %3311 = vmatpush.msra.mxu0 %v3185_v7  ;;  %3340 = vmatpush.msra.mxu1 %v3214_v17 }
 0xd33   :  { %4683 = vmatmul.msk.f32.vlgmr.msra.gmra.mxu0 %vm1007_vm14, %v3148_v32  ;;  %4687 = vmatmul.msk.f32.vlgmr.msra.gmra.mxu1 %vm1007_vm14, %v3148_v32 }
 0xd38   :  { %v3252_v44 = vpop.f32.mrf.mxu2  ;;  %v3281_v63 = vpop.f32.mrf.mxu3 }
 0xd39   :  { %3366 = vmatpush.msra.mxu2 %v3252_v44  ;;  %3395 = vmatpush.msra.mxu3 %v3281_v63 }
 0xd3b   :  { %3367 = vmatpush.msra.mxu2 %v3249_v24  ;;  %3396 = vmatpush.msra.mxu3 %v3278_v8 }
 0xd3c   :  { %4684 = vmatmul.msk.f32.gmra.mxu0 %vm1007_vm14, %v3149_v61  ;;  %4688 = vmatmul.msk.f32.gmra.mxu1 %vm1007_vm14, %v3149_v61 }
 0xd3d   :  { %3368 = vmatpush.msra.mxu2 %v3246_v14  ;;  %3397 = vmatpush.msra.mxu3 %v3275_v40 }
 0xd3f   :  { %3369 = vmatpush.msra.mxu2 %v3243_v36  ;;  %3398 = vmatpush.msra.mxu3 %v3272_v52 }
 0xd40   :  { %4691 = vmatmul.msk.f32.vlgmr.msra.gmra.mxu2 %vm1007_vm14, %v3148_v32  ;;  %4695 = vmatmul.msk.f32.vlgmr.msra.gmra.mxu3 %vm1007_vm14, %v3148_v32 }
 0xd44   :  { %4685 = vmatmul.msk.f32.gmra.mxu0 %vm1007_vm14, %v3150_v57  ;;  %4689 = vmatmul.msk.f32.gmra.mxu1 %vm1007_vm14, %v3150_v57 }
 0xd48   :  { %4692 = vmatmul.msk.f32.gmra.mxu2 %vm1007_vm14, %v3149_v61  ;;  %4696 = vmatmul.msk.f32.gmra.mxu3 %vm1007_vm14, %v3149_v61 }
 0xd4c   :  { %4686 = vmatmul.msk.f32.gmra.mxu0 %vm1007_vm14, %v3151_v46  ;;  %4690 = vmatmul.msk.f32.gmra.mxu1 %vm1007_vm14, %v3151_v46 }
 0xd50   :  { %4693 = vmatmul.msk.f32.gmra.mxu2 %vm1007_vm14, %v3150_v57  ;;  %4697 = vmatmul.msk.f32.gmra.mxu3 %vm1007_vm14, %v3150_v57 }
 0xd58   :  { %4694 = vmatmul.msk.f32.gmra.mxu2 %vm1007_vm14, %v3151_v46  ;;  %4698 = vmatmul.msk.f32.gmra.mxu3 %vm1007_vm14, %v3151_v46 }
 0xdb0   :  { %v6575_v23 = vpop.f32.mrf.mxu0  ;;  %v6577_v15 = vpop.f32.mrf.mxu1 }
 0xdb1   :  { %v3436_v51 = vmul.f32 %v6575_v23, %v6575_v23  ;;  %v3437_v7 = vmul.f32 %v6577_v15, %v6577_v15  ;;  %v3412_v57 = vadd.f32 %v6577_v15, %v6575_v23 }
 0xdb3   :  { %v3452_v24 = vadd.f32 %v3437_v7, %v3436_v51 }
 0xdb9   :  { %v6579_v60 = vpop.f32.mrf.mxu0  ;;  %v6581_v6 = vpop.f32.mrf.mxu1 }
 0xdba   :  { %v3417_v42 = vadd.f32 %v6581_v6, %v6579_v60  ;;  %v3440_v17 = vmul.f32 %v6579_v60, %v6579_v60  ;;  %v3441_v30 = vmul.f32 %v6581_v6, %v6581_v6 }
 0xdbc   :  { %v3457_v8 = vadd.f32 %v3441_v30, %v3440_v17 }
 0xdc1   :  { %v6589_v50 = vpop.f32.mrf.mxu0  ;;  %v6591_v22 = vpop.f32.mrf.mxu1 }
 0xdc2   :  { %v3422_v38 = vadd.f32 %v6591_v22, %v6589_v50  ;;  %v3444_v28 = vmul.f32 %v6589_v50, %v6589_v50  ;;  %v3445_v16 = vmul.f32 %v6591_v22, %v6591_v22 }
 0xdc3   :  { %v6583_v13 = vpop.f32.mrf.mxu2  ;;  %v6585_v53 = vpop.f32.mrf.mxu3 }
 0xdc4   :  { %v3462_v48 = vadd.f32 %v3445_v16, %v3444_v28  ;;  %v3438_v21 = vmul.f32 %v6583_v13, %v6583_v13  ;;  %v3413_v28 = vadd.f32 %v3412_v57, %v6583_v13 }
 0xdc9   :  { %v6605_v11 = vpop.f32.mrf.mxu0  ;;  %v6607_v5 = vpop.f32.mrf.mxu1 }
 0xdca   :  { %v3448_v3 = vmul.f32 %v6605_v11, %v6605_v11  ;;  %v3449_v25 = vmul.f32 %v6607_v5, %v6607_v5  ;;  %v3427_v1 = vadd.f32 %v6607_v5, %v6605_v11 }
 0xdcb   :  { %v6593_v26 = vpop.f32.mrf.mxu2  ;;  %v6595_v33 = vpop.f32.mrf.mxu3 }
 0xdcc   :  { %v3418_v39 = vadd.f32 %v3417_v42, %v6593_v26  ;;  %v3467_v52 = vadd.f32 %v3449_v25, %v3448_v3  ;;  %v3442_v32 = vmul.f32 %v6593_v26, %v6593_v26  ;;  %v3439_v42 = vmul.f32 %v6585_v53, %v6585_v53 }
 0xdce   :  { %v3419_v49 = vadd.f32 %v3418_v39, %v6595_v33  ;;  %v3453_v39 = vadd.f32 %v3452_v24, %v3438_v21 }
 0xdd0   :  { %3420 = vadd.xlane.f32.xlu2 %v3419_v49  ;;  %v3443_v49 = vmul.f32 %v6595_v33, %v6595_v33  ;;  %v3454_v16 = vadd.f32 %v3453_v39, %v3439_v42 }
 0xdd3   :  { %v6609_v27 = vpop.f32.mrf.mxu2  ;;  %v6611_v37 = vpop.f32.mrf.mxu3 }
 0xdd4   :  { %v3423_v47 = vadd.f32 %v3422_v38, %v6609_v27  ;;  %v3446_v29 = vmul.f32 %v6609_v27, %v6609_v27  ;;  %v3447_v54 = vmul.f32 %v6611_v37, %v6611_v37  ;;  %v3458_v38 = vadd.f32 %v3457_v8, %v3442_v32 }
 0xdd6   :  { %v3424_v19 = vadd.f32 %v3423_v47, %v6611_v37  ;;  %v3463_v36 = vadd.f32 %v3462_v48, %v3446_v29  ;;  %v3459_v47 = vadd.f32 %v3458_v38, %v3443_v49  ;;  %v3414_v48 = vadd.f32 %v3413_v28, %v6585_v53 }
 0xdd8   :  { %3425 = vadd.xlane.f32.xlu0 %v3424_v19  ;;  %v3464_v44 = vadd.f32 %v3463_v36, %v3447_v54 }
 0xddb   :  { %v6633_v43 = vpop.f32.mrf.mxu2  ;;  %v6635_v0 = vpop.f32.mrf.mxu3 }
 0xddc   :  { %v3450_v14 = vmul.f32 %v6633_v43, %v6633_v43  ;;  %v3428_v40 = vadd.f32 %v3427_v1, %v6633_v43  ;;  %v3451_v59 = vmul.f32 %v6635_v0, %v6635_v0 }
 0xdde   :  { %v3429_v63 = vadd.f32 %v3428_v40, %v6635_v0  ;;  %v3468_v61 = vadd.f32 %v3467_v52, %v3450_v14 }
 0xde0   :  { %3465 = vadd.xlane.f32.xlu0 %v3464_v44  ;;  %3430 = vadd.xlane.f32.xlu2 %v3429_v63  ;;  %v3469_v46 = vadd.f32 %v3468_v61, %v3451_v59 }
 0xde2   :  { %3470 = vadd.xlane.f32.xlu1 %v3469_v46 }
 0xde8   :  { %3455 = vadd.xlane.f32.xlu0 %v3454_v16  ;;  %3460 = vadd.xlane.f32.xlu2 %v3459_v47 }
 0xdea   :  { %3415 = vadd.xlane.f32.xlu1 %v3414_v48 }
 0xe43   :  { %v3421_v29 = vpop.xlane.xlu2 %3420 }
 0xe44   :  { %v6655_v14 = vmul.f32 0.0026041667, %v3421_v29 }
 0xe46   :  { %v3477_v8 = vmul.f32 %v6655_v14, %v6655_v14 }
 0xe4b   :  { %v3426_v19 = vpop.xlane.xlu0 %3425 }
 0xe4c   :  { %v3434_v3 = vmul.f32 0.0026041667, %v3426_v19 }
 0xe4e   :  { %v3478_v51 = vmul.f32 %v3434_v3, %v3434_v3 }
 0xe53   :  { %v3466_v25 = vpop.xlane.xlu0 %3465  ;;  %v3431_v1 = vpop.xlane.xlu2 %3430 }
 0xe54   :  { %v3474_v7 = vmul.f32 0.0026041667, %v3466_v25  ;;  %v3435_v17 = vmul.f32 0.0026041667, %v3431_v1 }
 0xe55   :  { %v3471_v30 = vpop.xlane.xlu1 %3470 }
 0xe56   :  { %v3482_v54 = vsub.f32 %v3474_v7, %v3478_v51  ;;  %v3479_v36 = vmul.f32 %v3435_v17, %v3435_v17  ;;  %v3475_v52 = vmul.f32 0.0026041667, %v3471_v30 }
 0xe58   :  { %v3486_v40 = vadd.f32 1e-05, %v3482_v54  ;;  %v3483_v59 = vsub.f32 %v3475_v52, %v3479_v36  ;;  %v3154_v52 = vld [vmem:[%s7012_s15 + $0x10] sm:$0xff] }
 0xe5a   :  { %4838 = vrsqrt.f32 %v3486_v40  ;;  %v3487_v21 = vadd.f32 1e-05, %v3483_v59  ;;  %vm3514_vm6 = vweird.f32 %v3486_v40 }
 0xe5b   :  { %v3461_v24 = vpop.xlane.xlu2 %3460  ;;  %v3456_v44 = vpop.xlane.xlu0 %3455 }
 0xe5c   :  { %4840 = vrsqrt.f32 %v3487_v21  ;;  %v3473_v32 = vmul.f32 0.0026041667, %v3461_v24  ;;  %v3472_v42 = vmul.f32 0.0026041667, %v3456_v44  ;;  %vm3524_vm9 = vweird.f32 %v3487_v21 }
 0xe5d   :  { %v3416_v63 = vpop.xlane.xlu1 %3415 }
 0xe5e   :  { %v3481_v61 = vsub.f32 %v3473_v32, %v3477_v8  ;;  %v6659_v57 = vmul.f32 0.0026041667, %v3416_v63  ;;  %v3155_v32 = vld [vmem:[%s7012_s15 + $0x18] sm:$0xff] }
 0xe60   :  { %v4839_v46 = vpop.eup %4838  ;;  %v3485_v39 = vadd.f32 1e-05, %v3481_v61  ;;  %v3476_v49 = vmul.f32 %v6659_v57, %v6659_v57 }
 0xe61   :  { %v3509_v38 = vmul.f32 %v4839_v46, %v3486_v40  ;;  %vm3515_vm5 = vweird.f32 %v4839_v46  ;;  %v3158_v40 = vld [vmem:[%s7013_s4 + $0x10] sm:$0xff] }
 0xe62   :  { %v4841_v28 = vpop.eup %4840  ;;  %4842 = vrsqrt.f32 %v3485_v39  ;;  %v3480_v16 = vsub.f32 %v3472_v42, %v3476_v49  ;;  %vm3516_vm8 = vmor %vm3514_vm6, %vm3515_vm5  ;;  %vm3504_vm12 = vweird.f32 %v3485_v39 }
 0xe63   :  { %v3510_v47 = vmul.f32 %v4839_v46, %v3509_v38  ;;  %v3519_v48 = vmul.f32 %v4841_v28, %v3487_v21  ;;  %vm3525_vm7 = vweird.f32 %v4841_v28 }
 0xe64   :  { %v3484_v29 = vadd.f32 1e-05, %v3480_v16  ;;  %vm3526_vm10 = vmor %vm3524_vm9, %vm3525_vm7 }
 0xe65   :  { %v3511_v19 = vmul.f32 0.5, %v3510_v47  ;;  %v3520_v25 = vmul.f32 %v4841_v28, %v3519_v48 }
 0xe66   :  { %4844 = vrsqrt.f32 %v3484_v29  ;;  %vm3494_vm0 = vweird.f32 %v3484_v29 }
 0xe67   :  { %v3512_v1 = vsub.f32 1.5, %v3511_v19  ;;  %v3521_v51 = vmul.f32 0.5, %v3520_v25  ;;  %v3159_v19 = vld [vmem:[%s7013_s4 + $0x18] sm:$0xff] }
 0xe68   :  { %v4843_v7 = vpop.eup %4842 }
 0xe69   :  { %v3513_v30 = vmul.f32 %v4839_v46, %v3512_v1  ;;  %v3522_v54 = vsub.f32 1.5, %v3521_v51  ;;  %v3499_v36 = vmul.f32 %v4843_v7, %v3485_v39  ;;  %vm3505_vm11 = vweird.f32 %v4843_v7  ;;  %v3153_v1 = vld [vmem:[%s7012_s15 + $0x8] sm:$0xff] }
 0xe6a   :  { %vm3506_vm13 = vmor %vm3504_vm12, %vm3505_vm11 }
 0xe6b   :  { %v3523_v59 = vmul.f32 %v4841_v28, %v3522_v54  ;;  %v3500_v24 = vmul.f32 %v4843_v7, %v3499_v36  ;;  %v3517_v8 = vsel %vm3516_vm8, %v4839_v46, %v3513_v30  ;;  %v3152_v36 = vld [vmem:[%s7012_s15] sm:$0xff] }
 0xe6c   :  { %v4845_v44 = vpop.eup %4844  ;;  %v3530_v63 = vmul.f32 %v3517_v8, %v3154_v52 }
 0xe6d   :  { %v3501_v61 = vmul.f32 0.5, %v3500_v24  ;;  %v3489_v42 = vmul.f32 %v4845_v44, %v3484_v29  ;;  %v3527_v49 = vsel %vm3526_vm10, %v4841_v28, %v3523_v59  ;;  %vm3495_vm15 = vweird.f32 %v4845_v44  ;;  %v3156_v24 = vld [vmem:[%s7013_s4] sm:$0xff] }
 0xe6e   :  { %v3534_v38 = vmul.f32 %v3530_v63, %v3434_v3  ;;  %v3531_v16 = vmul.f32 %v3527_v49, %v3155_v32  ;;  %vm3496_vm1 = vmor %vm3494_vm0, %vm3495_vm15  ;;  %v3164_v32 = vld [vmem:[%s7014_s6] sm:$0xff] }
 0xe6f   :  { %v3502_v47 = vsub.f32 1.5, %v3501_v61  ;;  %v3490_v48 = vmul.f32 %v4845_v44, %v3489_v42  ;;  %v3157_v61 = vld [vmem:[%s7013_s4 + $0x8] sm:$0xff]  ;;  %v3166_v42 = vld [vmem:[%s7014_s6 + $0x10] sm:$0xff] }
 0xe70   :  { %v3538_v25 = vsub.f32 %v3158_v40, %v3534_v38  ;;  %v3535_v21 = vmul.f32 %v3531_v16, %v3435_v17  ;;  %v3165_v40 = vld [vmem:[%s7014_s6 + $0x8] sm:$0xff] }
 0xe71   :  { %v3491_v46 = vmul.f32 0.5, %v3490_v48  ;;  %v3503_v51 = vmul.f32 %v4843_v7, %v3502_v47 }
 0xe72   :  { %3588 = vperm.xlu1 %4805, %v3538_v25   ;;  %v3539_v30 = vsub.f32 %v3159_v19, %v3535_v21 }
 0xe73   :  { %v3492_v54 = vsub.f32 1.5, %v3491_v46  ;;  %v3507_v28 = vsel %vm3506_vm13, %v4843_v7, %v3503_v51 }
 0xe74   :  { %3593 = vperm.xlu0 %4803, %v3539_v30   ;;  %v3529_v3 = vmul.f32 %v3507_v28, %v3153_v1 }
 0xe75   :  { %v3493_v52 = vmul.f32 %v4845_v44, %v3492_v54 }
 0xe76   :  { %3547 = vperm.xlu2 %4804, %v3529_v3   ;;  %v3533_v8 = vmul.f32 %v3529_v3, %v6655_v14 }
 0xe77   :  { %v3497_v17 = vsel %vm3496_vm1, %v4845_v44, %v3493_v52  ;;  %v3167_v44 = vld [vmem:[%s7014_s6 + $0x18] sm:$0xff] }
 0xe78   :  { %v3528_v39 = vmul.f32 %v3497_v17, %v3152_v36  ;;  %v3537_v29 = vsub.f32 %v3157_v61, %v3533_v8 }
 0xe7a   :  { %3557 = vperm.xlu1 %4805, %v3531_v16   ;;  %v3532_v59 = vmul.f32 %v3528_v39, %v6659_v57 }
 0xe7c   :  { %3542 = vperm.xlu0 %4803, %v3528_v39   ;;  %v3536_v7 = vsub.f32 %v3156_v24, %v3532_v59 }
 0xe7e   :  { %3552 = vperm.xlu2 %4804, %v3530_v63  }
 0xe82   :  { %3578 = vperm.xlu1 %4805, %v3536_v7  }
 0xe84   :  { %3630 = vperm.xlu0 %4803, %v3164_v32  }
 0xe86   :  { %3583 = vperm.xlu2 %4804, %v3537_v29  }
 0xe8a   :  { %3640 = vperm.xlu1 %4805, %v3166_v42  }
 0xe8c   :  { %3645 = vperm.xlu0 %4803, %v3167_v44  }
 0xe8e   :  { %3635 = vperm.xlu2 %4804, %v3165_v40  }
 0xed0   :  { %v3548_v49 = vpop.permute.xlu2 %3547 }
 0xed1   :  { %v3564_v63 = vmul.f32 %v3548_v49, %v6579_v60  ;;  %v3565_v14 = vmul.f32 %v3548_v49, %v6581_v6  ;;  %v3566_v47 = vmul.f32 %v3548_v49, %v6593_v26  ;;  %v3567_v48 = vmul.f32 %v3548_v49, %v6595_v33 }
 0xed8   :  { %v3553_v57 = vpop.permute.xlu2 %3552 }
 0xed9   :  { %v3568_v19 = vmul.f32 %v3553_v57, %v6589_v50  ;;  %v3569_v25 = vmul.f32 %v3553_v57, %v6591_v22  ;;  %v3570_v6 = vmul.f32 %v3553_v57, %v6609_v27  ;;  %v3571_v26 = vmul.f32 %v3553_v57, %v6611_v37 }
 0xee0   :  { %v3584_v46 = vpop.permute.xlu2 %3583 }
 0xee1   :  { %v3601_v39 = vadd.f32 %v3584_v46, %v3565_v14  ;;  %v3602_v7 = vadd.f32 %v3584_v46, %v3566_v47  ;;  %v3603_v27 = vadd.f32 %v3584_v46, %v3567_v48 }
 0xee3   :  { %v3617_v57 = vmax.f32 %v3601_v39, 0.0 }
 0xee4   :  { %v3589_v38 = vpop.permute.xlu1 %3588 }
 0xee5   :  { %v3604_v54 = vadd.f32 %v3589_v38, %v3568_v19  ;;  %v3605_v33 = vadd.f32 %v3589_v38, %v3569_v25  ;;  %v3606_v52 = vadd.f32 %v3589_v38, %v3570_v6  ;;  %v3607_v17 = vadd.f32 %v3589_v38, %v3571_v26  ;;  %v3160_v19 = vld [vmem:[#allocation14] sm:$0xff]  ;;  %v3807_v25 = vld [vmem:[#allocation16 + $0x78] sm:$0xff]  ;;  %v3162_v6 = vld [vmem:[#allocation14 + $0x10] sm:$0xff] }
 0xee6   :  { %v3594_v16 = vpop.permute.xlu0 %3593  ;;  %v3801_v26 = vld [vmem:[#allocation16 + $0x48] sm:$0xff] }
 0xee7   :  { %v3621_v61 = vmax.f32 %v3605_v33, 0.0  ;;  %v3622_v44 = vmax.f32 %v3606_v52, 0.0  ;;  %v3623_v40 = vmax.f32 %v3607_v17, 0.0  ;;  %v3799_v33 = vld [vmem:[#allocation16 + $0x38] sm:$0xff]  ;;  %v3794_v52 = vld [vmem:[#allocation16 + $0x10] sm:$0xff]  ;;  %v3793_v17 = vld [vmem:[#allocation16 + $0x8] sm:$0xff] }
 0xeec   :  { %v3558_v21 = vpop.permute.xlu1 %3557 }
 0xeed   :  { %v3572_v1 = vmul.f32 %v3558_v21, %v6605_v11  ;;  %v3573_v51 = vmul.f32 %v3558_v21, %v6607_v5  ;;  %v3574_v30 = vmul.f32 %v3558_v21, %v6633_v43  ;;  %v3575_v60 = vmul.f32 %v3558_v21, %v6635_v0  ;;  %v3806_v21 = vld [vmem:[#allocation16 + $0x70] sm:$0xff] }
 0xeee   :  { %v3543_v36 = vpop.permute.xlu0 %3542  ;;  %v3600_v11 = vadd.f32 %v3584_v46, %v3564_v63  ;;  %v3620_v0 = vmax.f32 %v3604_v54, 0.0  ;;  %v3805_v46 = vld [vmem:[#allocation16 + $0x68] sm:$0xff]  ;;  %v3800_v54 = vld [vmem:[#allocation16 + $0x40] sm:$0xff] }
 0xeef   :  { %v3608_v28 = vadd.f32 %v3594_v16, %v3572_v1  ;;  %v3609_v50 = vadd.f32 %v3594_v16, %v3573_v51  ;;  %v3610_v3 = vadd.f32 %v3594_v16, %v3574_v30  ;;  %v3611_v22 = vadd.f32 %v3594_v16, %v3575_v60  ;;  %v3161_v1 = vld [vmem:[#allocation14 + $0x8] sm:$0xff]  ;;  %v3804_v51 = vld [vmem:[#allocation16 + $0x60] sm:$0xff]  ;;  %v3803_v30 = vld [vmem:[#allocation16 + $0x58] sm:$0xff] }
 0xef0   :  { %v3560_v37 = vmul.f32 %v3543_v36, %v6575_v23  ;;  %v3561_v8 = vmul.f32 %v3543_v36, %v6577_v15  ;;  %v3562_v32 = vmul.f32 %v3543_v36, %v6583_v13  ;;  %v3563_v29 = vmul.f32 %v3543_v36, %v6585_v53  ;;  %v3802_v60 = vld [vmem:[#allocation16 + $0x50] sm:$0xff]  ;;  %v3795_v36 = vld [vmem:[#allocation16 + $0x18] sm:$0xff] }
 0xef1   :  { %v3624_v5 = vmax.f32 %v3608_v28, 0.0  ;;  %v3625_v59 = vmax.f32 %v3609_v50, 0.0  ;;  %v3626_v43 = vmax.f32 %v3610_v3, 0.0  ;;  %v3627_v24 = vmax.f32 %v3611_v22, 0.0  ;;  %v3163_v28 = vld [vmem:[#allocation14 + $0x18] sm:$0xff]  ;;  %v3798_v50 = vld [vmem:[#allocation16 + $0x30] sm:$0xff] }
 0xef2   :  { %v3616_v49 = vmax.f32 %v3600_v11, 0.0  ;;  %v3618_v15 = vmax.f32 %v3602_v7, 0.0  ;;  %v3619_v13 = vmax.f32 %v3603_v27, 0.0  ;;  %v3797_v3 = vld [vmem:[#allocation16 + $0x28] sm:$0xff]  ;;  %v3796_v22 = vld [vmem:[#allocation16 + $0x20] sm:$0xff]  ;;  %v3636_v27 = vpop.permute.xlu2 %3635 }
 0xef3   :  { %3672 = vmatpush.msrb.mxu0 %v3624_v5  ;;  %3701 = vmatpush.msrb.mxu1 %v3625_v59  ;;  %v3792_v11 = vld [vmem:[#allocation16] sm:$0xff] }
 0xef4   :  { %3730 = vmatpush.msrb.mxu2 %v3626_v43  ;;  %3759 = vmatpush.msrb.mxu3 %v3627_v24  ;;  %v3579_v42 = vpop.permute.xlu1 %3578 }
 0xef5   :  { %3673 = vmatpush.msrb.mxu0 %v3620_v0  ;;  %3702 = vmatpush.msrb.mxu1 %v3621_v61  ;;  %v3596_v38 = vadd.f32 %v3579_v42, %v3560_v37  ;;  %v3597_v23 = vadd.f32 %v3579_v42, %v3561_v8  ;;  %v3598_v16 = vadd.f32 %v3579_v42, %v3562_v32 }
 0xef6   :  { %3731 = vmatpush.msrb.mxu2 %v3622_v44  ;;  %3760 = vmatpush.msrb.mxu3 %v3623_v40  ;;  %v3599_v63 = vadd.f32 %v3579_v42, %v3563_v29  ;;  %v3631_v39 = vpop.permute.xlu0 %3630 }
 0xef7   :  { %3674 = vmatpush.msrb.mxu0 %v3616_v49  ;;  %3703 = vmatpush.msrb.mxu1 %v3617_v57  ;;  %v3612_v53 = vmax.f32 %v3596_v38, 0.0  ;;  %v3613_v14 = vmax.f32 %v3597_v23, 0.0  ;;  %v3614_v47 = vmax.f32 %v3598_v16, 0.0 }
 0xef8   :  { %3732 = vmatpush.msrb.mxu2 %v3618_v15  ;;  %3761 = vmatpush.msrb.mxu3 %v3619_v13  ;;  %v3615_v48 = vmax.f32 %v3599_v63, 0.0 }
 0xef9   :  { %3675 = vmatpush.msrb.mxu0 %v3612_v53  ;;  %3704 = vmatpush.msrb.mxu1 %v3613_v14 }
 0xefa   :  { %3733 = vmatpush.msrb.mxu2 %v3614_v47  ;;  %3762 = vmatpush.msrb.mxu3 %v3615_v48 }
 0xefb   :  { %4699 = vmatmul.msk.f32.vlgmr.msrb.gmra.mxu0 %vm1007_vm14, %v3160_v19  ;;  %4703 = vmatmul.msk.f32.vlgmr.msrb.gmra.mxu1 %vm1007_vm14, %v3160_v19 }
 0xefc   :  { %4707 = vmatmul.msk.f32.vlgmr.msrb.gmra.mxu2 %vm1007_vm14, %v3160_v19  ;;  %4711 = vmatmul.msk.f32.vlgmr.msrb.gmra.mxu3 %vm1007_vm14, %v3160_v19  ;;  %v3641_v38 = vpop.permute.xlu1 %3640 }
 0xefd   :  { %3828 = vmatpush.msra.mxu0 %v3807_v25  ;;  %3857 = vmatpush.msra.mxu1 %v3807_v25 }
 0xefe   :  { %3886 = vmatpush.msra.mxu2 %v3807_v25  ;;  %3915 = vmatpush.msra.mxu3 %v3807_v25  ;;  %v3646_v48 = vpop.permute.xlu0 %3645 }
 0xeff   :  { %3829 = vmatpush.msra.mxu0 %v3806_v21  ;;  %3858 = vmatpush.msra.mxu1 %v3806_v21 }
 0xf00   :  { %3887 = vmatpush.msra.mxu2 %v3806_v21  ;;  %3916 = vmatpush.msra.mxu3 %v3806_v21 }
 0xf01   :  { %3830 = vmatpush.msra.mxu0 %v3805_v46  ;;  %3859 = vmatpush.msra.mxu1 %v3805_v46 }
 0xf02   :  { %3888 = vmatpush.msra.mxu2 %v3805_v46  ;;  %3917 = vmatpush.msra.mxu3 %v3805_v46 }
 0xf03   :  { %4700 = vmatmul.msk.f32.gmra.mxu0 %vm1007_vm14, %v3161_v1  ;;  %4704 = vmatmul.msk.f32.gmra.mxu1 %vm1007_vm14, %v3161_v1 }
 0xf04   :  { %4708 = vmatmul.msk.f32.gmra.mxu2 %vm1007_vm14, %v3161_v1  ;;  %4712 = vmatmul.msk.f32.gmra.mxu3 %vm1007_vm14, %v3161_v1 }
 0xf05   :  { %3831 = vmatpush.msra.mxu0 %v3804_v51  ;;  %3860 = vmatpush.msra.mxu1 %v3804_v51 }
 0xf06   :  { %3889 = vmatpush.msra.mxu2 %v3804_v51  ;;  %3918 = vmatpush.msra.mxu3 %v3804_v51 }
 0xf07   :  { %3832 = vmatpush.msra.mxu0 %v3803_v30  ;;  %3861 = vmatpush.msra.mxu1 %v3803_v30 }
 0xf08   :  { %3890 = vmatpush.msra.mxu2 %v3803_v30  ;;  %3919 = vmatpush.msra.mxu3 %v3803_v30 }
 0xf09   :  { %3833 = vmatpush.msra.mxu0 %v3802_v60  ;;  %3862 = vmatpush.msra.mxu1 %v3802_v60 }
 0xf0a   :  { %3891 = vmatpush.msra.mxu2 %v3802_v60  ;;  %3920 = vmatpush.msra.mxu3 %v3802_v60 }
 0xf0b   :  { %4701 = vmatmul.msk.f32.gmra.mxu0 %vm1007_vm14, %v3162_v6  ;;  %4705 = vmatmul.msk.f32.gmra.mxu1 %vm1007_vm14, %v3162_v6 }
 0xf0c   :  { %4709 = vmatmul.msk.f32.gmra.mxu2 %vm1007_vm14, %v3162_v6  ;;  %4713 = vmatmul.msk.f32.gmra.mxu3 %vm1007_vm14, %v3162_v6 }
 0xf0d   :  { %3834 = vmatpush.msra.mxu0 %v3801_v26  ;;  %3863 = vmatpush.msra.mxu1 %v3801_v26 }
 0xf0e   :  { %3892 = vmatpush.msra.mxu2 %v3801_v26  ;;  %3921 = vmatpush.msra.mxu3 %v3801_v26 }
 0xf0f   :  { %3835 = vmatpush.msra.mxu0 %v3800_v54  ;;  %3864 = vmatpush.msra.mxu1 %v3800_v54 }
 0xf10   :  { %3893 = vmatpush.msra.mxu2 %v3800_v54  ;;  %3922 = vmatpush.msra.mxu3 %v3800_v54 }
 0xf11   :  { %3836 = vmatpush.msra.mxu0 %v3799_v33  ;;  %3865 = vmatpush.msra.mxu1 %v3799_v33 }
 0xf12   :  { %3894 = vmatpush.msra.mxu2 %v3799_v33  ;;  %3923 = vmatpush.msra.mxu3 %v3799_v33 }
 0xf13   :  { %4702 = vmatmul.msk.f32.gmra.mxu0 %vm1007_vm14, %v3163_v28  ;;  %4706 = vmatmul.msk.f32.gmra.mxu1 %vm1007_vm14, %v3163_v28 }
 0xf14   :  { %4710 = vmatmul.msk.f32.gmra.mxu2 %vm1007_vm14, %v3163_v28  ;;  %4714 = vmatmul.msk.f32.gmra.mxu3 %vm1007_vm14, %v3163_v28 }
 0xf15   :  { %3837 = vmatpush.msra.mxu0 %v3798_v50  ;;  %3866 = vmatpush.msra.mxu1 %v3798_v50 }
 0xf16   :  { %3895 = vmatpush.msra.mxu2 %v3798_v50  ;;  %3924 = vmatpush.msra.mxu3 %v3798_v50 }
 0xf17   :  { %3838 = vmatpush.msra.mxu0 %v3797_v3  ;;  %3867 = vmatpush.msra.mxu1 %v3797_v3 }
 0xf18   :  { %3896 = vmatpush.msra.mxu2 %v3797_v3  ;;  %3925 = vmatpush.msra.mxu3 %v3797_v3 }
 0xf19   :  { %3839 = vmatpush.msra.mxu0 %v3796_v22  ;;  %3868 = vmatpush.msra.mxu1 %v3796_v22 }
 0xf1a   :  { %3897 = vmatpush.msra.mxu2 %v3796_v22  ;;  %3926 = vmatpush.msra.mxu3 %v3796_v22 }
 0xf1b   :  { %3840 = vmatpush.msra.mxu0 %v3795_v36  ;;  %3869 = vmatpush.msra.mxu1 %v3795_v36 }
 0xf1c   :  { %3898 = vmatpush.msra.mxu2 %v3795_v36  ;;  %3927 = vmatpush.msra.mxu3 %v3795_v36 }
 0xf1d   :  { %3841 = vmatpush.msra.mxu0 %v3794_v52  ;;  %3870 = vmatpush.msra.mxu1 %v3794_v52 }
 0xf1e   :  { %3899 = vmatpush.msra.mxu2 %v3794_v52  ;;  %3928 = vmatpush.msra.mxu3 %v3794_v52 }
 0xf1f   :  { %3842 = vmatpush.msra.mxu0 %v3793_v17  ;;  %3871 = vmatpush.msra.mxu1 %v3793_v17 }
 0xf20   :  { %3900 = vmatpush.msra.mxu2 %v3793_v17  ;;  %3929 = vmatpush.msra.mxu3 %v3793_v17 }
 0xf21   :  { %3843 = vmatpush.msra.mxu0 %v3792_v11  ;;  %3872 = vmatpush.msra.mxu1 %v3792_v11 }
 0xf22   :  { %3901 = vmatpush.msra.mxu2 %v3792_v11  ;;  %3930 = vmatpush.msra.mxu3 %v3792_v11 }
 0xf78   :  { %v3677_v5 = vpop.f32.mrf.mxu0  ;;  %v3706_v59 = vpop.f32.mrf.mxu1 }
 0xf79   :  { %v3678_v43 = vadd.f32 %v3677_v5, %v3631_v39  ;;  %v3707_v24 = vadd.f32 %v3706_v59, %v3631_v39  ;;  %v3808_v59 = vld [vmem:[#allocation17] sm:$0xff] }
 0xf7b   :  { %v6710_v0 = vadd.f32 %v3678_v43, %v6496_v34  ;;  %v6713_v7 = vadd.f32 %v3707_v24, %v6499_v58 }
 0xf7d   :  { %3844 = vmatmul.f32.vlgmr.msra.gmra.mxu0 %v6710_v0  ;;  %3873 = vmatmul.f32.vlgmr.msra.gmra.mxu1 %v6713_v7 }
 0xf7f   :  { %v3735_v37 = vpop.f32.mrf.mxu2  ;;  %v3764_v8 = vpop.f32.mrf.mxu3 }
 0xf80   :  { %v3736_v32 = vadd.f32 %v3735_v37, %v3631_v39  ;;  %v3765_v61 = vadd.f32 %v3764_v8, %v3631_v39  ;;  %v3680_v29 = vpop.f32.mrf.mxu0  ;;  %v3709_v42 = vpop.f32.mrf.mxu1  ;;  %v3810_v37 = vld [vmem:[#allocation17 + $0x10] sm:$0xff]  ;;  %v3811_v8 = vld [vmem:[#allocation17 + $0x18] sm:$0xff] }
 0xf81   :  { %v3681_v44 = vadd.f32 %v3680_v29, %v3636_v27  ;;  %v3710_v40 = vadd.f32 %v3709_v42, %v3636_v27 }
 0xf82   :  { %v6718_v49 = vadd.f32 %v3736_v32, %v6504_v31  ;;  %v6721_v34 = vadd.f32 %v3765_v61, %v6507_v2 }
 0xf83   :  { %v6724_v58 = vadd.f32 %v3681_v44, %v6510_v10  ;;  %v6727_v57 = vadd.f32 %v3710_v40, %v6513_v56 }
 0xf84   :  { %3902 = vmatmul.f32.vlgmr.msra.gmra.mxu2 %v6718_v49  ;;  %3931 = vmatmul.f32.vlgmr.msra.gmra.mxu3 %v6721_v34 }
 0xf85   :  { %3847 = vmatmul.f32.gmra.mxu0 %v6724_v58  ;;  %3876 = vmatmul.f32.gmra.mxu1 %v6727_v57 }
 0xf87   :  { %v3738_v31 = vpop.f32.mrf.mxu2  ;;  %v3767_v23 = vpop.f32.mrf.mxu3 }
 0xf88   :  { %v3739_v16 = vadd.f32 %v3738_v31, %v3636_v27  ;;  %v3768_v2 = vadd.f32 %v3767_v23, %v3636_v27  ;;  %v3683_v15 = vpop.f32.mrf.mxu0  ;;  %v3712_v13 = vpop.f32.mrf.mxu1  ;;  %v3809_v27 = vld [vmem:[#allocation17 + $0x8] sm:$0xff] }
 0xf89   :  { %v3684_v10 = vadd.f32 %v3683_v15, %v3641_v38  ;;  %v3713_v63 = vadd.f32 %v3712_v13, %v3641_v38 }
 0xf8a   :  { %v6734_v56 = vadd.f32 %v3739_v16, %v6520_v4  ;;  %v6737_v53 = vadd.f32 %v3768_v2, %v6523_v9 }
 0xf8b   :  { %v6740_v14 = vadd.f32 %v3684_v10, %v6526_v20  ;;  %v6743_v47 = vadd.f32 %v3713_v63, %v6529_v18 }
 0xf8c   :  { %3905 = vmatmul.f32.gmra.mxu2 %v6734_v56  ;;  %3934 = vmatmul.f32.gmra.mxu3 %v6737_v53 }
 0xf8d   :  { %3850 = vmatmul.f32.gmra.mxu0 %v6740_v14  ;;  %3879 = vmatmul.f32.gmra.mxu1 %v6743_v47 }
 0xf8f   :  { %v3741_v4 = vpop.f32.mrf.mxu2  ;;  %v3770_v19 = vpop.f32.mrf.mxu3 }
 0xf90   :  { %v3742_v25 = vadd.f32 %v3741_v4, %v3641_v38  ;;  %v3771_v9 = vadd.f32 %v3770_v19, %v3641_v38  ;;  %v3686_v21 = vpop.f32.mrf.mxu0  ;;  %v3715_v46 = vpop.f32.mrf.mxu1 }
 0xf91   :  { %v3687_v20 = vadd.f32 %v3686_v21, %v3646_v48  ;;  %v3716_v1 = vadd.f32 %v3715_v46, %v3646_v48 }
 0xf92   :  { %v6750_v18 = vadd.f32 %v3742_v25, %v6536_v55  ;;  %v6753_v51 = vadd.f32 %v3771_v9, %v6539_v12 }
 0xf93   :  { %v6756_v30 = vadd.f32 %v3687_v20, %v6542_v35  ;;  %v6759_v60 = vadd.f32 %v3716_v1, %v6545_v41 }
 0xf94   :  { %3908 = vmatmul.f32.gmra.mxu2 %v6750_v18  ;;  %3937 = vmatmul.f32.gmra.mxu3 %v6753_v51 }
 0xf95   :  { %3853 = vmatmul.f32.gmra.mxu0 %v6756_v30  ;;  %3882 = vmatmul.f32.gmra.mxu1 %v6759_v60 }
 0xf97   :  { %v3744_v6 = vpop.f32.mrf.mxu2  ;;  %v3773_v55 = vpop.f32.mrf.mxu3 }
 0xf98   :  { %v3745_v26 = vadd.f32 %v3744_v6, %v3646_v48  ;;  %v3774_v54 = vadd.f32 %v3773_v55, %v3646_v48 }
 0xf9a   :  { %v6766_v12 = vadd.f32 %v3745_v26, %v6552_v62  ;;  %v6769_v35 = vadd.f32 %v3774_v54, %v6555_v45 }
 0xf9c   :  { %3911 = vmatmul.f32.gmra.mxu2 %v6766_v12  ;;  %3940 = vmatmul.f32.gmra.mxu3 %v6769_v35 }
 0xffa   :  { %v3845_v41 = vpop.f32.mrf.mxu0  ;;  %v3874_v33 = vpop.f32.mrf.mxu1 }
0x1002   :  { %v3848_v28 = vpop.f32.mrf.mxu0  ;;  %v3877_v50 = vpop.f32.mrf.mxu1 }
0x1007   :  { %v3903_v3 = vpop.f32.mrf.mxu2  ;;  %v3932_v22 = vpop.f32.mrf.mxu3 }
0x100a   :  { %v3851_v36 = vpop.f32.mrf.mxu0  ;;  %v3880_v52 = vpop.f32.mrf.mxu1 }
0x100f   :  { %v3906_v17 = vpop.f32.mrf.mxu2  ;;  %v3935_v11 = vpop.f32.mrf.mxu3 }
0x1012   :  { %v3854_v39 = vpop.f32.mrf.mxu0  ;;  %v3883_v62 = vpop.f32.mrf.mxu1 }
0x1013   :  { %3968 = vmatpush.msrb.mxu0 %v3854_v39  ;;  %3997 = vmatpush.msrb.mxu1 %v3883_v62 }
0x1015   :  { %3969 = vmatpush.msrb.mxu0 %v3851_v36  ;;  %3998 = vmatpush.msrb.mxu1 %v3880_v52 }
0x1017   :  { %v3909_v45 = vpop.f32.mrf.mxu2  ;;  %v3938_v5 = vpop.f32.mrf.mxu3  ;;  %3970 = vmatpush.msrb.mxu0 %v3848_v28  ;;  %3999 = vmatpush.msrb.mxu1 %v3877_v50 }
0x1019   :  { %3971 = vmatpush.msrb.mxu0 %v3845_v41  ;;  %4000 = vmatpush.msrb.mxu1 %v3874_v33 }
0x101a   :  { %4715 = vmatmul.msk.f32.vlgmr.msrb.gmra.mxu0 %vm1007_vm14, %v3808_v59  ;;  %4719 = vmatmul.msk.f32.vlgmr.msrb.gmra.mxu1 %vm1007_vm14, %v3808_v59 }
0x101f   :  { %v3912_v43 = vpop.f32.mrf.mxu2  ;;  %v3941_v24 = vpop.f32.mrf.mxu3 }
0x1020   :  { %4026 = vmatpush.msrb.mxu2 %v3912_v43  ;;  %4055 = vmatpush.msrb.mxu3 %v3941_v24 }
0x1022   :  { %4027 = vmatpush.msrb.mxu2 %v3909_v45  ;;  %4056 = vmatpush.msrb.mxu3 %v3938_v5 }
0x1023   :  { %4716 = vmatmul.msk.f32.gmra.mxu0 %vm1007_vm14, %v3809_v27  ;;  %4720 = vmatmul.msk.f32.gmra.mxu1 %vm1007_vm14, %v3809_v27 }
0x1024   :  { %4028 = vmatpush.msrb.mxu2 %v3906_v17  ;;  %4057 = vmatpush.msrb.mxu3 %v3935_v11 }
0x1026   :  { %4029 = vmatpush.msrb.mxu2 %v3903_v3  ;;  %4058 = vmatpush.msrb.mxu3 %v3932_v22 }
0x1027   :  { %4723 = vmatmul.msk.f32.vlgmr.msrb.gmra.mxu2 %vm1007_vm14, %v3808_v59  ;;  %4727 = vmatmul.msk.f32.vlgmr.msrb.gmra.mxu3 %vm1007_vm14, %v3808_v59 }
0x102b   :  { %4717 = vmatmul.msk.f32.gmra.mxu0 %vm1007_vm14, %v3810_v37  ;;  %4721 = vmatmul.msk.f32.gmra.mxu1 %vm1007_vm14, %v3810_v37 }
0x102f   :  { %4724 = vmatmul.msk.f32.gmra.mxu2 %vm1007_vm14, %v3809_v27  ;;  %4728 = vmatmul.msk.f32.gmra.mxu3 %vm1007_vm14, %v3809_v27 }
0x1033   :  { %4718 = vmatmul.msk.f32.gmra.mxu0 %vm1007_vm14, %v3811_v8  ;;  %4722 = vmatmul.msk.f32.gmra.mxu1 %vm1007_vm14, %v3811_v8 }
0x1037   :  { %4725 = vmatmul.msk.f32.gmra.mxu2 %vm1007_vm14, %v3810_v37  ;;  %4729 = vmatmul.msk.f32.gmra.mxu3 %vm1007_vm14, %v3810_v37 }
0x103f   :  { %4726 = vmatmul.msk.f32.gmra.mxu2 %vm1007_vm14, %v3811_v8  ;;  %4730 = vmatmul.msk.f32.gmra.mxu3 %vm1007_vm14, %v3811_v8 }
0x1097   :  { %v6789_v32 = vpop.f32.mrf.mxu0  ;;  %v6791_v61 = vpop.f32.mrf.mxu1 }
0x1098   :  { %v4096_v54 = vmul.f32 %v6789_v32, %v6789_v32  ;;  %v4097_v41 = vmul.f32 %v6791_v61, %v6791_v61  ;;  %v4072_v37 = vadd.f32 %v6791_v61, %v6789_v32 }
0x109a   :  { %v4112_v45 = vadd.f32 %v4097_v41, %v4096_v54 }
0x10a0   :  { %v6793_v29 = vpop.f32.mrf.mxu0  ;;  %v6795_v42 = vpop.f32.mrf.mxu1 }
0x10a1   :  { %v4077_v38 = vadd.f32 %v6795_v42, %v6793_v29  ;;  %v4100_v33 = vmul.f32 %v6793_v29, %v6793_v29  ;;  %v4101_v28 = vmul.f32 %v6795_v42, %v6795_v42 }
0x10a3   :  { %v4117_v5 = vadd.f32 %v4101_v28, %v4100_v33 }
0x10a8   :  { %v6803_v31 = vpop.f32.mrf.mxu0  ;;  %v6805_v23 = vpop.f32.mrf.mxu1 }
0x10a9   :  { %v4082_v10 = vadd.f32 %v6805_v23, %v6803_v31  ;;  %v4104_v63 = vmul.f32 %v6803_v31, %v6803_v31  ;;  %v4105_v48 = vmul.f32 %v6805_v23, %v6805_v23 }
0x10aa   :  { %v6797_v44 = vpop.f32.mrf.mxu2  ;;  %v6799_v40 = vpop.f32.mrf.mxu3 }
0x10ab   :  { %v4122_v46 = vadd.f32 %v4105_v48, %v4104_v63  ;;  %v4098_v62 = vmul.f32 %v6797_v44, %v6797_v44  ;;  %v4073_v63 = vadd.f32 %v4072_v37, %v6797_v44 }
0x10b0   :  { %v6819_v4 = vpop.f32.mrf.mxu0  ;;  %v6821_v19 = vpop.f32.mrf.mxu1 }
0x10b1   :  { %v4108_v6 = vmul.f32 %v6819_v4, %v6819_v4  ;;  %v4109_v55 = vmul.f32 %v6821_v19, %v6821_v19  ;;  %v4087_v26 = vadd.f32 %v6821_v19, %v6819_v4 }
0x10b2   :  { %v6807_v16 = vpop.f32.mrf.mxu2  ;;  %v6809_v2 = vpop.f32.mrf.mxu3 }
0x10b3   :  { %v4078_v15 = vadd.f32 %v4077_v38, %v6807_v16  ;;  %v4127_v22 = vadd.f32 %v4109_v55, %v4108_v6  ;;  %v4102_v59 = vmul.f32 %v6807_v16, %v6807_v16  ;;  %v4099_v38 = vmul.f32 %v6799_v40, %v6799_v40 }
0x10b5   :  { %v4079_v13 = vadd.f32 %v4078_v15, %v6809_v2  ;;  %v4113_v15 = vadd.f32 %v4112_v45, %v4098_v62 }
0x10b7   :  { %4080 = vadd.xlane.f32.xlu2 %v4079_v13  ;;  %v4103_v13 = vmul.f32 %v6809_v2, %v6809_v2  ;;  %v4114_v48 = vadd.f32 %v4113_v15, %v4099_v38 }
0x10ba   :  { %v6823_v25 = vpop.f32.mrf.mxu2  ;;  %v6825_v9 = vpop.f32.mrf.mxu3 }
0x10bb   :  { %v4083_v21 = vadd.f32 %v4082_v10, %v6823_v25  ;;  %v4106_v20 = vmul.f32 %v6823_v25, %v6823_v25  ;;  %v4107_v50 = vmul.f32 %v6825_v9, %v6825_v9  ;;  %v4118_v10 = vadd.f32 %v4117_v5, %v4102_v59 }
0x10bd   :  { %v4084_v1 = vadd.f32 %v4083_v21, %v6825_v9  ;;  %v4123_v3 = vadd.f32 %v4122_v46, %v4106_v20  ;;  %v4119_v21 = vadd.f32 %v4118_v10, %v4103_v13  ;;  %v4074_v46 = vadd.f32 %v4073_v63, %v6799_v40 }
0x10bf   :  { %4085 = vadd.xlane.f32.xlu1 %v4084_v1  ;;  %v4124_v43 = vadd.f32 %v4123_v3, %v4107_v50 }
0x10c2   :  { %v6847_v36 = vpop.f32.mrf.mxu2  ;;  %v6849_v52 = vpop.f32.mrf.mxu3 }
0x10c3   :  { %v4110_v17 = vmul.f32 %v6847_v36, %v6847_v36  ;;  %v4088_v11 = vadd.f32 %v4087_v26, %v6847_v36  ;;  %v4111_v39 = vmul.f32 %v6849_v52, %v6849_v52 }
0x10c5   :  { %v4089_v24 = vadd.f32 %v4088_v11, %v6849_v52  ;;  %v4128_v27 = vadd.f32 %v4127_v22, %v4110_v17 }
0x10c7   :  { %4125 = vadd.xlane.f32.xlu1 %v4124_v43  ;;  %4090 = vadd.xlane.f32.xlu2 %v4089_v24  ;;  %v4129_v8 = vadd.f32 %v4128_v27, %v4111_v39 }
0x10c9   :  { %4130 = vadd.xlane.f32.xlu0 %v4129_v8 }
0x10cf   :  { %4115 = vadd.xlane.f32.xlu1 %v4114_v48  ;;  %4120 = vadd.xlane.f32.xlu2 %v4119_v21 }
0x10d1   :  { %4075 = vadd.xlane.f32.xlu0 %v4074_v46 }
0x112a   :  { %v4081_v20 = vpop.xlane.xlu2 %4080 }
0x112b   :  { %v6873_v17 = vmul.f32 0.0026041667, %v4081_v20 }
0x112d   :  { %v4137_v5 = vmul.f32 %v6873_v17, %v6873_v17 }
0x1132   :  { %v4086_v1 = vpop.xlane.xlu1 %4085 }
0x1133   :  { %v6869_v6 = vmul.f32 0.0026041667, %v4086_v1 }
0x1135   :  { %v4138_v54 = vmul.f32 %v6869_v6, %v6869_v6 }
0x113a   :  { %v4126_v55 = vpop.xlane.xlu1 %4125  ;;  %v4091_v26 = vpop.xlane.xlu2 %4090 }
0x113b   :  { %v4134_v41 = vmul.f32 0.0026041667, %v4126_v55  ;;  %v4095_v33 = vmul.f32 0.0026041667, %v4091_v26 }
0x113c   :  { %v4131_v28 = vpop.xlane.xlu0 %4130 }
0x113d   :  { %v4142_v50 = vsub.f32 %v4134_v41, %v4138_v54  ;;  %v4139_v3 = vmul.f32 %v4095_v33, %v4095_v33  ;;  %v4135_v22 = vmul.f32 0.0026041667, %v4131_v28 }
0x113f   :  { %v4146_v11 = vadd.f32 1e-05, %v4142_v50  ;;  %v4143_v39 = vsub.f32 %v4135_v22, %v4139_v3  ;;  %v3814_v3 = vld [vmem:[%s7015_s30 + $0x10] sm:$0xff] }
0x1141   :  { %4846 = vrsqrt.f32 %v4146_v11  ;;  %v4147_v62 = vadd.f32 1e-05, %v4143_v39  ;;  %vm4174_vm3 = vweird.f32 %v4146_v11 }
0x1142   :  { %v4121_v45 = vpop.xlane.xlu2 %4120  ;;  %v4116_v43 = vpop.xlane.xlu1 %4115 }
0x1143   :  { %4848 = vrsqrt.f32 %v4147_v62  ;;  %v4133_v59 = vmul.f32 0.0026041667, %v4121_v45  ;;  %v4132_v38 = vmul.f32 0.0026041667, %v4116_v43  ;;  %vm4184_vm6 = vweird.f32 %v4147_v62 }
0x1144   :  { %v4076_v24 = vpop.xlane.xlu0 %4075 }
0x1145   :  { %v4141_v27 = vsub.f32 %v4133_v59, %v4137_v5  ;;  %v6877_v37 = vmul.f32 0.0026041667, %v4076_v24  ;;  %v3815_v59 = vld [vmem:[%s7015_s30 + $0x18] sm:$0xff] }
0x1147   :  { %v4847_v8 = vpop.eup %4846  ;;  %v4145_v15 = vadd.f32 1e-05, %v4141_v27  ;;  %v4136_v13 = vmul.f32 %v6877_v37, %v6877_v37 }
0x1148   :  { %v4169_v10 = vmul.f32 %v4847_v8, %v4146_v11  ;;  %vm4175_vm2 = vweird.f32 %v4847_v8 }
0x1149   :  { %v4849_v63 = vpop.eup %4848  ;;  %4850 = vrsqrt.f32 %v4145_v15  ;;  %v4140_v48 = vsub.f32 %v4132_v38, %v4136_v13  ;;  %vm4176_vm5 = vmor %vm4174_vm3, %vm4175_vm2  ;;  %vm4164_vm9 = vweird.f32 %v4145_v15 }
0x114a   :  { %v4170_v21 = vmul.f32 %v4847_v8, %v4169_v10  ;;  %v4179_v46 = vmul.f32 %v4849_v63, %v4147_v62  ;;  %vm4185_vm4 = vweird.f32 %v4849_v63 }
0x114b   :  { %v4144_v20 = vadd.f32 1e-05, %v4140_v48  ;;  %vm4186_vm7 = vmor %vm4184_vm6, %vm4185_vm4 }
0x114c   :  { %v4171_v1 = vmul.f32 0.5, %v4170_v21  ;;  %v4180_v55 = vmul.f32 %v4849_v63, %v4179_v46  ;;  %v3819_v21 = vld [vmem:[%s5400_s25 + $0x18] sm:$0xff] }
0x114d   :  { %4852 = vrsqrt.f32 %v4144_v20  ;;  %vm4154_vm12 = vweird.f32 %v4144_v20 }
0x114e   :  { %v4172_v26 = vsub.f32 1.5, %v4171_v1  ;;  %v4181_v54 = vmul.f32 0.5, %v4180_v55  ;;  %v3818_v1 = vld [vmem:[%s5400_s25 + $0x10] sm:$0xff]  ;;  %v3813_v55 = vld [vmem:[%s7015_s30 + $0x8] sm:$0xff] }
0x114f   :  { %v4851_v41 = vpop.eup %4850 }
0x1150   :  { %v4182_v28 = vsub.f32 1.5, %v4181_v54  ;;  %v4159_v50 = vmul.f32 %v4851_v41, %v4145_v15  ;;  %v4173_v22 = vmul.f32 %v4847_v8, %v4172_v26  ;;  %vm4165_vm8 = vweird.f32 %v4851_v41  ;;  %v3817_v15 = vld [vmem:[%s5400_s25 + $0x8] sm:$0xff] }
0x1151   :  { %vm4166_vm10 = vmor %vm4164_vm9, %vm4165_vm8 }
0x1152   :  { %v4183_v39 = vmul.f32 %v4849_v63, %v4182_v28  ;;  %v4160_v45 = vmul.f32 %v4851_v41, %v4159_v50  ;;  %v4177_v5 = vsel %vm4176_vm5, %v4847_v8, %v4173_v22  ;;  %v3812_v22 = vld [vmem:[%s7015_s30] sm:$0xff] }
0x1153   :  { %v4853_v43 = vpop.eup %4852  ;;  %v4190_v24 = vmul.f32 %v4177_v5, %v3814_v3  ;;  %v3816_v5 = vld [vmem:[%s5400_s25] sm:$0xff]  ;;  %s5209_s25 = smov [#allocation20]  }
0x1154   :  { %v4161_v27 = vmul.f32 0.5, %v4160_v45  ;;  %v4149_v38 = vmul.f32 %v4853_v43, %v4144_v20  ;;  %v4187_v11 = vsel %vm4186_vm7, %v4849_v63, %v4183_v39  ;;  %vm4155_vm11 = vweird.f32 %v4853_v43  ;;  %v3825_v20 = vld [vmem:[%s5410_s8 + $0x8] sm:$0xff] }
0x1155   :  { %4212 = vperm.xlu2 %4804, %v4190_v24   ;;  %v4191_v13 = vmul.f32 %v4187_v11, %v3815_v59  ;;  %v4194_v62 = vmul.f32 %v4190_v24, %v6869_v6  ;;  %vm4156_vm13 = vmor %vm4154_vm12, %vm4155_vm11 }
0x1156   :  { %v4162_v10 = vsub.f32 1.5, %v4161_v27  ;;  %v4150_v48 = vmul.f32 %v4853_v43, %v4149_v38  ;;  %v3826_v27 = vld [vmem:[%s5410_s8 + $0x10] sm:$0xff]  ;;  %v3824_v38 = vld [vmem:[%s5410_s8] sm:$0xff] }
0x1157   :  { %v4195_v46 = vmul.f32 %v4191_v13, %v4095_v33  ;;  %v4198_v50 = vsub.f32 %v3818_v1, %v4194_v62 }
0x1158   :  { %v4151_v8 = vmul.f32 0.5, %v4150_v48  ;;  %v4163_v26 = vmul.f32 %v4851_v41, %v4162_v10 }
0x1159   :  { %v4199_v54 = vsub.f32 %v3819_v21, %v4195_v46 }
0x115a   :  { %v4152_v28 = vsub.f32 1.5, %v4151_v8  ;;  %v4167_v63 = vsel %vm4166_vm10, %v4851_v41, %v4163_v26 }
0x115b   :  { %4253 = vperm.xlu1 %4805, %v4199_v54   ;;  %v4189_v3 = vmul.f32 %v4167_v63, %v3813_v55 }
0x115c   :  { %v4153_v39 = vmul.f32 %v4853_v43, %v4152_v28 }
0x115d   :  { %4248 = vperm.xlu2 %4804, %v4198_v50   ;;  %4207 = vperm.xlu0 %4803, %v4189_v3   ;;  %v4193_v6 = vmul.f32 %v4189_v3, %v6873_v17  ;;  %v3827_v17 = vld [vmem:[%s5410_s8 + $0x18] sm:$0xff]  ;;  %s4472_s8 = sshll.u32 %s5209_s25, 4  ;;  %s4473_s8 = int_to_ptr.vmem [resolvable:$true] %s4472_s8 }
0x115e   :  { %v4157_v33 = vsel %vm4156_vm13, %v4853_v43, %v4153_v39 }
0x115f   :  { %v4188_v45 = vmul.f32 %v4157_v33, %v3812_v22  ;;  %v4197_v59 = vsub.f32 %v3817_v15, %v4193_v6 }
0x1161   :  { %v4192_v41 = vmul.f32 %v4188_v45, %v6877_v37 }
0x1163   :  { %4243 = vperm.xlu1 %4805, %v4197_v59   ;;  %v4196_v24 = vsub.f32 %v3816_v5, %v4192_v41 }
0x1165   :  { %4238 = vperm.xlu2 %4804, %v4196_v24   ;;  %4217 = vperm.xlu0 %4803, %v4191_v13  }
0x116b   :  { %4295 = vperm.xlu1 %4805, %v3825_v20  }
0x116d   :  { %4300 = vperm.xlu2 %4804, %v3826_v27   ;;  %4202 = vperm.xlu0 %4803, %v4188_v45  }
0x1175   :  { %4290 = vperm.xlu0 %4803, %v3824_v38  }
0x117d   :  { %4305 = vperm.xlu0 %4803, %v3827_v17  }
0x11af   :  { %v4213_v43 = vpop.permute.xlu2 %4212 }
0x11b0   :  { %v4228_v37 = vmul.f32 %v4213_v43, %v6803_v31  ;;  %v4229_v21 = vmul.f32 %v4213_v43, %v6805_v23  ;;  %v4230_v46 = vmul.f32 %v4213_v43, %v6823_v25  ;;  %v4231_v13 = vmul.f32 %v4213_v43, %v6825_v9 }
0x11b7   :  { %v4249_v48 = vpop.permute.xlu2 %4248 }
0x11b8   :  { %v4264_v8 = vadd.f32 %v4249_v48, %v4228_v37  ;;  %v4265_v31 = vadd.f32 %v4249_v48, %v4229_v21  ;;  %v4266_v50 = vadd.f32 %v4249_v48, %v4230_v46  ;;  %v4267_v23 = vadd.f32 %v4249_v48, %v4231_v13 }
0x11ba   :  { %v4280_v5 = vmax.f32 %v4264_v8, 0.0  ;;  %v4281_v24 = vmax.f32 %v4265_v31, 0.0  ;;  %v4283_v20 = vmax.f32 %v4267_v23, 0.0  ;;  %v3821_v8 = vld [vmem:[#allocation19 + $0x8] sm:$0xff] }
0x11bf   :  { %v4239_v43 = vpop.permute.xlu2 %4238 }
0x11cd   :  { %v4254_v11 = vpop.permute.xlu1 %4253 }
0x11cf   :  { %v4208_v10 = vpop.permute.xlu0 %4207 }
0x11d0   :  { %v4224_v63 = vmul.f32 %v4208_v10, %v6793_v29  ;;  %v4225_v39 = vmul.f32 %v4208_v10, %v6795_v42  ;;  %v4226_v6 = vmul.f32 %v4208_v10, %v6807_v16  ;;  %v4282_v42 = vmax.f32 %v4266_v50, 0.0 }
0x11d5   :  { %v4244_v1 = vpop.permute.xlu1 %4243 }
0x11d6   :  { %v4261_v45 = vadd.f32 %v4244_v1, %v4225_v39  ;;  %v4262_v29 = vadd.f32 %v4244_v1, %v4226_v6 }
0x11d7   :  { %v4218_v62 = vpop.permute.xlu0 %4217 }
0x11d8   :  { %v4232_v55 = vmul.f32 %v4218_v62, %v6819_v4  ;;  %v4233_v26 = vmul.f32 %v4218_v62, %v6821_v19  ;;  %v4234_v54 = vmul.f32 %v4218_v62, %v6847_v36  ;;  %v4235_v28 = vmul.f32 %v4218_v62, %v6849_v52  ;;  %v3820_v62 = vld [vmem:[#allocation19] sm:$0xff] }
0x11d9   :  { %v4227_v4 = vmul.f32 %v4208_v10, %v6809_v2  ;;  %v4260_v19 = vadd.f32 %v4244_v1, %v4224_v63  ;;  %v4278_v10 = vmax.f32 %v4262_v29, 0.0 }
0x11da   :  { %v4268_v3 = vadd.f32 %v4254_v11, %v4232_v55  ;;  %v4269_v25 = vadd.f32 %v4254_v11, %v4233_v26  ;;  %v4270_v22 = vadd.f32 %v4254_v11, %v4234_v54  ;;  %v4271_v9 = vadd.f32 %v4254_v11, %v4235_v28  ;;  %v3823_v55 = vld [vmem:[#allocation19 + $0x18] sm:$0xff] }
0x11db   :  { %v4263_v41 = vadd.f32 %v4244_v1, %v4227_v4  ;;  %v4276_v16 = vmax.f32 %v4260_v19, 0.0  ;;  %v4277_v11 = vmax.f32 %v4261_v45, 0.0  ;;  %v3822_v1 = vld [vmem:[#allocation19 + $0x10] sm:$0xff] }
0x11dc   :  { %v4284_v33 = vmax.f32 %v4268_v3, 0.0  ;;  %v4285_v36 = vmax.f32 %v4269_v25, 0.0  ;;  %v4286_v15 = vmax.f32 %v4270_v22, 0.0  ;;  %v4287_v52 = vmax.f32 %v4271_v9, 0.0 }
0x11dd   :  { %v4279_v48 = vmax.f32 %v4263_v41, 0.0  ;;  %v4296_v3 = vpop.permute.xlu1 %4295 }
0x11de   :  { %4332 = vmatpush.msra.mxu0 %v4284_v33  ;;  %4361 = vmatpush.msra.mxu1 %v4285_v36 }
0x11df   :  { %4390 = vmatpush.msra.mxu2 %v4286_v15  ;;  %4419 = vmatpush.msra.mxu3 %v4287_v52  ;;  %v4203_v59 = vpop.permute.xlu0 %4202 }
0x11e0   :  { %v4220_v2 = vmul.f32 %v4203_v59, %v6789_v32  ;;  %v4221_v27 = vmul.f32 %v4203_v59, %v6791_v61  ;;  %v4222_v38 = vmul.f32 %v4203_v59, %v6797_v44  ;;  %v4223_v17 = vmul.f32 %v4203_v59, %v6799_v40  ;;  %4333 = vmatpush.msra.mxu0 %v4280_v5 }
0x11e1   :  { %4362 = vmatpush.msra.mxu1 %v4281_v24  ;;  %4391 = vmatpush.msra.mxu2 %v4282_v42 }
0x11e2   :  { %4420 = vmatpush.msra.mxu3 %v4283_v20  ;;  %4334 = vmatpush.msra.mxu0 %v4276_v16  ;;  %v4256_v37 = vadd.f32 %v4239_v43, %v4220_v2  ;;  %v4257_v21 = vadd.f32 %v4239_v43, %v4221_v27  ;;  %v4258_v46 = vadd.f32 %v4239_v43, %v4222_v38 }
0x11e3   :  { %4363 = vmatpush.msra.mxu1 %v4277_v11  ;;  %4392 = vmatpush.msra.mxu2 %v4278_v10  ;;  %v4259_v32 = vadd.f32 %v4239_v43, %v4223_v17 }
0x11e4   :  { %4421 = vmatpush.msra.mxu3 %v4279_v48  ;;  %v4272_v61 = vmax.f32 %v4256_v37, 0.0  ;;  %v4273_v44 = vmax.f32 %v4257_v21, 0.0  ;;  %v4274_v13 = vmax.f32 %v4258_v46, 0.0 }
0x11e5   :  { %v4275_v40 = vmax.f32 %v4259_v32, 0.0 }
0x11e6   :  { %4335 = vmatpush.msra.mxu0 %v4272_v61  ;;  %4364 = vmatpush.msra.mxu1 %v4273_v44 }
0x11e7   :  { %4393 = vmatpush.msra.mxu2 %v4274_v13  ;;  %4422 = vmatpush.msra.mxu3 %v4275_v40  ;;  %v4291_v26 = vpop.permute.xlu0 %4290 }
0x11e8   :  { %4731 = vmatmul.msk.f32.vlgmr.msra.gmra.mxu0 %vm1007_vm14, %v3820_v62  ;;  %4735 = vmatmul.msk.f32.vlgmr.msra.gmra.mxu1 %vm1007_vm14, %v3820_v62 }
0x11e9   :  { %4739 = vmatmul.msk.f32.vlgmr.msra.gmra.mxu2 %vm1007_vm14, %v3820_v62  ;;  %4743 = vmatmul.msk.f32.vlgmr.msra.gmra.mxu3 %vm1007_vm14, %v3820_v62 }
0x11ef   :  { %v4306_v16 = vpop.permute.xlu0 %4305 }
0x11f0   :  { %4732 = vmatmul.msk.f32.gmra.mxu0 %vm1007_vm14, %v3821_v8  ;;  %4736 = vmatmul.msk.f32.gmra.mxu1 %vm1007_vm14, %v3821_v8 }
0x11f1   :  { %4740 = vmatmul.msk.f32.gmra.mxu2 %vm1007_vm14, %v3821_v8  ;;  %4744 = vmatmul.msk.f32.gmra.mxu3 %vm1007_vm14, %v3821_v8 }
0x11f8   :  { %4733 = vmatmul.msk.f32.gmra.mxu0 %vm1007_vm14, %v3822_v1  ;;  %4737 = vmatmul.msk.f32.gmra.mxu1 %vm1007_vm14, %v3822_v1 }
0x11f9   :  { %4741 = vmatmul.msk.f32.gmra.mxu2 %vm1007_vm14, %v3822_v1  ;;  %4745 = vmatmul.msk.f32.gmra.mxu3 %vm1007_vm14, %v3822_v1 }
0x1200   :  { %4734 = vmatmul.msk.f32.gmra.mxu0 %vm1007_vm14, %v3823_v55  ;;  %4738 = vmatmul.msk.f32.gmra.mxu1 %vm1007_vm14, %v3823_v55 }
0x1201   :  { %4742 = vmatmul.msk.f32.gmra.mxu2 %vm1007_vm14, %v3823_v55  ;;  %4746 = vmatmul.msk.f32.gmra.mxu3 %vm1007_vm14, %v3823_v55 }
0x1265   :  { %v4337_v54 = vpop.f32.mrf.mxu0  ;;  %v4366_v28 = vpop.f32.mrf.mxu1 }
0x1266   :  { %v4338_v63 = vadd.f32 %v4337_v54, %v4291_v26  ;;  %v4367_v31 = vadd.f32 %v4366_v28, %v4291_v26 }
0x1268   :  { %v4436_v50 = vadd.f32 %v4338_v63, %v6710_v0  ;;  %v4437_v23 = vadd.f32 %v4367_v31, %v6713_v7  ;;  %v4301_v7 = vpop.permute.xlu2 %4300 }
0x126a   :  { %4452 = vst [vmem:[#allocation20] sm:$0xff] %v4436_v50 }
0x126b   :  { %4453 = vst [vmem:[#allocation20 + $0x8] sm:$0xff] %v4437_v23 }
0x126c   :  { %v4395_v25 = vpop.f32.mrf.mxu2  ;;  %v4424_v22 = vpop.f32.mrf.mxu3 }
0x126d   :  { %v4396_v9 = vadd.f32 %v4395_v25, %v4291_v26  ;;  %v4425_v39 = vadd.f32 %v4424_v22, %v4291_v26  ;;  %v4340_v6 = vpop.f32.mrf.mxu0  ;;  %v4369_v4 = vpop.f32.mrf.mxu1 }
0x126e   :  { %v4341_v19 = vadd.f32 %v4340_v6, %v4296_v3  ;;  %v4370_v33 = vadd.f32 %v4369_v4, %v4296_v3 }
0x126f   :  { %v4438_v36 = vadd.f32 %v4396_v9, %v6718_v49  ;;  %v4439_v15 = vadd.f32 %v4425_v39, %v6721_v34 }
0x1270   :  { %v4440_v52 = vadd.f32 %v4341_v19, %v6724_v58  ;;  %v4441_v0 = vadd.f32 %v4370_v33, %v6727_v57 }
0x1271   :  { %4454 = vst [vmem:[#allocation20 + $0x10] sm:$0xff] %v4438_v36 }
0x1272   :  { %4455 = vst [vmem:[#allocation20 + $0x18] sm:$0xff] %v4439_v15 }
0x1273   :  { %4456 = vst [vmem:[#allocation20 + $0x20] sm:$0xff] %v4440_v52 }
0x1274   :  { %4457 = vst [vmem:[#allocation20 + $0x28] sm:$0xff] %v4441_v0  ;;  %v4398_v45 = vpop.f32.mrf.mxu2  ;;  %v4427_v29 = vpop.f32.mrf.mxu3 }
0x1275   :  { %v4399_v5 = vadd.f32 %v4398_v45, %v4296_v3  ;;  %v4428_v41 = vadd.f32 %v4427_v29, %v4296_v3  ;;  %v4343_v59 = vpop.f32.mrf.mxu0  ;;  %v4372_v24 = vpop.f32.mrf.mxu1 }
0x1276   :  { %v4344_v42 = vadd.f32 %v4343_v59, %v4301_v7  ;;  %v4373_v20 = vadd.f32 %v4372_v24, %v4301_v7 }
0x1277   :  { %v4442_v49 = vadd.f32 %v4399_v5, %v6734_v56  ;;  %v4443_v34 = vadd.f32 %v4428_v41, %v6737_v53 }
0x1278   :  { %v4444_v58 = vadd.f32 %v4344_v42, %v6740_v14  ;;  %v4445_v57 = vadd.f32 %v4373_v20, %v6743_v47 }
0x1279   :  { %4458 = vst [vmem:[#allocation20 + $0x30] sm:$0xff] %v4442_v49 }
0x127a   :  { %4459 = vst [vmem:[#allocation20 + $0x38] sm:$0xff] %v4443_v34 }
0x127b   :  { %4460 = vst [vmem:[#allocation20 + $0x40] sm:$0xff] %v4444_v58 }
0x127c   :  { %4461 = vst [vmem:[#allocation20 + $0x48] sm:$0xff] %v4445_v57  ;;  %v4401_v2 = vpop.f32.mrf.mxu2  ;;  %v4430_v27 = vpop.f32.mrf.mxu3 }
0x127d   :  { %v4402_v38 = vadd.f32 %v4401_v2, %v4301_v7  ;;  %v4431_v17 = vadd.f32 %v4430_v27, %v4301_v7  ;;  %v4346_v43 = vpop.f32.mrf.mxu0  ;;  %v4375_v11 = vpop.f32.mrf.mxu1 }
0x127e   :  { %v4347_v10 = vadd.f32 %v4346_v43, %v4306_v16  ;;  %v4376_v56 = vadd.f32 %v4375_v11, %v4306_v16 }
0x127f   :  { %v4446_v53 = vadd.f32 %v4402_v38, %v6750_v18  ;;  %v4447_v14 = vadd.f32 %v4431_v17, %v6753_v51 }
0x1280   :  { %v4448_v47 = vadd.f32 %v4347_v10, %v6756_v30  ;;  %v4449_v48 = vadd.f32 %v4376_v56, %v6759_v60 }
0x1281   :  { %4462 = vst [vmem:[#allocation20 + $0x50] sm:$0xff] %v4446_v53 }
0x1282   :  { %4463 = vst [vmem:[#allocation20 + $0x58] sm:$0xff] %v4447_v14 }
0x1283   :  { %4464 = vst [vmem:[#allocation20 + $0x60] sm:$0xff] %v4448_v47 }
0x1284   :  { %4465 = vst [vmem:[#allocation20 + $0x68] sm:$0xff] %v4449_v48  ;;  %v4404_v37 = vpop.f32.mrf.mxu2  ;;  %v4433_v21 = vpop.f32.mrf.mxu3 }
0x1285   :  { %v4405_v46 = vadd.f32 %v4404_v37, %v4306_v16  ;;  %v4434_v32 = vadd.f32 %v4433_v21, %v4306_v16 }
0x1287   :  { %v4450_v18 = vadd.f32 %v4405_v46, %v6766_v12  ;;  %v4451_v51 = vadd.f32 %v4434_v32, %v6769_v35 }
0x1289   :  { %4466 = vst [vmem:[#allocation20 + $0x70] sm:$0xff] %v4450_v18 }
0x128a   :  { %4467 = vst [vmem:[#allocation20 + $0x78] sm:$0xff] %v4451_v51 }
0x128b   :  { %5141 = shalt.err (!%p5138_p3)
}
0x128c   :  { %s5210_s26 = smov 512   ;;  %s5211_s14 = smov 32  }
0x128d   :  { %4480 = dma.vmem_to_hbm [thread:$0]  %s4473_s8, 2048, %s4475_s18, [#allocation4], %s5210_s26, %s5210_s26, %s5211_s14  }
0x128e   :  { %5154 = dma.done.wait [#allocation4], 2048  }
0x128f   :  { %5155 = vsyncadd [#allocation4], 4294965248 }
0x1290   :  { %4485 = vsyncpa [#allocation3], 1 }
0x1291   :  { %4486 = vsyncpa [#allocation6], 1 }
0x1292   :  { %4487 = vsyncpa [#allocation9], 1 }
0x1293   :  { %4488 = vsyncpa [#allocation12], 1 }
0x1294   :  { %4489 = vsyncpa [#allocation15], 1 }
0x1295   :  { %4490 = vsyncpa [#allocation18], 1 }
0x1296   :  { %4491 = vsyncpa [#allocation4], 1 }

</bundles_post_ra>
